<compile_context>
chip_gen: v7x
topology: tpu7x:2x2x1
jax: 0.10.0
libtpu: 0.0.40
codegen_flags: <defaults>
</compile_context>

<pallas_src>
import functools

import jax
import jax.numpy as jnp
from jax import lax
from jax.experimental import pallas as pl
from jax.experimental.pallas import tpu as pltpu


# ------------------------------ Pallas kernels ------------------------------ #

def _conv4x4_s2_kernel(xe_ref, xo_ref, w_ref, o_ref, *, wo, norm, eps=1e-5):
    """Fused 4x4 / stride-2 conv (+ InstanceNorm) + LeakyReLU, one batch element.

    xe_ref / xo_ref : ((Ho+1)*Wo, 4*Cin) even / odd padded-row phases with the
                      four W-taps folded into channels (index = kj*Cin + c).
    w_ref           : (4, 4*Cin, Cout)   one (K, N) weight slab per H-tap ki.
    o_ref           : (Ho*Wo, Cout)
    """
    m = o_ref.shape[0]                                   # Ho*Wo
    # H-taps ki=0/2 read the even phase at row offsets 0/Wo, ki=1/3 the odd one.
    acc = jnp.dot(xe_ref[pl.ds(0, m), :], w_ref[0],
                  preferred_element_type=jnp.float32)
    acc = acc + jnp.dot(xo_ref[pl.ds(0, m), :], w_ref[1],
                        preferred_element_type=jnp.float32)
    acc = acc + jnp.dot(xe_ref[pl.ds(wo, m), :], w_ref[2],
                        preferred_element_type=jnp.float32)
    acc = acc + jnp.dot(xo_ref[pl.ds(wo, m), :], w_ref[3],
                        preferred_element_type=jnp.float32)
    if norm:                                             # InstanceNorm2d(affine=False)
        mean = jnp.mean(acc, axis=0, keepdims=True)
        var = jnp.mean(jnp.square(acc - mean), axis=0, keepdims=True)
        acc = (acc - mean) * lax.rsqrt(var + eps)
    o_ref[...] = jnp.where(acc >= 0, acc, 0.2 * acc).astype(o_ref.dtype)


def _conv4_out_kernel(xe_ref, xo_ref, w_ref, wout_ref, o_ref, *, wo, eps=1e-5):
    """conv4 + InstanceNorm + LeakyReLU fused with the final 4x4 conv + sigmoid."""
    m = wout_ref.shape[0]                                # Ho*Wo (= 16)
    acc = jnp.dot(xe_ref[pl.ds(0, m), :], w_ref[0],
                  preferred_element_type=jnp.float32)
    acc = acc + jnp.dot(xo_ref[pl.ds(0, m), :], w_ref[1],
                        preferred_element_type=jnp.float32)
    acc = acc + jnp.dot(xe_ref[pl.ds(wo, m), :], w_ref[2],
                        preferred_element_type=jnp.float32)
    acc = acc + jnp.dot(xo_ref[pl.ds(wo, m), :], w_ref[3],
                        preferred_element_type=jnp.float32)
    mean = jnp.mean(acc, axis=0, keepdims=True)
    var = jnp.mean(jnp.square(acc - mean), axis=0, keepdims=True)
    acc = (acc - mean) * lax.rsqrt(var + eps)
    acc = jnp.where(acc >= 0, acc, 0.2 * acc)
    # Final k=4 valid conv on the 4x4 map == full spatial*channel reduction.
    logit = jnp.sum(acc * wout_ref[...].astype(jnp.float32), keepdims=True)  # (1,1)
    o_ref[...] = jax.nn.sigmoid(logit).astype(o_ref.dtype)


# ------------------------------ kernel wrappers ------------------------------ #

def conv4x4_s2(xe, xo, w_taps, *, ho, wo, norm, out_dtype):
    """xe/xo: (B, (Ho+1)*Wo, K), w_taps: (4, K, N) -> (B, Ho*Wo, N)."""
    b, me, k = xe.shape
    n = w_taps.shape[-1]
    m = ho * wo
    kernel = functools.partial(_conv4x4_s2_kernel, wo=wo, norm=norm)
    return pl.pallas_call(
        kernel,
        out_shape=jax.ShapeDtypeStruct((b, m, n), out_dtype),
        grid=(b,),
        in_specs=[
            pl.BlockSpec((None, me, k), lambda i: (i, 0, 0)),
            pl.BlockSpec((None, me, k), lambda i: (i, 0, 0)),
            pl.BlockSpec((4, k, n), lambda i: (0, 0, 0)),      # shared weights
        ],
        out_specs=pl.BlockSpec((None, m, n), lambda i: (i, 0, 0)),
        compiler_params=pltpu.CompilerParams(
            dimension_semantics=("parallel",)),
    )(xe, xo, w_taps)


def conv4_out_fused(xe, xo, w_taps, wout_r, *, ho, wo):
    """conv4 + IN + LeakyReLU + out-conv + sigmoid -> (B, 1, 1) f32."""
    b, me, k = xe.shape
    n = w_taps.shape[-1]
    m = ho * wo
    assert wout_r.shape == (m, n), (wout_r.shape, m, n)
    kernel = functools.partial(_conv4_out_kernel, wo=wo)
    return pl.pallas_call(
        kernel,
        out_shape=jax.ShapeDtypeStruct((b, 1, 1), jnp.float32),
        grid=(b,),
        in_specs=[
            pl.BlockSpec((None, me, k), lambda i: (i, 0, 0)),
            pl.BlockSpec((None, me, k), lambda i: (i, 0, 0)),
            pl.BlockSpec((4, k, n), lambda i: (0, 0, 0)),
            pl.BlockSpec((m, n), lambda i: (0, 0)),
        ],
        out_specs=pl.BlockSpec((None, 1, 1), lambda i: (i, 0, 0)),
        compiler_params=pltpu.CompilerParams(
            dimension_semantics=("parallel",)),
    )(xe, xo, w_taps, wout_r)


# --------------------------------- JAX glue ---------------------------------- #

def stride2_phase_gather(x_nhwc):
    """(B, H, W, C) -> (xe, xo) of shape (B, (Ho+1)*Wo, 4*C) for a k=4/s=2/p=1 conv.

    Pads by 1, folds the four kernel-column taps into the channel dim
    (xw[b, h, ow, kj*C + c] = x_pad[b, h, 2*ow + kj, c]) and splits padded rows
    into even / odd phases, so inside the kernel every kernel-row tap is just a
    contiguous row-slice of a 2-D matrix (no strided access, no 16x im2col).
    """
    xp = jnp.pad(x_nhwc, ((0, 0), (1, 1), (1, 1), (0, 0)))
    b, hp, wp, c = xp.shape
    ho, wo = (hp - 4) // 2 + 1, (wp - 4) // 2 + 1
    cols = jnp.stack([xp[:, :, j:j + 2 * wo:2, :] for j in range(4)], axis=3)
    xw = cols.reshape(b, hp, wo, 4 * c)                  # (B, Hp, Wo, 4C)
    xe = xw[:, 0::2].reshape(b, (ho + 1) * wo, 4 * c)    # even padded rows
    xo = xw[:, 1::2].reshape(b, (ho + 1) * wo, 4 * c)    # odd  padded rows
    return xe, xo, ho, wo


def w_to_taps(w_oihw):
    """(Cout, Cin, 4, 4) -> (4, 4*Cin, Cout); [ki, kj*Cin + c, n] = w[n, c, ki, kj]."""
    cout, cin, kh, kw = w_oihw.shape
    return jnp.transpose(w_oihw, (2, 3, 1, 0)).reshape(kh, kw * cin, cout)


class DiscriminatorPallas:
    """JAX/Pallas equivalent of the PyTorch CGAN Discriminator (inference)."""

    def __init__(self, ndf, image_size, image_channel, n_label=10, key=None,
                 compute_dtype=jnp.bfloat16):
        if image_size != 64:
            raise ValueError("fused out-conv assumes a 4x4 feature map before "
                             "the final layer, i.e. image_size == 64")
        self.ndf = ndf
        self.image_size = image_size
        self.image_channel = image_channel
        self.n_label = n_label
        self.compute_dtype = compute_dtype

        key = jax.random.PRNGKey(0) if key is None else key
        ks = jax.random.split(key, 6)
        init = lambda k, shape: 0.02 * jax.random.normal(k, shape, jnp.float32)
        # Raw conv weights, PyTorch layout (Cout, Cin, KH, KW), all bias=False.
        self.w1x = init(ks[0], (ndf * 1, image_channel, 4, 4))
        self.w1l = init(ks[1], (ndf * 1, n_label, 4, 4))
        self.w2 = init(ks[2], (ndf * 4, ndf * 2, 4, 4))
        self.w3 = init(ks[3], (ndf * 8, ndf * 4, 4, 4))
        self.w4 = init(ks[4], (ndf * 16, ndf * 8, 4, 4))
        self.wout = init(ks[5], (1, ndf * 16, 4, 4))

        # conv1X / conv1L fused into one conv over the concatenated [x, label]
        # channels via a block weight (zeros in the off-diagonal blocks).
        cin1 = image_channel + n_label
        w1 = jnp.zeros((2 * ndf, cin1, 4, 4), jnp.float32)
        w1 = w1.at[:ndf, :image_channel].set(self.w1x)
        w1 = w1.at[ndf:, image_channel:].set(self.w1l)

        # Tap-layout weights, precomputed once, in the compute dtype.
        self.w1_taps = w_to_taps(w1).astype(compute_dtype)
        self.w2_taps = w_to_taps(self.w2).astype(compute_dtype)
        self.w3_taps = w_to_taps(self.w3).astype(compute_dtype)
        self.w4_taps = w_to_taps(self.w4).astype(compute_dtype)
        # Final 4x4 valid conv reshaped to conv4's output layout (Ho*Wo, Cout).
        self.wout_r = jnp.transpose(self.wout, (0, 2, 3, 1)).reshape(16, ndf * 16)

        self._forward = jax.jit(self._forward_impl)

    def _forward_impl(self, x, label):
        if x.shape[1] == 1:
            x = jnp.concatenate([x, x, x], axis=1)
        b = x.shape[0]
        hw = self.image_size
        lab = jnp.broadcast_to(label, (b, self.n_label, hw, hw))
        h = jnp.concatenate([x, lab], axis=1)                       # NCHW
        h = jnp.transpose(h, (0, 2, 3, 1)).astype(self.compute_dtype)  # NHWC

        # conv1X + conv1L (fused): conv(k4,s2,p1) + LeakyReLU(0.2)
        xe, xo, ho, wo = stride2_phase_gather(h)
        h = conv4x4_s2(xe, xo, self.w1_taps, ho=ho, wo=wo, norm=False,
                       out_dtype=self.compute_dtype)
        h = h.reshape(b, ho, wo, 2 * self.ndf)

        # conv2 / conv3: conv(k4,s2,p1) + InstanceNorm + LeakyReLU(0.2)
        for w in (self.w2_taps, self.w3_taps):
            xe, xo, ho, wo = stride2_phase_gather(h)
            h = conv4x4_s2(xe, xo, w, ho=ho, wo=wo, norm=True,
                           out_dtype=self.compute_dtype)
            h = h.reshape(b, ho, wo, -1)

        # conv4 + InstanceNorm + LeakyReLU + out(4x4 valid conv) + sigmoid
        xe, xo, ho, wo = stride2_phase_gather(h)
        o = conv4_out_fused(xe, xo, self.w4_taps, self.wout_r, ho=ho, wo=wo)
        return o.reshape(b, 1, 1, 1)                      # NCHW (== NHWC here)

    def __call__(self, x, label):
        return self._forward(x, label)


# ----------------------------- pure-JAX reference ---------------------------- #

def ref_forward(m, x, label):
    def conv(x, w, s, p):
        return lax.conv_general_dilated(
            x, w, (s, s), [(p, p), (p, p)],
            dimension_numbers=("NCHW", "OIHW", "NCHW"),
            precision=lax.Precision.HIGHEST)

    def lrelu(v):
        return jnp.where(v >= 0, v, 0.2 * v)

    def inorm(v, eps=1e-5):
        mu = jnp.mean(v, axis=(2, 3), keepdims=True)
        var = jnp.mean((v - mu) ** 2, axis=(2, 3), keepdims=True)
        return (v - mu) * lax.rsqrt(var + eps)

    if x.shape[1] == 1:
        x = jnp.concatenate([x, x, x], axis=1)
    l = jnp.broadcast_to(label, (x.shape[0], m.n_label, m.image_size, m.image_size))
    hx = lrelu(conv(x, m.w1x, 2, 1))
    hl = lrelu(conv(l, m.w1l, 2, 1))
    h = jnp.concatenate([hx, hl], axis=1)
    h = lrelu(inorm(conv(h, m.w2, 2, 1)))
    h = lrelu(inorm(conv(h, m.w3, 2, 1)))
    h = lrelu(inorm(conv(h, m.w4, 2, 1)))
    return jax.nn.sigmoid(conv(h, m.wout, 1, 0))


# ------------------------------------ main ------------------------------------ #

if __name__ == "__main__":
    key = jax.random.PRNGKey(0)
    kw, kx, kl = jax.random.split(key, 3)

    # image_size=64 is the architecture's config (final 4x4 valid conv -> 1x1).
    ndf, image_size, image_channel, n_label, B = 8, 64, 3, 10, 2

    x = jax.random.normal(kx, (B, image_channel, image_size, image_size), jnp.float32)
    label = jax.random.normal(kl, (B, n_label, 1, 1), jnp.float32)

    # Primary (performance) path: bf16 matmuls, f32 accumulation / norm.
    model = DiscriminatorPallas(ndf, image_size, image_channel, n_label, key=kw)
    out = jax.block_until_ready(model(x, label))
    assert out.shape == (B, 1, 1, 1), out.shape

    ref = ref_forward(model, x, label)
    assert jnp.allclose(out, ref, atol=5e-2, rtol=5e-2), (out, ref)

    # Tight algorithmic check with an f32 compute path (same kernels, f32 dtype).
    model_f32 = DiscriminatorPallas(ndf, image_size, image_channel, n_label,
                                    key=kw, compute_dtype=jnp.float32)
    out_f32 = jax.block_until_ready(model_f32(x, label))
    assert jnp.allclose(out_f32, ref, atol=1e-3, rtol=1e-3), (out_f32, ref)

    print("KERNEL_OK")
</pallas_src>

<mosaic_0001>
module attributes {stable_mosaic.version = 11 : i64} {
  func.func @_conv4x4_s2_kernel(%arg0: i32, %arg1: memref<1x1056x52xbf16, #tpu.memory_space<vmem>>, %arg2: memref<1x1056x52xbf16, #tpu.memory_space<vmem>>, %arg3: memref<4x52x16xbf16, #tpu.memory_space<vmem>>, %arg4: memref<1x1024x16xbf16, #tpu.memory_space<vmem>>) attributes {dimension_semantics = [#tpu.dimension_semantics<parallel>], iteration_bounds = array<i64: 2>, scalar_prefetch = 0 : i64, scratch_operands = 0 : i64, tpu.core_type = #tpu.core_type<tc>, window_params = [{transform_indices = @transform_0, window_bounds = array<i64: 1, 1056, 52>}, {transform_indices = @transform_1, window_bounds = array<i64: 1, 1056, 52>}, {pipeline_mode = #tpu.pipeline_mode<synchronous>, transform_indices = @transform_2, window_bounds = array<i64: 4, 52, 16>}, {transform_indices = @transform_3, window_bounds = array<i64: 1, 1024, 16>}]} {
    %c0 = arith.constant 0 : index
    %c0_0 = arith.constant 0 : index
    %c0_1 = arith.constant 0 : index
    %0 = vector.load %arg1[%c0, %c0_0, %c0_1] : memref<1x1056x52xbf16, #tpu.memory_space<vmem>>, vector<1x1024x52xbf16>
    %1 = vector.shape_cast %0 : vector<1x1024x52xbf16> to vector<1024x52xbf16>
    %c0_2 = arith.constant 0 : index
    %c0_3 = arith.constant 0 : index
    %c0_4 = arith.constant 0 : index
    %2 = vector.load %arg3[%c0_2, %c0_3, %c0_4] : memref<4x52x16xbf16, #tpu.memory_space<vmem>>, vector<1x52x16xbf16>
    %3 = vector.shape_cast %2 : vector<1x52x16xbf16> to vector<52x16xbf16>
    %cst = arith.constant dense<0.000000e+00> : vector<1024x16xf32>
    %4 = tpu.matmul %1, %3, %cst {dimension_numbers = #tpu.dot_dimension_numbers<[1], [0], [0], [1], [0, 0, 1, 1], [], []>} : vector<1024x52xbf16>, vector<52x16xbf16>, vector<1024x16xf32> -> vector<1024x16xf32>
    %c0_5 = arith.constant 0 : index
    %c0_6 = arith.constant 0 : index
    %c0_7 = arith.constant 0 : index
    %5 = vector.load %arg2[%c0_5, %c0_6, %c0_7] : memref<1x1056x52xbf16, #tpu.memory_space<vmem>>, vector<1x1024x52xbf16>
    %6 = vector.shape_cast %5 : vector<1x1024x52xbf16> to vector<1024x52xbf16>
    %c1 = arith.constant 1 : index
    %c0_8 = arith.constant 0 : index
    %c0_9 = arith.constant 0 : index
    %7 = vector.load %arg3[%c1, %c0_8, %c0_9] : memref<4x52x16xbf16, #tpu.memory_space<vmem>>, vector<1x52x16xbf16>
    %8 = vector.shape_cast %7 : vector<1x52x16xbf16> to vector<52x16xbf16>
    %cst_10 = arith.constant dense<0.000000e+00> : vector<1024x16xf32>
    %9 = tpu.matmul %6, %8, %cst_10 {dimension_numbers = #tpu.dot_dimension_numbers<[1], [0], [0], [1], [0, 0, 1, 1], [], []>} : vector<1024x52xbf16>, vector<52x16xbf16>, vector<1024x16xf32> -> vector<1024x16xf32>
    %10 = arith.addf %4, %9 : vector<1024x16xf32>
    %c0_11 = arith.constant 0 : index
    %c32 = arith.constant 32 : index
    %c0_12 = arith.constant 0 : index
    %11 = vector.load %arg1[%c0_11, %c32, %c0_12] : memref<1x1056x52xbf16, #tpu.memory_space<vmem>>, vector<1x1024x52xbf16>
    %12 = vector.shape_cast %11 : vector<1x1024x52xbf16> to vector<1024x52xbf16>
    %c2 = arith.constant 2 : index
    %c0_13 = arith.constant 0 : index
    %c0_14 = arith.constant 0 : index
    %13 = vector.load %arg3[%c2, %c0_13, %c0_14] : memref<4x52x16xbf16, #tpu.memory_space<vmem>>, vector<1x52x16xbf16>
    %14 = vector.shape_cast %13 : vector<1x52x16xbf16> to vector<52x16xbf16>
    %cst_15 = arith.constant dense<0.000000e+00> : vector<1024x16xf32>
    %15 = tpu.matmul %12, %14, %cst_15 {dimension_numbers = #tpu.dot_dimension_numbers<[1], [0], [0], [1], [0, 0, 1, 1], [], []>} : vector<1024x52xbf16>, vector<52x16xbf16>, vector<1024x16xf32> -> vector<1024x16xf32>
    %16 = arith.addf %10, %15 : vector<1024x16xf32>
    %c0_16 = arith.constant 0 : index
    %c32_17 = arith.constant 32 : index
    %c0_18 = arith.constant 0 : index
    %17 = vector.load %arg2[%c0_16, %c32_17, %c0_18] : memref<1x1056x52xbf16, #tpu.memory_space<vmem>>, vector<1x1024x52xbf16>
    %18 = vector.shape_cast %17 : vector<1x1024x52xbf16> to vector<1024x52xbf16>
    %c3 = arith.constant 3 : index
    %c0_19 = arith.constant 0 : index
    %c0_20 = arith.constant 0 : index
    %19 = vector.load %arg3[%c3, %c0_19, %c0_20] : memref<4x52x16xbf16, #tpu.memory_space<vmem>>, vector<1x52x16xbf16>
    %20 = vector.shape_cast %19 : vector<1x52x16xbf16> to vector<52x16xbf16>
    %cst_21 = arith.constant dense<0.000000e+00> : vector<1024x16xf32>
    %21 = tpu.matmul %18, %20, %cst_21 {dimension_numbers = #tpu.dot_dimension_numbers<[1], [0], [0], [1], [0, 0, 1, 1], [], []>} : vector<1024x52xbf16>, vector<52x16xbf16>, vector<1024x16xf32> -> vector<1024x16xf32>
    %22 = arith.addf %16, %21 : vector<1024x16xf32>
    %cst_22 = arith.constant 0.000000e+00 : f32
    %23 = vector.broadcast %cst_22 : f32 to vector<1024x16xf32>
    %24 = arith.cmpf oge, %22, %23 : vector<1024x16xf32>
    %cst_23 = arith.constant 2.000000e-01 : f32
    %25 = vector.broadcast %cst_23 : f32 to vector<1024x16xf32>
    %26 = arith.mulf %25, %22 : vector<1024x16xf32>
    %27 = arith.select %24, %22, %26 : vector<1024x16xi1>, vector<1024x16xf32>
    %28 = arith.truncf %27 : vector<1024x16xf32> to vector<1024x16xbf16>
    %c0_24 = arith.constant 0 : index
    %c0_25 = arith.constant 0 : index
    %c0_26 = arith.constant 0 : index
    %29 = vector.load %arg4[%c0_24, %c0_25, %c0_26] : memref<1x1024x16xbf16, #tpu.memory_space<vmem>>, vector<1x1024x16xbf16>
    %30 = vector.shape_cast %29 : vector<1x1024x16xbf16> to vector<1024x16xbf16>
    %31 = vector.shape_cast %28 : vector<1024x16xbf16> to vector<1x1024x16xbf16>
    tpu.vector_store %arg4[%c0_24, %c0_25, %c0_26], %31 {strides = array<i32>} : memref<1x1024x16xbf16, #tpu.memory_space<vmem>>, vector<1x1024x16xbf16>,
    return
  }
  func.func @transform_0(%arg0: i32) -> (i32, i32, i32) {
    %c0_i32 = arith.constant 0 : i32
    %c0_i32_0 = arith.constant 0 : i32
    %c0_i32_1 = arith.constant 0 : i32
    return %arg0, %c0_i32, %c0_i32_0 : i32, i32, i32
  }
  func.func @transform_1(%arg0: i32) -> (i32, i32, i32) {
    %c0_i32 = arith.constant 0 : i32
    %c0_i32_0 = arith.constant 0 : i32
    %c0_i32_1 = arith.constant 0 : i32
    return %arg0, %c0_i32, %c0_i32_0 : i32, i32, i32
  }
  func.func @transform_2(%arg0: i32) -> (i32, i32, i32) {
    %c0_i32 = arith.constant 0 : i32
    %c0_i32_0 = arith.constant 0 : i32
    %c0_i32_1 = arith.constant 0 : i32
    %c0_i32_2 = arith.constant 0 : i32
    return %c0_i32, %c0_i32_0, %c0_i32_1 : i32, i32, i32
  }
  func.func @transform_3(%arg0: i32) -> (i32, i32, i32) {
    %c0_i32 = arith.constant 0 : i32
    %c0_i32_0 = arith.constant 0 : i32
    %c0_i32_1 = arith.constant 0 : i32
    return %arg0, %c0_i32, %c0_i32_0 : i32, i32, i32
  }
}

module attributes {stable_mosaic.version = 11 : i64} {
  func.func @_conv4x4_s2_kernel(%arg0: i32, %arg1: memref<1x272x64xbf16, #tpu.memory_space<vmem>>, %arg2: memref<1x272x64xbf16, #tpu.memory_space<vmem>>, %arg3: memref<4x64x32xbf16, #tpu.memory_space<vmem>>, %arg4: memref<1x256x32xbf16, #tpu.memory_space<vmem>>) attributes {dimension_semantics = [#tpu.dimension_semantics<parallel>], iteration_bounds = array<i64: 2>, scalar_prefetch = 0 : i64, scratch_operands = 0 : i64, tpu.core_type = #tpu.core_type<tc>, window_params = [{transform_indices = @transform_0, window_bounds = array<i64: 1, 272, 64>}, {transform_indices = @transform_1, window_bounds = array<i64: 1, 272, 64>}, {pipeline_mode = #tpu.pipeline_mode<synchronous>, transform_indices = @transform_2, window_bounds = array<i64: 4, 64, 32>}, {transform_indices = @transform_3, window_bounds = array<i64: 1, 256, 32>}]} {
    %c0 = arith.constant 0 : index
    %c0_0 = arith.constant 0 : index
    %c0_1 = arith.constant 0 : index
    %0 = vector.load %arg1[%c0, %c0_0, %c0_1] : memref<1x272x64xbf16, #tpu.memory_space<vmem>>, vector<1x256x64xbf16>
    %1 = vector.shape_cast %0 : vector<1x256x64xbf16> to vector<256x64xbf16>
    %c0_2 = arith.constant 0 : index
    %c0_3 = arith.constant 0 : index
    %c0_4 = arith.constant 0 : index
    %2 = vector.load %arg3[%c0_2, %c0_3, %c0_4] : memref<4x64x32xbf16, #tpu.memory_space<vmem>>, vector<1x64x32xbf16>
    %3 = vector.shape_cast %2 : vector<1x64x32xbf16> to vector<64x32xbf16>
    %cst = arith.constant dense<0.000000e+00> : vector<256x32xf32>
    %4 = tpu.matmul %1, %3, %cst {dimension_numbers = #tpu.dot_dimension_numbers<[1], [0], [0], [1], [0, 0, 1, 1], [], []>} : vector<256x64xbf16>, vector<64x32xbf16>, vector<256x32xf32> -> vector<256x32xf32>
    %c0_5 = arith.constant 0 : index
    %c0_6 = arith.constant 0 : index
    %c0_7 = arith.constant 0 : index
    %5 = vector.load %arg2[%c0_5, %c0_6, %c0_7] : memref<1x272x64xbf16, #tpu.memory_space<vmem>>, vector<1x256x64xbf16>
    %6 = vector.shape_cast %5 : vector<1x256x64xbf16> to vector<256x64xbf16>
    %c1 = arith.constant 1 : index
    %c0_8 = arith.constant 0 : index
    %c0_9 = arith.constant 0 : index
    %7 = vector.load %arg3[%c1, %c0_8, %c0_9] : memref<4x64x32xbf16, #tpu.memory_space<vmem>>, vector<1x64x32xbf16>
    %8 = vector.shape_cast %7 : vector<1x64x32xbf16> to vector<64x32xbf16>
    %cst_10 = arith.constant dense<0.000000e+00> : vector<256x32xf32>
    %9 = tpu.matmul %6, %8, %cst_10 {dimension_numbers = #tpu.dot_dimension_numbers<[1], [0], [0], [1], [0, 0, 1, 1], [], []>} : vector<256x64xbf16>, vector<64x32xbf16>, vector<256x32xf32> -> vector<256x32xf32>
    %10 = arith.addf %4, %9 : vector<256x32xf32>
    %c0_11 = arith.constant 0 : index
    %c16 = arith.constant 16 : index
    %c0_12 = arith.constant 0 : index
    %11 = vector.load %arg1[%c0_11, %c16, %c0_12] : memref<1x272x64xbf16, #tpu.memory_space<vmem>>, vector<1x256x64xbf16>
    %12 = vector.shape_cast %11 : vector<1x256x64xbf16> to vector<256x64xbf16>
    %c2 = arith.constant 2 : index
    %c0_13 = arith.constant 0 : index
    %c0_14 = arith.constant 0 : index
    %13 = vector.load %arg3[%c2, %c0_13, %c0_14] : memref<4x64x32xbf16, #tpu.memory_space<vmem>>, vector<1x64x32xbf16>
    %14 = vector.shape_cast %13 : vector<1x64x32xbf16> to vector<64x32xbf16>
    %cst_15 = arith.constant dense<0.000000e+00> : vector<256x32xf32>
    %15 = tpu.matmul %12, %14, %cst_15 {dimension_numbers = #tpu.dot_dimension_numbers<[1], [0], [0], [1], [0, 0, 1, 1], [], []>} : vector<256x64xbf16>, vector<64x32xbf16>, vector<256x32xf32> -> vector<256x32xf32>
    %16 = arith.addf %10, %15 : vector<256x32xf32>
    %c0_16 = arith.constant 0 : index
    %c16_17 = arith.constant 16 : index
    %c0_18 = arith.constant 0 : index
    %17 = vector.load %arg2[%c0_16, %c16_17, %c0_18] : memref<1x272x64xbf16, #tpu.memory_space<vmem>>, vector<1x256x64xbf16>
    %18 = vector.shape_cast %17 : vector<1x256x64xbf16> to vector<256x64xbf16>
    %c3 = arith.constant 3 : index
    %c0_19 = arith.constant 0 : index
    %c0_20 = arith.constant 0 : index
    %19 = vector.load %arg3[%c3, %c0_19, %c0_20] : memref<4x64x32xbf16, #tpu.memory_space<vmem>>, vector<1x64x32xbf16>
    %20 = vector.shape_cast %19 : vector<1x64x32xbf16> to vector<64x32xbf16>
    %cst_21 = arith.constant dense<0.000000e+00> : vector<256x32xf32>
    %21 = tpu.matmul %18, %20, %cst_21 {dimension_numbers = #tpu.dot_dimension_numbers<[1], [0], [0], [1], [0, 0, 1, 1], [], []>} : vector<256x64xbf16>, vector<64x32xbf16>, vector<256x32xf32> -> vector<256x32xf32>
    %22 = arith.addf %16, %21 : vector<256x32xf32>
    %cst_22 = arith.constant dense<0.000000e+00> : vector<32xf32>
    %23 = vector.multi_reduction <add>, %22, %cst_22 [0] : vector<256x32xf32> to vector<32xf32>
    %24 = vector.shape_cast %23 : vector<32xf32> to vector<1x32xf32>
    %cst_23 = arith.constant 2.560000e+02 : f32
    %25 = vector.broadcast %cst_23 : f32 to vector<1x32xf32>
    %26 = arith.divf %24, %25 : vector<1x32xf32>
    %27 = vector.broadcast %26 : vector<1x32xf32> to vector<256x32xf32>
    %28 = arith.subf %22, %27 : vector<256x32xf32>
    %29 = arith.mulf %28, %28 : vector<256x32xf32>
    %cst_24 = arith.constant dense<0.000000e+00> : vector<32xf32>
    %30 = vector.multi_reduction <add>, %29, %cst_24 [0] : vector<256x32xf32> to vector<32xf32>
    %31 = vector.shape_cast %30 : vector<32xf32> to vector<1x32xf32>
    %cst_25 = arith.constant 2.560000e+02 : f32
    %32 = vector.broadcast %cst_25 : f32 to vector<1x32xf32>
    %33 = arith.divf %31, %32 : vector<1x32xf32>
    %34 = vector.broadcast %26 : vector<1x32xf32> to vector<256x32xf32>
    %35 = arith.subf %22, %34 : vector<256x32xf32>
    %cst_26 = arith.constant 9.99999974E-6 : f32
    %36 = vector.broadcast %cst_26 : f32 to vector<1x32xf32>
    %37 = arith.addf %33, %36 : vector<1x32xf32>
    %38 = math.rsqrt %37 : vector<1x32xf32>
    %39 = vector.broadcast %38 : vector<1x32xf32> to vector<256x32xf32>
    %40 = arith.mulf %35, %39 : vector<256x32xf32>
    %cst_27 = arith.constant 0.000000e+00 : f32
    %41 = vector.broadcast %cst_27 : f32 to vector<256x32xf32>
    %42 = arith.cmpf oge, %40, %41 : vector<256x32xf32>
    %cst_28 = arith.constant 2.000000e-01 : f32
    %43 = vector.broadcast %cst_28 : f32 to vector<256x32xf32>
    %44 = arith.mulf %43, %40 : vector<256x32xf32>
    %45 = arith.select %42, %40, %44 : vector<256x32xi1>, vector<256x32xf32>
    %46 = arith.truncf %45 : vector<256x32xf32> to vector<256x32xbf16>
    %c0_29 = arith.constant 0 : index
    %c0_30 = arith.constant 0 : index
    %c0_31 = arith.constant 0 : index
    %47 = vector.load %arg4[%c0_29, %c0_30, %c0_31] : memref<1x256x32xbf16, #tpu.memory_space<vmem>>, vector<1x256x32xbf16>
    %48 = vector.shape_cast %47 : vector<1x256x32xbf16> to vector<256x32xbf16>
    %49 = vector.shape_cast %46 : vector<256x32xbf16> to vector<1x256x32xbf16>
    tpu.vector_store %arg4[%c0_29, %c0_30, %c0_31], %49 {strides = array<i32>} : memref<1x256x32xbf16, #tpu.memory_space<vmem>>, vector<1x256x32xbf16>,
    return
  }
  func.func @transform_0(%arg0: i32) -> (i32, i32, i32) {
    %c0_i32 = arith.constant 0 : i32
    %c0_i32_0 = arith.constant 0 : i32
    %c0_i32_1 = arith.constant 0 : i32
    return %arg0, %c0_i32, %c0_i32_0 : i32, i32, i32
  }
  func.func @transform_1(%arg0: i32) -> (i32, i32, i32) {
    %c0_i32 = arith.constant 0 : i32
    %c0_i32_0 = arith.constant 0 : i32
    %c0_i32_1 = arith.constant 0 : i32
    return %arg0, %c0_i32, %c0_i32_0 : i32, i32, i32
  }
  func.func @transform_2(%arg0: i32) -> (i32, i32, i32) {
    %c0_i32 = arith.constant 0 : i32
    %c0_i32_0 = arith.constant 0 : i32
    %c0_i32_1 = arith.constant 0 : i32
    %c0_i32_2 = arith.constant 0 : i32
    return %c0_i32, %c0_i32_0, %c0_i32_1 : i32, i32, i32
  }
  func.func @transform_3(%arg0: i32) -> (i32, i32, i32) {
    %c0_i32 = arith.constant 0 : i32
    %c0_i32_0 = arith.constant 0 : i32
    %c0_i32_1 = arith.constant 0 : i32
    return %arg0, %c0_i32, %c0_i32_0 : i32, i32, i32
  }
}

module attributes {stable_mosaic.version = 11 : i64} {
  func.func @_conv4x4_s2_kernel(%arg0: i32, %arg1: memref<1x72x128xbf16, #tpu.memory_space<vmem>>, %arg2: memref<1x72x128xbf16, #tpu.memory_space<vmem>>, %arg3: memref<4x128x64xbf16, #tpu.memory_space<vmem>>, %arg4: memref<1x64x64xbf16, #tpu.memory_space<vmem>>) attributes {dimension_semantics = [#tpu.dimension_semantics<parallel>], iteration_bounds = array<i64: 2>, scalar_prefetch = 0 : i64, scratch_operands = 0 : i64, tpu.core_type = #tpu.core_type<tc>, window_params = [{transform_indices = @transform_0, window_bounds = array<i64: 1, 72, 128>}, {transform_indices = @transform_1, window_bounds = array<i64: 1, 72, 128>}, {pipeline_mode = #tpu.pipeline_mode<synchronous>, transform_indices = @transform_2, window_bounds = array<i64: 4, 128, 64>}, {transform_indices = @transform_3, window_bounds = array<i64: 1, 64, 64>}]} {
    %c0 = arith.constant 0 : index
    %c0_0 = arith.constant 0 : index
    %c0_1 = arith.constant 0 : index
    %0 = vector.load %arg1[%c0, %c0_0, %c0_1] : memref<1x72x128xbf16, #tpu.memory_space<vmem>>, vector<1x64x128xbf16>
    %1 = vector.shape_cast %0 : vector<1x64x128xbf16> to vector<64x128xbf16>
    %c0_2 = arith.constant 0 : index
    %c0_3 = arith.constant 0 : index
    %c0_4 = arith.constant 0 : index
    %2 = vector.load %arg3[%c0_2, %c0_3, %c0_4] : memref<4x128x64xbf16, #tpu.memory_space<vmem>>, vector<1x128x64xbf16>
    %3 = vector.shape_cast %2 : vector<1x128x64xbf16> to vector<128x64xbf16>
    %cst = arith.constant dense<0.000000e+00> : vector<64x64xf32>
    %4 = tpu.matmul %1, %3, %cst {dimension_numbers = #tpu.dot_dimension_numbers<[1], [0], [0], [1], [0, 0, 1, 1], [], []>} : vector<64x128xbf16>, vector<128x64xbf16>, vector<64x64xf32> -> vector<64x64xf32>
    %c0_5 = arith.constant 0 : index
    %c0_6 = arith.constant 0 : index
    %c0_7 = arith.constant 0 : index
    %5 = vector.load %arg2[%c0_5, %c0_6, %c0_7] : memref<1x72x128xbf16, #tpu.memory_space<vmem>>, vector<1x64x128xbf16>
    %6 = vector.shape_cast %5 : vector<1x64x128xbf16> to vector<64x128xbf16>
    %c1 = arith.constant 1 : index
    %c0_8 = arith.constant 0 : index
    %c0_9 = arith.constant 0 : index
    %7 = vector.load %arg3[%c1, %c0_8, %c0_9] : memref<4x128x64xbf16, #tpu.memory_space<vmem>>, vector<1x128x64xbf16>
    %8 = vector.shape_cast %7 : vector<1x128x64xbf16> to vector<128x64xbf16>
    %cst_10 = arith.constant dense<0.000000e+00> : vector<64x64xf32>
    %9 = tpu.matmul %6, %8, %cst_10 {dimension_numbers = #tpu.dot_dimension_numbers<[1], [0], [0], [1], [0, 0, 1, 1], [], []>} : vector<64x128xbf16>, vector<128x64xbf16>, vector<64x64xf32> -> vector<64x64xf32>
    %10 = arith.addf %4, %9 : vector<64x64xf32>
    %c0_11 = arith.constant 0 : index
    %c8 = arith.constant 8 : index
    %c0_12 = arith.constant 0 : index
    %11 = vector.load %arg1[%c0_11, %c8, %c0_12] : memref<1x72x128xbf16, #tpu.memory_space<vmem>>, vector<1x64x128xbf16>
    %12 = vector.shape_cast %11 : vector<1x64x128xbf16> to vector<64x128xbf16>
    %c2 = arith.constant 2 : index
    %c0_13 = arith.constant 0 : index
    %c0_14 = arith.constant 0 : index
    %13 = vector.load %arg3[%c2, %c0_13, %c0_14] : memref<4x128x64xbf16, #tpu.memory_space<vmem>>, vector<1x128x64xbf16>
    %14 = vector.shape_cast %13 : vector<1x128x64xbf16> to vector<128x64xbf16>
    %cst_15 = arith.constant dense<0.000000e+00> : vector<64x64xf32>
    %15 = tpu.matmul %12, %14, %cst_15 {dimension_numbers = #tpu.dot_dimension_numbers<[1], [0], [0], [1], [0, 0, 1, 1], [], []>} : vector<64x128xbf16>, vector<128x64xbf16>, vector<64x64xf32> -> vector<64x64xf32>
    %16 = arith.addf %10, %15 : vector<64x64xf32>
    %c0_16 = arith.constant 0 : index
    %c8_17 = arith.constant 8 : index
    %c0_18 = arith.constant 0 : index
    %17 = vector.load %arg2[%c0_16, %c8_17, %c0_18] : memref<1x72x128xbf16, #tpu.memory_space<vmem>>, vector<1x64x128xbf16>
    %18 = vector.shape_cast %17 : vector<1x64x128xbf16> to vector<64x128xbf16>
    %c3 = arith.constant 3 : index
    %c0_19 = arith.constant 0 : index
    %c0_20 = arith.constant 0 : index
    %19 = vector.load %arg3[%c3, %c0_19, %c0_20] : memref<4x128x64xbf16, #tpu.memory_space<vmem>>, vector<1x128x64xbf16>
    %20 = vector.shape_cast %19 : vector<1x128x64xbf16> to vector<128x64xbf16>
    %cst_21 = arith.constant dense<0.000000e+00> : vector<64x64xf32>
    %21 = tpu.matmul %18, %20, %cst_21 {dimension_numbers = #tpu.dot_dimension_numbers<[1], [0], [0], [1], [0, 0, 1, 1], [], []>} : vector<64x128xbf16>, vector<128x64xbf16>, vector<64x64xf32> -> vector<64x64xf32>
    %22 = arith.addf %16, %21 : vector<64x64xf32>
    %cst_22 = arith.constant dense<0.000000e+00> : vector<64xf32>
    %23 = vector.multi_reduction <add>, %22, %cst_22 [0] : vector<64x64xf32> to vector<64xf32>
    %24 = vector.shape_cast %23 : vector<64xf32> to vector<1x64xf32>
    %cst_23 = arith.constant 6.400000e+01 : f32
    %25 = vector.broadcast %cst_23 : f32 to vector<1x64xf32>
    %26 = arith.divf %24, %25 : vector<1x64xf32>
    %27 = vector.broadcast %26 : vector<1x64xf32> to vector<64x64xf32>
    %28 = arith.subf %22, %27 : vector<64x64xf32>
    %29 = arith.mulf %28, %28 : vector<64x64xf32>
    %cst_24 = arith.constant dense<0.000000e+00> : vector<64xf32>
    %30 = vector.multi_reduction <add>, %29, %cst_24 [0] : vector<64x64xf32> to vector<64xf32>
    %31 = vector.shape_cast %30 : vector<64xf32> to vector<1x64xf32>
    %cst_25 = arith.constant 6.400000e+01 : f32
    %32 = vector.broadcast %cst_25 : f32 to vector<1x64xf32>
    %33 = arith.divf %31, %32 : vector<1x64xf32>
    %34 = vector.broadcast %26 : vector<1x64xf32> to vector<64x64xf32>
    %35 = arith.subf %22, %34 : vector<64x64xf32>
    %cst_26 = arith.constant 9.99999974E-6 : f32
    %36 = vector.broadcast %cst_26 : f32 to vector<1x64xf32>
    %37 = arith.addf %33, %36 : vector<1x64xf32>
    %38 = math.rsqrt %37 : vector<1x64xf32>
    %39 = vector.broadcast %38 : vector<1x64xf32> to vector<64x64xf32>
    %40 = arith.mulf %35, %39 : vector<64x64xf32>
    %cst_27 = arith.constant 0.000000e+00 : f32
    %41 = vector.broadcast %cst_27 : f32 to vector<64x64xf32>
    %42 = arith.cmpf oge, %40, %41 : vector<64x64xf32>
    %cst_28 = arith.constant 2.000000e-01 : f32
    %43 = vector.broadcast %cst_28 : f32 to vector<64x64xf32>
    %44 = arith.mulf %43, %40 : vector<64x64xf32>
    %45 = arith.select %42, %40, %44 : vector<64x64xi1>, vector<64x64xf32>
    %46 = arith.truncf %45 : vector<64x64xf32> to vector<64x64xbf16>
    %c0_29 = arith.constant 0 : index
    %c0_30 = arith.constant 0 : index
    %c0_31 = arith.constant 0 : index
    %47 = vector.load %arg4[%c0_29, %c0_30, %c0_31] : memref<1x64x64xbf16, #tpu.memory_space<vmem>>, vector<1x64x64xbf16>
    %48 = vector.shape_cast %47 : vector<1x64x64xbf16> to vector<64x64xbf16>
    %49 = vector.shape_cast %46 : vector<64x64xbf16> to vector<1x64x64xbf16>
    tpu.vector_store %arg4[%c0_29, %c0_30, %c0_31], %49 {strides = array<i32>} : memref<1x64x64xbf16, #tpu.memory_space<vmem>>, vector<1x64x64xbf16>,
    return
  }
  func.func @transform_0(%arg0: i32) -> (i32, i32, i32) {
    %c0_i32 = arith.constant 0 : i32
    %c0_i32_0 = arith.constant 0 : i32
    %c0_i32_1 = arith.constant 0 : i32
    return %arg0, %c0_i32, %c0_i32_0 : i32, i32, i32
  }
  func.func @transform_1(%arg0: i32) -> (i32, i32, i32) {
    %c0_i32 = arith.constant 0 : i32
    %c0_i32_0 = arith.constant 0 : i32
    %c0_i32_1 = arith.constant 0 : i32
    return %arg0, %c0_i32, %c0_i32_0 : i32, i32, i32
  }
  func.func @transform_2(%arg0: i32) -> (i32, i32, i32) {
    %c0_i32 = arith.constant 0 : i32
    %c0_i32_0 = arith.constant 0 : i32
    %c0_i32_1 = arith.constant 0 : i32
    %c0_i32_2 = arith.constant 0 : i32
    return %c0_i32, %c0_i32_0, %c0_i32_1 : i32, i32, i32
  }
  func.func @transform_3(%arg0: i32) -> (i32, i32, i32) {
    %c0_i32 = arith.constant 0 : i32
    %c0_i32_0 = arith.constant 0 : i32
    %c0_i32_1 = arith.constant 0 : i32
    return %arg0, %c0_i32, %c0_i32_0 : i32, i32, i32
  }
}

module attributes {stable_mosaic.version = 11 : i64} {
  func.func @_conv4_out_kernel(%arg0: i32, %arg1: memref<1x20x256xbf16, #tpu.memory_space<vmem>>, %arg2: memref<1x20x256xbf16, #tpu.memory_space<vmem>>, %arg3: memref<4x256x128xbf16, #tpu.memory_space<vmem>>, %arg4: memref<16x128xf32, #tpu.memory_space<vmem>>, %arg5: memref<1x1x1xf32, #tpu.memory_space<vmem>>) attributes {dimension_semantics = [#tpu.dimension_semantics<parallel>], iteration_bounds = array<i64: 2>, scalar_prefetch = 0 : i64, scratch_operands = 0 : i64, tpu.core_type = #tpu.core_type<tc>, window_params = [{transform_indices = @transform_0, window_bounds = array<i64: 1, 20, 256>}, {transform_indices = @transform_1, window_bounds = array<i64: 1, 20, 256>}, {pipeline_mode = #tpu.pipeline_mode<synchronous>, transform_indices = @transform_2, window_bounds = array<i64: 4, 256, 128>}, {pipeline_mode = #tpu.pipeline_mode<synchronous>, transform_indices = @transform_3, window_bounds = array<i64: 16, 128>}, {transform_indices = @transform_4, window_bounds = array<i64: 1, 1, 1>}]} {
    %c0 = arith.constant 0 : index
    %c0_0 = arith.constant 0 : index
    %c0_1 = arith.constant 0 : index
    %0 = vector.load %arg1[%c0, %c0_0, %c0_1] : memref<1x20x256xbf16, #tpu.memory_space<vmem>>, vector<1x16x256xbf16>
    %1 = vector.shape_cast %0 : vector<1x16x256xbf16> to vector<16x256xbf16>
    %c0_2 = arith.constant 0 : index
    %c0_3 = arith.constant 0 : index
    %c0_4 = arith.constant 0 : index
    %2 = vector.load %arg3[%c0_2, %c0_3, %c0_4] : memref<4x256x128xbf16, #tpu.memory_space<vmem>>, vector<1x256x128xbf16>
    %3 = vector.shape_cast %2 : vector<1x256x128xbf16> to vector<256x128xbf16>
    %cst = arith.constant dense<0.000000e+00> : vector<16x128xf32>
    %4 = tpu.matmul %1, %3, %cst {dimension_numbers = #tpu.dot_dimension_numbers<[1], [0], [0], [1], [0, 0, 1, 1], [], []>} : vector<16x256xbf16>, vector<256x128xbf16>, vector<16x128xf32> -> vector<16x128xf32>
    %c0_5 = arith.constant 0 : index
    %c0_6 = arith.constant 0 : index
    %c0_7 = arith.constant 0 : index
    %5 = vector.load %arg2[%c0_5, %c0_6, %c0_7] : memref<1x20x256xbf16, #tpu.memory_space<vmem>>, vector<1x16x256xbf16>
    %6 = vector.shape_cast %5 : vector<1x16x256xbf16> to vector<16x256xbf16>
    %c1 = arith.constant 1 : index
    %c0_8 = arith.constant 0 : index
    %c0_9 = arith.constant 0 : index
    %7 = vector.load %arg3[%c1, %c0_8, %c0_9] : memref<4x256x128xbf16, #tpu.memory_space<vmem>>, vector<1x256x128xbf16>
    %8 = vector.shape_cast %7 : vector<1x256x128xbf16> to vector<256x128xbf16>
    %cst_10 = arith.constant dense<0.000000e+00> : vector<16x128xf32>
    %9 = tpu.matmul %6, %8, %cst_10 {dimension_numbers = #tpu.dot_dimension_numbers<[1], [0], [0], [1], [0, 0, 1, 1], [], []>} : vector<16x256xbf16>, vector<256x128xbf16>, vector<16x128xf32> -> vector<16x128xf32>
    %10 = arith.addf %4, %9 : vector<16x128xf32>
    %c0_11 = arith.constant 0 : index
    %c4 = arith.constant 4 : index
    %c0_12 = arith.constant 0 : index
    %11 = vector.load %arg1[%c0_11, %c4, %c0_12] : memref<1x20x256xbf16, #tpu.memory_space<vmem>>, vector<1x16x256xbf16>
    %12 = vector.shape_cast %11 : vector<1x16x256xbf16> to vector<16x256xbf16>
    %c2 = arith.constant 2 : index
    %c0_13 = arith.constant 0 : index
    %c0_14 = arith.constant 0 : index
    %13 = vector.load %arg3[%c2, %c0_13, %c0_14] : memref<4x256x128xbf16, #tpu.memory_space<vmem>>, vector<1x256x128xbf16>
    %14 = vector.shape_cast %13 : vector<1x256x128xbf16> to vector<256x128xbf16>
    %cst_15 = arith.constant dense<0.000000e+00> : vector<16x128xf32>
    %15 = tpu.matmul %12, %14, %cst_15 {dimension_numbers = #tpu.dot_dimension_numbers<[1], [0], [0], [1], [0, 0, 1, 1], [], []>} : vector<16x256xbf16>, vector<256x128xbf16>, vector<16x128xf32> -> vector<16x128xf32>
    %16 = arith.addf %10, %15 : vector<16x128xf32>
    %c0_16 = arith.constant 0 : index
    %c4_17 = arith.constant 4 : index
    %c0_18 = arith.constant 0 : index
    %17 = vector.load %arg2[%c0_16, %c4_17, %c0_18] : memref<1x20x256xbf16, #tpu.memory_space<vmem>>, vector<1x16x256xbf16>
    %18 = vector.shape_cast %17 : vector<1x16x256xbf16> to vector<16x256xbf16>
    %c3 = arith.constant 3 : index
    %c0_19 = arith.constant 0 : index
    %c0_20 = arith.constant 0 : index
    %19 = vector.load %arg3[%c3, %c0_19, %c0_20] : memref<4x256x128xbf16, #tpu.memory_space<vmem>>, vector<1x256x128xbf16>
    %20 = vector.shape_cast %19 : vector<1x256x128xbf16> to vector<256x128xbf16>
    %cst_21 = arith.constant dense<0.000000e+00> : vector<16x128xf32>
    %21 = tpu.matmul %18, %20, %cst_21 {dimension_numbers = #tpu.dot_dimension_numbers<[1], [0], [0], [1], [0, 0, 1, 1], [], []>} : vector<16x256xbf16>, vector<256x128xbf16>, vector<16x128xf32> -> vector<16x128xf32>
    %22 = arith.addf %16, %21 : vector<16x128xf32>
    %cst_22 = arith.constant dense<0.000000e+00> : vector<128xf32>
    %23 = vector.multi_reduction <add>, %22, %cst_22 [0] : vector<16x128xf32> to vector<128xf32>
    %24 = vector.shape_cast %23 : vector<128xf32> to vector<1x128xf32>
    %cst_23 = arith.constant 1.600000e+01 : f32
    %25 = vector.broadcast %cst_23 : f32 to vector<1x128xf32>
    %26 = arith.divf %24, %25 : vector<1x128xf32>
    %27 = vector.broadcast %26 : vector<1x128xf32> to vector<16x128xf32>
    %28 = arith.subf %22, %27 : vector<16x128xf32>
    %29 = arith.mulf %28, %28 : vector<16x128xf32>
    %cst_24 = arith.constant dense<0.000000e+00> : vector<128xf32>
    %30 = vector.multi_reduction <add>, %29, %cst_24 [0] : vector<16x128xf32> to vector<128xf32>
    %31 = vector.shape_cast %30 : vector<128xf32> to vector<1x128xf32>
    %cst_25 = arith.constant 1.600000e+01 : f32
    %32 = vector.broadcast %cst_25 : f32 to vector<1x128xf32>
    %33 = arith.divf %31, %32 : vector<1x128xf32>
    %34 = vector.broadcast %26 : vector<1x128xf32> to vector<16x128xf32>
    %35 = arith.subf %22, %34 : vector<16x128xf32>
    %cst_26 = arith.constant 9.99999974E-6 : f32
    %36 = vector.broadcast %cst_26 : f32 to vector<1x128xf32>
    %37 = arith.addf %33, %36 : vector<1x128xf32>
    %38 = math.rsqrt %37 : vector<1x128xf32>
    %39 = vector.broadcast %38 : vector<1x128xf32> to vector<16x128xf32>
    %40 = arith.mulf %35, %39 : vector<16x128xf32>
    %cst_27 = arith.constant 0.000000e+00 : f32
    %41 = vector.broadcast %cst_27 : f32 to vector<16x128xf32>
    %42 = arith.cmpf oge, %40, %41 : vector<16x128xf32>
    %cst_28 = arith.constant 2.000000e-01 : f32
    %43 = vector.broadcast %cst_28 : f32 to vector<16x128xf32>
    %44 = arith.mulf %43, %40 : vector<16x128xf32>
    %45 = arith.select %42, %40, %44 : vector<16x128xi1>, vector<16x128xf32>
    %c0_29 = arith.constant 0 : index
    %c0_30 = arith.constant 0 : index
    %46 = vector.load %arg4[%c0_29, %c0_30] : memref<16x128xf32, #tpu.memory_space<vmem>>, vector<16x128xf32>
    %47 = arith.mulf %45, %46 : vector<16x128xf32>
    %48 = vector.shape_cast %47 : vector<16x128xf32> to vector<1x16x128xf32>
    %cst_31 = arith.constant dense<0.000000e+00> : vector<1xf32>
    %49 = vector.multi_reduction <add>, %48, %cst_31 [1, 2] : vector<1x16x128xf32> to vector<1xf32>
    %50 = vector.shape_cast %49 : vector<1xf32> to vector<1x1x1xf32>
    %51 = vector.extract %50[0, 0, 0] : f32 from vector<1x1x1xf32>
    %52 = vector.broadcast %51 : f32 to vector<1x1xf32>
    %53 = arith.negf %52 : vector<1x1xf32>
    %54 = math.exp %53 : vector<1x1xf32>
    %cst_32 = arith.constant 1.000000e+00 : f32
    %55 = vector.broadcast %cst_32 : f32 to vector<1x1xf32>
    %56 = arith.addf %55, %54 : vector<1x1xf32>
    %57 = arith.divf %55, %56 : vector<1x1xf32>
    %c0_33 = arith.constant 0 : index
    %c0_34 = arith.constant 0 : index
    %c0_35 = arith.constant 0 : index
    %58 = vector.load %arg5[%c0_33, %c0_34, %c0_35] : memref<1x1x1xf32, #tpu.memory_space<vmem>>, vector<1x1x1xf32>
    %59 = vector.shape_cast %58 : vector<1x1x1xf32> to vector<1x1xf32>
    %60 = vector.shape_cast %57 : vector<1x1xf32> to vector<1x1x1xf32>
    tpu.vector_store %arg5[%c0_33, %c0_34, %c0_35], %60 {strides = array<i32>} : memref<1x1x1xf32, #tpu.memory_space<vmem>>, vector<1x1x1xf32>,
    return
  }
  func.func @transform_0(%arg0: i32) -> (i32, i32, i32) {
    %c0_i32 = arith.constant 0 : i32
    %c0_i32_0 = arith.constant 0 : i32
    %c0_i32_1 = arith.constant 0 : i32
    return %arg0, %c0_i32, %c0_i32_0 : i32, i32, i32
  }
  func.func @transform_1(%arg0: i32) -> (i32, i32, i32) {
    %c0_i32 = arith.constant 0 : i32
    %c0_i32_0 = arith.constant 0 : i32
    %c0_i32_1 = arith.constant 0 : i32
    return %arg0, %c0_i32, %c0_i32_0 : i32, i32, i32
  }
  func.func @transform_2(%arg0: i32) -> (i32, i32, i32) {
    %c0_i32 = arith.constant 0 : i32
    %c0_i32_0 = arith.constant 0 : i32
    %c0_i32_1 = arith.constant 0 : i32
    %c0_i32_2 = arith.constant 0 : i32
    return %c0_i32, %c0_i32_0, %c0_i32_1 : i32, i32, i32
  }
  func.func @transform_3(%arg0: i32) -> (i32, i32) {
    %c0_i32 = arith.constant 0 : i32
    %c0_i32_0 = arith.constant 0 : i32
    %c0_i32_1 = arith.constant 0 : i32
    return %c0_i32, %c0_i32_0 : i32, i32
  }
  func.func @transform_4(%arg0: i32) -> (i32, i32, i32) {
    %c0_i32 = arith.constant 0 : i32
    %c0_i32_0 = arith.constant 0 : i32
    %c0_i32_1 = arith.constant 0 : i32
    return %arg0, %c0_i32, %c0_i32_0 : i32, i32, i32
  }
}

</mosaic_0001>

<bundles_post_ra>
// kernel: _forward_impl.4
= control target key start
LH: loop header
LB: loop body
LE: loop exit
PB: predicated region body
PF: predicated region fallthrough
CT: control target
= control target key end

     0   :  { %s8739_s12 = smov 0   ;;  %s9593_s0 = inlined_call_operand.vmem [shape: bf16[2,1056,52], index: 0, kind: input, shape index: {}]   ;;  %s9594_s1 = inlined_call_operand.vmem [shape: bf16[2,1056,52], index: 1, kind: input, shape index: {}]   ;;  %s9595_s2 = inlined_call_operand.vmem [shape: bf16[4,52,16], index: 2, kind: input, shape index: {}]   ;;  %s9596_s3 = inlined_call_operand.vmem [shape: bf16[2,1024,16], index: 3, kind: output, shape index: {}]  }
   0x1 LB: > { %s6409_s13 = sadd.s32 4294967295, %s8717_s12   ;;  %p6413_p0 = scmp.ge.s32.totalorder %s8717_s12, 1  ;;  %s8717_s12 = sphi %s8739_s12, %s13_s12  }
   0x2   : > { %p147_p1 = scmp.lt.s32.totalorder %s8717_s12, 3 }
   0x4   : > { %p148_p2 = pnand %p6413_p0, %p147_p1 }
   0x5   : > { %v8439_v0 = vld [vmem:[%s9595_s2 + $0x1c] sm:$0xff] (!%p148_p2)   ;;  %p176_p3 = scmp.lt.s32.totalorder (!%p148_p2), %s6409_s13, 1  ;;  %v8441_v2 = vld [vmem:[%s9595_s2 + $0x24] sm:$0xff] (!%p148_p2)   ;;  %v8443_v4 = vld [vmem:[%s9595_s2 + $0x2c] sm:$0xff] (!%p148_p2)   ;;  %vm804_vm0 = vcmask (!%p148_p2), 424960   ;;  %vm997_vm1 = vcmask (!%p148_p2), 1041408  }
   0x6   : > { %151 = sbr.rel (%p148_p2) target bundleno = 750 (0x2ee), region = 32  ;;  %v8440_v1 = vld [vmem:[%s9595_s2 + $0x38] sm:$0xff] (!%p148_p2)   ;;  %7498 = vmatprep.subr.bf16.mxu1 (!%p148_p2), %v8439_v0  ;;  %v8442_v3 = vld [vmem:[%s9595_s2 + $0x40] sm:$0xff] (!%p148_p2)   ;;  %v8444_v5 = vld [vmem:[%s9595_s2 + $0x48] sm:$0xff] (!%p148_p2)   ;;  %vm6213_vm4 = vcmask (!%p148_p2), 125952  }
   0x7   : > { %7770 = vmatprep.subr.bf16.mxu0 (!%p148_p2), %v8440_v1  ;;  %7499 = vmatpush3.bf16.msra.mxu1 (!%p148_p2), %v8439_v0  ;;  %v8445_v6 = vld [vmem:[%s9595_s2 + $0x34] ss:$0 sps:$4 sm:$0x33] (!%p148_p2)   ;;  %v8446_v7 = vld [vmem:[%s9595_s2 + $0x50] ss:$0 sps:$4 sm:$0x33] (!%p148_p2)  }
   0x8   : > { %7771 = vmatpush3.bf16.msra.mxu0 (!%p148_p2), %v8440_v1  ;;  %7500 = vmatprep.subr.bf16.mxu1 (!%p148_p2), %v8441_v2  ;;  %v8450_v10 = vld [vmem:[%s9595_s2] sm:$0xff] (!%p148_p2)   ;;  %v8452_v11 = vld [vmem:[%s9595_s2 + $0x54] sm:$0xff] (!%p148_p2)   ;;  %v999_v12 = vsel (!%p148_p2), %vm997_vm1, %v8445_v6, 0  ;;  %v3297_v13 = vsel (!%p148_p2), %vm997_vm1, %v8446_v7, 0  ;;  %v8484_v32 = vld [vmem:[%s9595_s2 + $0x8] sm:$0xff] (!%p148_p2)  }
   0x9   : > { %7772 = vmatprep.subr.bf16.mxu0 (!%p148_p2), %v8442_v3  ;;  %v8486_v34 = vld [vmem:[%s9595_s2 + $0x5c] sm:$0xff] (!%p148_p2)   ;;  %v8518_v51 = vld [vmem:[%s9595_s2 + $0x10] sm:$0xff] (!%p148_p2)   ;;  %v8520_v53 = vld [vmem:[%s9595_s2 + $0x64] sm:$0xff] (!%p148_p2)  }
   0xb   : > { %7501 = vmatpush3.bf16.msra.mxu1 (!%p148_p2), %v8441_v2 }
   0xc   : > { %7773 = vmatpush3.bf16.msra.mxu0 (!%p148_p2), %v8442_v3  ;;  %7502 = vmatprep.subr.bf16.mxu1 (!%p148_p2), %v8443_v4 }
   0xd   : > { %s9598_s13 = smov (!%p176_p3, %s6409_s13), 1  ;;  %7774 = vmatprep.subr.bf16.mxu0 %v8444_v5 }
   0xe   : > { %s8430_s26 = smul.u32 528, %s9598_s13  ;;  %s7097_s28 = sshll.u32 %s9598_s13, 9 }
   0xf   : > { %7503 = vmatpush3.bf16.msra.mxu1 %v8443_v4  ;;  %s9301_s4 = scalar_lea.vmem %s9596_s3, %s7097_s28 }
  0x10   : > { %s8777_s6 = scalar_lea.vmem %s9594_s1, %s8430_s26  ;;  %s8782_s9 = scalar_lea.vmem %s9593_s0, %s8430_s26  ;;  %7775 = vmatpush3.bf16.msra.mxu0 %v8444_v5  ;;  %8426 = vmatprep.subr.msk.bf16.mxu1 %vm997_vm1, %v8445_v6  ;;  %v8552_v6 = vld [vmem:[%s9595_s2 + $0x18] ss:$0 sps:$4 sm:$0x33]  }
  0x11   : > { %v8447_v8 = vld [vmem:[%s8777_s6] sm:$0xff]   ;;  %v8448_v9 = vld [vmem:[%s8782_s9 + $0x10] sm:$0xff]   ;;  %8428 = vmatprep.subr.msk.bf16.mxu0 %vm997_vm1, %v8446_v7  ;;  %v8449_v14 = vld [vmem:[%s8777_s6 + $0x8] sm:$0xff]  }
  0x12   : > { %7506 = vmatprep.mubr.msk.bf16.mxu1 %vm804_vm0, %v8447_v8  ;;  %7778 = vmatprep.mubr.msk.bf16.mxu0 %vm804_vm0, %v8448_v9  ;;  %v8451_v15 = vld [vmem:[%s8782_s9 + $0x18] sm:$0xff]   ;;  %v8453_v16 = vld [vmem:[%s8777_s6 + $0x10] sm:$0xff]   ;;  %v8454_v17 = vld [vmem:[%s8782_s9 + $0x20] sm:$0xff]   ;;  %v2080_v8 = vsel %vm997_vm1, %v8552_v6, 0 }
  0x13   : > { %7505 = vmatpush3.bf16.msra.mxu1 %v999_v12  ;;  %v8455_v18 = vld [vmem:[%s8777_s6 + $0x18] sm:$0xff]   ;;  %v8456_v19 = vld [vmem:[%s8782_s9 + $0x28] sm:$0xff]   ;;  %v8457_v20 = vld [vmem:[%s8777_s6 + $0x20] sm:$0xff]  }
  0x14   : > { %7777 = vmatpush3.bf16.msra.mxu0 %v3297_v13  ;;  %7634 = vmatprep.subr.bf16.mxu1 %v8450_v10  ;;  %v8458_v21 = vld [vmem:[%s8782_s9 + $0x30] sm:$0xff]   ;;  %v8459_v22 = vld [vmem:[%s8777_s6 + $0x28] sm:$0xff]   ;;  %v8460_v23 = vld [vmem:[%s8782_s9 + $0x38] sm:$0xff]  }
  0x15   : > { %7906 = vmatprep.subr.bf16.mxu0 %v8452_v11  ;;  %v8461_v24 = vld [vmem:[%s8777_s6 + $0x30] sm:$0xff]   ;;  %v8462_v25 = vld [vmem:[%s8782_s9 + $0x40] sm:$0xff]   ;;  %v8463_v26 = vld [vmem:[%s8777_s6 + $0x38] sm:$0xff]  }
  0x16   : > { %7507 = vmatmul.mubr.msk.bf16.vlgmr.msra.gmra.mrb[0].mxu1 %vm804_vm0, %v8449_v14  ;;  %v8464_v27 = vld [vmem:[%s8782_s9 + $0x48] sm:$0xff]   ;;  %v8465_v28 = vld [vmem:[%s8777_s6 + $0x40] sm:$0xff]   ;;  %v8466_v29 = vld [vmem:[%s8782_s9 + $0x50] sm:$0xff]  }
  0x17   : > { %7779 = vmatmul.mubr.msk.bf16.vlgmr.msra.gmra.mrb[0].mxu0 %vm804_vm0, %v8451_v15  ;;  %7635 = vmatpush3.bf16.msra.mxu1 %v8450_v10  ;;  %v8467_v30 = vld [vmem:[%s8777_s6 + $0x48] sm:$0xff]   ;;  %v8468_v31 = vld [vmem:[%s8782_s9 + $0x58] sm:$0xff]   ;;  %v8469_v33 = vld [vmem:[%s8777_s6 + $0x50] sm:$0xff]  }
  0x18   : > { %7907 = vmatpush3.bf16.msra.mxu0 %v8452_v11  ;;  %7510 = vmatprep.mubr.msk.bf16.mxu1 %vm804_vm0, %v8453_v16  ;;  %v8470_v35 = vld [vmem:[%s8782_s9 + $0x60] sm:$0xff]   ;;  %v8471_v36 = vld [vmem:[%s8777_s6 + $0x58] sm:$0xff]   ;;  %v8472_v37 = vld [vmem:[%s8782_s9 + $0x68] sm:$0xff]  }
  0x19   : > { %7782 = vmatprep.mubr.msk.bf16.mxu0 %vm804_vm0, %v8454_v17  ;;  %7636 = vmatprep.subr.bf16.mxu1 %v8484_v32  ;;  %v8473_v38 = vld [vmem:[%s8777_s6 + $0x60] sm:$0xff]   ;;  %v8474_v39 = vld [vmem:[%s8782_s9 + $0x70] sm:$0xff]   ;;  %v8475_v40 = vld [vmem:[%s8777_s6 + $0x68] sm:$0xff]  }
  0x1a   : > { %7908 = vmatprep.subr.bf16.mxu0 %v8486_v34  ;;  %v8476_v41 = vld [vmem:[%s8782_s9 + $0x78] sm:$0xff]   ;;  %v8477_v42 = vld [vmem:[%s8777_s6 + $0x70] sm:$0xff]   ;;  %v8478_v43 = vld [vmem:[%s8782_s9 + $0x80] sm:$0xff]  }
  0x1b   : > { %7637 = vmatpush3.bf16.msra.mxu1 %v8484_v32  ;;  %v8479_v44 = vld [vmem:[%s8777_s6 + $0x78] sm:$0xff]   ;;  %v8480_v45 = vld [vmem:[%s8782_s9 + $0x88] sm:$0xff]   ;;  %v8481_v46 = vld [vmem:[%s8777_s6 + $0x80] sm:$0xff]  }
  0x1c   : > { %7909 = vmatpush3.bf16.msra.mxu0 %v8486_v34  ;;  %v8482_v47 = vld [vmem:[%s8782_s9 + $0x90] sm:$0xff]   ;;  %v8483_v48 = vld [vmem:[%s8777_s6 + $0x88] sm:$0xff]   ;;  %v8485_v49 = vld [vmem:[%s8782_s9 + $0x98] sm:$0xff]   ;;  %7638 = vmatprep.subr.bf16.mxu1 %v8518_v51 }
  0x1d   : > { %v8487_v50 = vld [vmem:[%s8777_s6 + $0x90] sm:$0xff]   ;;  %v8488_v52 = vld [vmem:[%s8782_s9 + $0xa0] sm:$0xff]   ;;  %7910 = vmatprep.subr.bf16.mxu0 %v8520_v53  ;;  %v8489_v54 = vld [vmem:[%s8777_s6 + $0x98] sm:$0xff]  }
  0x1e   : > { %7511 = vmatmul.mubr.msk.bf16.gmra.mrb[4].mxu1 %vm804_vm0, %v8455_v18  ;;  %v8490_v55 = vld [vmem:[%s8782_s9 + $0xa8] sm:$0xff]   ;;  %v8491_v56 = vld [vmem:[%s8777_s6 + $0xa0] sm:$0xff]   ;;  %v8492_v57 = vld [vmem:[%s8782_s9 + $0xb0] sm:$0xff]  }
  0x1f   : > { %7783 = vmatmul.mubr.msk.bf16.gmra.mrb[4].mxu0 %vm804_vm0, %v8456_v19  ;;  %7514 = vmatprep.mubr.msk.bf16.mxu1 %vm804_vm0, %v8457_v20  ;;  %v8493_v58 = vld [vmem:[%s8777_s6 + $0xa8] sm:$0xff]   ;;  %v8494_v59 = vld [vmem:[%s8782_s9 + $0xb8] sm:$0xff]   ;;  %v8495_v60 = vld [vmem:[%s8777_s6 + $0xb0] sm:$0xff]  }
  0x20   : > { %7786 = vmatprep.mubr.msk.bf16.mxu0 %vm804_vm0, %v8458_v21  ;;  %7639 = vmatpush3.bf16.msra.mxu1 %v8518_v51  ;;  %v8496_v61 = vld [vmem:[%s8782_s9 + $0xc0] sm:$0xff]   ;;  %v8497_v62 = vld [vmem:[%s8777_s6 + $0xb8] sm:$0xff]   ;;  %v8498_v63 = vld [vmem:[%s8782_s9 + $0xc8] sm:$0xff]  }
  0x21   : > { %7911 = vmatpush3.bf16.msra.mxu0 %v8520_v53  ;;  %v8499_v0 = vld [vmem:[%s8777_s6 + $0xc0] sm:$0xff]   ;;  %v8500_v1 = vld [vmem:[%s8782_s9 + $0xd0] sm:$0xff]   ;;  %v8501_v2 = vld [vmem:[%s8777_s6 + $0xc8] sm:$0xff]   ;;  %8427 = vmatprep.subr.msk.bf16.mxu1 %vm997_vm1, %v8552_v6 }
  0x22   : > { %v8502_v3 = vld [vmem:[%s8782_s9 + $0xd8] sm:$0xff]   ;;  %v8503_v4 = vld [vmem:[%s8777_s6 + $0xd0] sm:$0xff]   ;;  %v8504_v5 = vld [vmem:[%s8782_s9 + $0xe0] sm:$0xff]  }
  0x23   : > { %v8554_v7 = vld [vmem:[%s9595_s2 + $0x6c] ss:$0 sps:$4 sm:$0x33]   ;;  %v8505_v10 = vld [vmem:[%s8777_s6 + $0xd8] sm:$0xff]   ;;  %v8507_v12 = vld [vmem:[%s8777_s6 + $0xe0] sm:$0xff]  }
  0x24   : > { %8429 = vmatprep.subr.msk.bf16.mxu0 %vm997_vm1, %v8554_v7  ;;  %v4642_v9 = vsel %vm997_vm1, %v8554_v7, 0  ;;  %7641 = vmatpush3.bf16.msra.mxu1 %v2080_v8  ;;  %v8506_v11 = vld [vmem:[%s8782_s9 + $0xe8] sm:$0xff]   ;;  %v8508_v13 = vld [vmem:[%s8782_s9 + $0xf0] sm:$0xff]   ;;  %v8510_v15 = vld [vmem:[%s8782_s9 + $0xf8] sm:$0xff]  }
  0x25   : > { %7913 = vmatpush3.bf16.msra.mxu0 %v4642_v9  ;;  %v8509_v14 = vld [vmem:[%s8777_s6 + $0xe8] sm:$0xff]   ;;  %v8511_v16 = vld [vmem:[%s8777_s6 + $0xf0] sm:$0xff]   ;;  %v8512_v17 = vld [vmem:[%s8782_s9 + $0x100] sm:$0xff]  }
  0x26   : > { %7515 = vmatmul.mubr.msk.bf16.gmra.mrb[8].mxu1 %vm804_vm0, %v8459_v22  ;;  %v8513_v18 = vld [vmem:[%s8777_s6 + $0xf8] sm:$0xff]   ;;  %v8514_v19 = vld [vmem:[%s8782_s9 + $0x108] sm:$0xff]   ;;  %v8515_v20 = vld [vmem:[%s8777_s6 + $0x100] sm:$0xff]  }
  0x27   : > { %7787 = vmatmul.mubr.msk.bf16.gmra.mrb[8].mxu0 %vm804_vm0, %v8460_v23  ;;  %7518 = vmatprep.mubr.msk.bf16.mxu1 %vm804_vm0, %v8461_v24  ;;  %v8516_v21 = vld [vmem:[%s8782_s9 + $0x110] sm:$0xff]   ;;  %v8517_v22 = vld [vmem:[%s8777_s6 + $0x108] sm:$0xff]   ;;  %v8519_v23 = vld [vmem:[%s8782_s9 + $0x118] sm:$0xff]  }
  0x28   : > { %7790 = vmatprep.mubr.msk.bf16.mxu0 %vm804_vm0, %v8462_v25  ;;  %v8521_v24 = vld [vmem:[%s8777_s6 + $0x110] sm:$0xff]   ;;  %v8522_v25 = vld [vmem:[%s8782_s9 + $0x120] sm:$0xff]   ;;  %v8531_v34 = vld [vmem:[%s8777_s6 + $0x138] sm:$0xff]  }
  0x29   : > { %v8529_v32 = vld [vmem:[%s8777_s6 + $0x130] sm:$0xff]   ;;  %v8548_v51 = vld [vmem:[%s8782_s9 + $0x188] sm:$0xff]   ;;  %v8570_v7 = vld [vmem:[%s8782_s9 + $0x1d8] sm:$0xff]  }
  0x2a   : > { %v8550_v53 = vld [vmem:[%s8782_s9 + $0x190] sm:$0xff]   ;;  %v8569_v6 = vld [vmem:[%s8777_s6 + $0x1c8] sm:$0xff]   ;;  %v8572_v9 = vld [vmem:[%s8782_s9 + $0x1e0] sm:$0xff]  }
  0x2b   : > { %v8571_v8 = vld [vmem:[%s8777_s6 + $0x1d0] sm:$0xff]  }
  0x2e   : > { %7519 = vmatmul.mubr.msk.bf16.gmra.mrb[12].mxu1 %vm804_vm0, %v8463_v26  ;;  %v8523_v26 = vld [vmem:[%s8777_s6 + $0x118] sm:$0xff]  }
  0x2f   : > { %7791 = vmatmul.mubr.msk.bf16.gmra.mrb[12].mxu0 %vm804_vm0, %v8464_v27  ;;  %7522 = vmatprep.mubr.msk.bf16.mxu1 %vm804_vm0, %v8465_v28  ;;  %v8524_v27 = vld [vmem:[%s8782_s9 + $0x128] sm:$0xff]   ;;  %v8525_v28 = vld [vmem:[%s8777_s6 + $0x120] sm:$0xff]  }
  0x30   : > { %7794 = vmatprep.mubr.msk.bf16.mxu0 %vm804_vm0, %v8466_v29  ;;  %v8526_v29 = vld [vmem:[%s8782_s9 + $0x130] sm:$0xff]  }
  0x36   : > { %7523 = vmatmul.mubr.msk.bf16.gmra.mrb[16].mxu1 %vm804_vm0, %v8467_v30  ;;  %v8527_v30 = vld [vmem:[%s8777_s6 + $0x128] sm:$0xff]  }
  0x37   : > { %7795 = vmatmul.mubr.msk.bf16.gmra.mrb[16].mxu0 %vm804_vm0, %v8468_v31  ;;  %7526 = vmatprep.mubr.msk.bf16.mxu1 %vm804_vm0, %v8469_v33  ;;  %v8528_v31 = vld [vmem:[%s8782_s9 + $0x138] sm:$0xff]   ;;  %v8530_v33 = vld [vmem:[%s8782_s9 + $0x140] sm:$0xff]  }
  0x38   : > { %7798 = vmatprep.mubr.msk.bf16.mxu0 %vm804_vm0, %v8470_v35  ;;  %v8532_v35 = vld [vmem:[%s8782_s9 + $0x148] sm:$0xff]  }
  0x3e   : > { %7527 = vmatmul.mubr.msk.bf16.gmra.mrb[20].mxu1 %vm804_vm0, %v8471_v36  ;;  %v8533_v36 = vld [vmem:[%s8777_s6 + $0x140] sm:$0xff]  }
  0x3f   : > { %7799 = vmatmul.mubr.msk.bf16.gmra.mrb[20].mxu0 %vm804_vm0, %v8472_v37  ;;  %7530 = vmatprep.mubr.msk.bf16.mxu1 %vm804_vm0, %v8473_v38  ;;  %v8534_v37 = vld [vmem:[%s8782_s9 + $0x150] sm:$0xff]   ;;  %v8535_v38 = vld [vmem:[%s8777_s6 + $0x148] sm:$0xff]  }
  0x40   : > { %7802 = vmatprep.mubr.msk.bf16.mxu0 %vm804_vm0, %v8474_v39  ;;  %v8536_v39 = vld [vmem:[%s8782_s9 + $0x158] sm:$0xff]  }
  0x46   : > { %7531 = vmatmul.mubr.msk.bf16.gmra.mrb[24].mxu1 %vm804_vm0, %v8475_v40  ;;  %v8537_v40 = vld [vmem:[%s8777_s6 + $0x150] sm:$0xff]  }
  0x47   : > { %7803 = vmatmul.mubr.msk.bf16.gmra.mrb[24].mxu0 %vm804_vm0, %v8476_v41  ;;  %7534 = vmatprep.mubr.msk.bf16.mxu1 %vm804_vm0, %v8477_v42  ;;  %v8538_v41 = vld [vmem:[%s8782_s9 + $0x160] sm:$0xff]   ;;  %v8539_v42 = vld [vmem:[%s8777_s6 + $0x158] sm:$0xff]  }
  0x48   : > { %7806 = vmatprep.mubr.msk.bf16.mxu0 %vm804_vm0, %v8478_v43  ;;  %v8540_v43 = vld [vmem:[%s8782_s9 + $0x168] sm:$0xff]  }
  0x4e   : > { %7535 = vmatmul.mubr.msk.bf16.gmra.mrb[28].mxu1 %vm804_vm0, %v8479_v44  ;;  %v8541_v44 = vld [vmem:[%s8777_s6 + $0x160] sm:$0xff]  }
  0x4f   : > { %7807 = vmatmul.mubr.msk.bf16.gmra.mrb[28].mxu0 %vm804_vm0, %v8480_v45  ;;  %7538 = vmatprep.mubr.msk.bf16.mxu1 %vm804_vm0, %v8481_v46  ;;  %v8542_v45 = vld [vmem:[%s8782_s9 + $0x170] sm:$0xff]   ;;  %v8543_v46 = vld [vmem:[%s8777_s6 + $0x168] sm:$0xff]  }
  0x50   : > { %7810 = vmatprep.mubr.msk.bf16.mxu0 %vm804_vm0, %v8482_v47  ;;  %v8544_v47 = vld [vmem:[%s8782_s9 + $0x178] sm:$0xff]  }
  0x56   : > { %7539 = vmatmul.mubr.msk.bf16.gmra.mrb[32].mxu1 %vm804_vm0, %v8483_v48  ;;  %v8545_v48 = vld [vmem:[%s8777_s6 + $0x170] sm:$0xff]  }
  0x57   : > { %7811 = vmatmul.mubr.msk.bf16.gmra.mrb[32].mxu0 %vm804_vm0, %v8485_v49  ;;  %7542 = vmatprep.mubr.msk.bf16.mxu1 %vm804_vm0, %v8487_v50  ;;  %v8546_v49 = vld [vmem:[%s8782_s9 + $0x180] sm:$0xff]   ;;  %v8547_v50 = vld [vmem:[%s8777_s6 + $0x178] sm:$0xff]  }
  0x58   : > { %7814 = vmatprep.mubr.msk.bf16.mxu0 %vm804_vm0, %v8488_v52  ;;  %v8549_v52 = vld [vmem:[%s8777_s6 + $0x180] sm:$0xff]  }
  0x5e   : > { %7543 = vmatmul.mubr.msk.bf16.gmra.mrb[36].mxu1 %vm804_vm0, %v8489_v54  ;;  %v8551_v54 = vld [vmem:[%s8777_s6 + $0x188] sm:$0xff]  }
  0x5f   : > { %7815 = vmatmul.mubr.msk.bf16.gmra.mrb[36].mxu0 %vm804_vm0, %v8490_v55  ;;  %7546 = vmatprep.mubr.msk.bf16.mxu1 %vm804_vm0, %v8491_v56  ;;  %v8553_v55 = vld [vmem:[%s8782_s9 + $0x198] sm:$0xff]   ;;  %v8555_v56 = vld [vmem:[%s8777_s6 + $0x190] sm:$0xff]  }
  0x60   : > { %7818 = vmatprep.mubr.msk.bf16.mxu0 %vm804_vm0, %v8492_v57  ;;  %v8556_v57 = vld [vmem:[%s8782_s9 + $0x1a0] sm:$0xff]  }
  0x66   : > { %7547 = vmatmul.mubr.msk.bf16.gmra.mrb[40].mxu1 %vm804_vm0, %v8493_v58  ;;  %v8557_v58 = vld [vmem:[%s8777_s6 + $0x198] sm:$0xff]  }
  0x67   : > { %7819 = vmatmul.mubr.msk.bf16.gmra.mrb[40].mxu0 %vm804_vm0, %v8494_v59  ;;  %7550 = vmatprep.mubr.msk.bf16.mxu1 %vm804_vm0, %v8495_v60  ;;  %v8558_v59 = vld [vmem:[%s8782_s9 + $0x1a8] sm:$0xff]   ;;  %v8559_v60 = vld [vmem:[%s8777_s6 + $0x1a0] sm:$0xff]  }
  0x68   : > { %7822 = vmatprep.mubr.msk.bf16.mxu0 %vm804_vm0, %v8496_v61  ;;  %v8560_v61 = vld [vmem:[%s8782_s9 + $0x1b0] sm:$0xff]  }
  0x6e   : > { %7551 = vmatmul.mubr.msk.bf16.gmra.mrb[44].mxu1 %vm804_vm0, %v8497_v62  ;;  %v8561_v62 = vld [vmem:[%s8777_s6 + $0x1a8] sm:$0xff]  }
  0x6f   : > { %7823 = vmatmul.mubr.msk.bf16.gmra.mrb[44].mxu0 %vm804_vm0, %v8498_v63  ;;  %7554 = vmatprep.mubr.msk.bf16.mxu1 %vm804_vm0, %v8499_v0  ;;  %v8562_v63 = vld [vmem:[%s8782_s9 + $0x1b8] sm:$0xff]   ;;  %v8563_v0 = vld [vmem:[%s8777_s6 + $0x1b0] sm:$0xff]  }
  0x70   : > { %7826 = vmatprep.mubr.msk.bf16.mxu0 %vm804_vm0, %v8500_v1  ;;  %v8564_v1 = vld [vmem:[%s8782_s9 + $0x1c0] sm:$0xff]  }
  0x76   : > { %7555 = vmatmul.mubr.msk.bf16.gmra.mrb[48].mxu1 %vm804_vm0, %v8501_v2  ;;  %v8565_v2 = vld [vmem:[%s8777_s6 + $0x1b8] sm:$0xff]  }
  0x77   : > { %7827 = vmatmul.mubr.msk.bf16.gmra.mrb[48].mxu0 %vm804_vm0, %v8502_v3  ;;  %7558 = vmatprep.mubr.msk.bf16.mxu1 %vm804_vm0, %v8503_v4  ;;  %v8566_v3 = vld [vmem:[%s8782_s9 + $0x1c8] sm:$0xff]   ;;  %v8567_v4 = vld [vmem:[%s8777_s6 + $0x1c0] sm:$0xff]  }
  0x78   : > { %7830 = vmatprep.mubr.msk.bf16.mxu0 %vm804_vm0, %v8504_v5  ;;  %v8568_v5 = vld [vmem:[%s8782_s9 + $0x1d0] sm:$0xff]  }
  0x7e   : > { %7559 = vmatmul.mubr.msk.bf16.gmra.mrb[52].mxu1 %vm804_vm0, %v8505_v10  ;;  %v8573_v10 = vld [vmem:[%s8777_s6 + $0x1d8] sm:$0xff]  }
  0x7f   : > { %7831 = vmatmul.mubr.msk.bf16.gmra.mrb[52].mxu0 %vm804_vm0, %v8506_v11  ;;  %7562 = vmatprep.mubr.msk.bf16.mxu1 %vm804_vm0, %v8507_v12  ;;  %v8574_v11 = vld [vmem:[%s8782_s9 + $0x1e8] sm:$0xff]   ;;  %v8575_v12 = vld [vmem:[%s8777_s6 + $0x1e0] sm:$0xff]  }
  0x80   : > { %7834 = vmatprep.mubr.msk.bf16.mxu0 %vm804_vm0, %v8508_v13  ;;  %v8576_v13 = vld [vmem:[%s8782_s9 + $0x1f0] sm:$0xff]  }
  0x86   : > { %7563 = vmatmul.mubr.msk.bf16.gmra.mrb[56].mxu1 %vm804_vm0, %v8509_v14  ;;  %v8577_v14 = vld [vmem:[%s8777_s6 + $0x1e8] sm:$0xff]  }
  0x87   : > { %7835 = vmatmul.mubr.msk.bf16.gmra.mrb[56].mxu0 %vm804_vm0, %v8510_v15  ;;  %7566 = vmatprep.mubr.msk.bf16.mxu1 %vm804_vm0, %v8511_v16  ;;  %v8578_v15 = vld [vmem:[%s8782_s9 + $0x1f8] sm:$0xff]   ;;  %v8579_v16 = vld [vmem:[%s8777_s6 + $0x1f0] sm:$0xff]  }
  0x88   : > { %7838 = vmatprep.mubr.msk.bf16.mxu0 %vm804_vm0, %v8512_v17  ;;  %v8580_v17 = vld [vmem:[%s8782_s9 + $0x200] sm:$0xff]  }
  0x8e   : > { %7567 = vmatmul.mubr.msk.bf16.gmra.mrb[60].mxu1 %vm804_vm0, %v8513_v18  ;;  %v8581_v18 = vld [vmem:[%s8777_s6 + $0x1f8] sm:$0xff]  }
  0x8f   : > { %7839 = vmatmul.mubr.msk.bf16.gmra.mrb[60].mxu0 %vm804_vm0, %v8514_v19  ;;  %7570 = vmatprep.mubr.msk.bf16.mxu1 %vm804_vm0, %v8515_v20  ;;  %v8582_v19 = vld [vmem:[%s8782_s9 + $0x208] sm:$0xff]   ;;  %v8583_v20 = vld [vmem:[%s8782_s9] sm:$0xff]  }
  0x90   : > { %7842 = vmatprep.mubr.msk.bf16.mxu0 %vm804_vm0, %v8516_v21  ;;  %v8584_v21 = vld [vmem:[%s8777_s6 + $0x10] sm:$0xff]  }
  0x96   : > { %7571 = vmatmul.mubr.msk.bf16.gmra.mrb[64].mxu1 %vm804_vm0, %v8517_v22  ;;  %v8585_v22 = vld [vmem:[%s8782_s9 + $0x8] sm:$0xff]  }
  0x97   : > { %7843 = vmatmul.mubr.msk.bf16.gmra.mrb[64].mxu0 %vm804_vm0, %v8519_v23  ;;  %7574 = vmatprep.mubr.msk.bf16.mxu1 %vm804_vm0, %v8521_v24  ;;  %v8586_v23 = vld [vmem:[%s8777_s6 + $0x18] sm:$0xff]   ;;  %v8587_v24 = vld [vmem:[%s8782_s9 + $0x10] sm:$0xff]  }
  0x98   : > { %7846 = vmatprep.mubr.msk.bf16.mxu0 %vm804_vm0, %v8522_v25  ;;  %v8588_v25 = vld [vmem:[%s8777_s6 + $0x20] sm:$0xff]  }
  0x9e   : > { %7575 = vmatmul.mubr.msk.bf16.gmra.mrb[68].mxu1 %vm804_vm0, %v8523_v26  ;;  %v8589_v26 = vld [vmem:[%s8782_s9 + $0x18] sm:$0xff]  }
  0x9f   : > { %7847 = vmatmul.mubr.msk.bf16.gmra.mrb[68].mxu0 %vm804_vm0, %v8524_v27  ;;  %7578 = vmatprep.mubr.msk.bf16.mxu1 %vm804_vm0, %v8525_v28  ;;  %v8590_v27 = vld [vmem:[%s8777_s6 + $0x28] sm:$0xff]   ;;  %v8591_v28 = vld [vmem:[%s8782_s9 + $0x20] sm:$0xff]  }
  0xa0   : > { %7850 = vmatprep.mubr.msk.bf16.mxu0 %vm804_vm0, %v8526_v29  ;;  %v8592_v29 = vld [vmem:[%s8777_s6 + $0x30] sm:$0xff]  }
  0xa6   : > { %7579 = vmatmul.mubr.msk.bf16.gmra.mrb[72].mxu1 %vm804_vm0, %v8527_v30  ;;  %v8593_v30 = vld [vmem:[%s8782_s9 + $0x28] sm:$0xff]  }
  0xa7   : > { %7851 = vmatmul.mubr.msk.bf16.gmra.mrb[72].mxu0 %vm804_vm0, %v8528_v31  ;;  %7582 = vmatprep.mubr.msk.bf16.mxu1 %vm804_vm0, %v8529_v32  ;;  %v8594_v31 = vld [vmem:[%s8777_s6 + $0x38] sm:$0xff]   ;;  %v8595_v32 = vld [vmem:[%s8782_s9 + $0x30] sm:$0xff]  }
  0xa8   : > { %7854 = vmatprep.mubr.msk.bf16.mxu0 %vm804_vm0, %v8530_v33  ;;  %v8596_v33 = vld [vmem:[%s8777_s6 + $0x40] sm:$0xff]  }
  0xae   : > { %7583 = vmatmul.mubr.msk.bf16.gmra.mrb[76].mxu1 %vm804_vm0, %v8531_v34  ;;  %v8597_v34 = vld [vmem:[%s8782_s9 + $0x38] sm:$0xff]  }
  0xaf   : > { %7855 = vmatmul.mubr.msk.bf16.gmra.mrb[76].mxu0 %vm804_vm0, %v8532_v35  ;;  %7586 = vmatprep.mubr.msk.bf16.mxu1 %vm804_vm0, %v8533_v36  ;;  %v8598_v35 = vld [vmem:[%s8777_s6 + $0x48] sm:$0xff]   ;;  %v8599_v36 = vld [vmem:[%s8782_s9 + $0x40] sm:$0xff]  }
  0xb0   : > { %7858 = vmatprep.mubr.msk.bf16.mxu0 %vm804_vm0, %v8534_v37  ;;  %v8600_v37 = vld [vmem:[%s8777_s6 + $0x50] sm:$0xff]  }
  0xb6   : > { %7587 = vmatmul.mubr.msk.bf16.gmra.mrb[80].mxu1 %vm804_vm0, %v8535_v38  ;;  %v8601_v38 = vld [vmem:[%s8782_s9 + $0x48] sm:$0xff]  }
  0xb7   : > { %7859 = vmatmul.mubr.msk.bf16.gmra.mrb[80].mxu0 %vm804_vm0, %v8536_v39  ;;  %7590 = vmatprep.mubr.msk.bf16.mxu1 %vm804_vm0, %v8537_v40  ;;  %v8602_v39 = vld [vmem:[%s8777_s6 + $0x58] sm:$0xff]   ;;  %v8603_v40 = vld [vmem:[%s8782_s9 + $0x50] sm:$0xff]  }
  0xb8   : > { %7862 = vmatprep.mubr.msk.bf16.mxu0 %vm804_vm0, %v8538_v41  ;;  %v8604_v41 = vld [vmem:[%s8777_s6 + $0x60] sm:$0xff]  }
  0xbe   : > { %7591 = vmatmul.mubr.msk.bf16.gmra.mrb[84].mxu1 %vm804_vm0, %v8539_v42  ;;  %v8605_v42 = vld [vmem:[%s8782_s9 + $0x58] sm:$0xff]  }
  0xbf   : > { %7863 = vmatmul.mubr.msk.bf16.gmra.mrb[84].mxu0 %vm804_vm0, %v8540_v43  ;;  %7594 = vmatprep.mubr.msk.bf16.mxu1 %vm804_vm0, %v8541_v44  ;;  %v8606_v43 = vld [vmem:[%s8777_s6 + $0x68] sm:$0xff]   ;;  %v8607_v44 = vld [vmem:[%s8782_s9 + $0x60] sm:$0xff]  }
  0xc0   : > { %7866 = vmatprep.mubr.msk.bf16.mxu0 %vm804_vm0, %v8542_v45  ;;  %v8608_v45 = vld [vmem:[%s8777_s6 + $0x70] sm:$0xff]  }
  0xc6   : > { %7595 = vmatmul.mubr.msk.bf16.gmra.mrb[88].mxu1 %vm804_vm0, %v8543_v46  ;;  %v8609_v46 = vld [vmem:[%s8782_s9 + $0x68] sm:$0xff]  }
  0xc7   : > { %7867 = vmatmul.mubr.msk.bf16.gmra.mrb[88].mxu0 %vm804_vm0, %v8544_v47  ;;  %7598 = vmatprep.mubr.msk.bf16.mxu1 %vm804_vm0, %v8545_v48  ;;  %v8610_v47 = vld [vmem:[%s8777_s6 + $0x78] sm:$0xff]   ;;  %v8611_v48 = vld [vmem:[%s8782_s9 + $0x70] sm:$0xff]  }
  0xc8   : > { %7870 = vmatprep.mubr.msk.bf16.mxu0 %vm804_vm0, %v8546_v49  ;;  %v8612_v49 = vld [vmem:[%s8777_s6 + $0x80] sm:$0xff]  }
  0xce   : > { %7599 = vmatmul.mubr.msk.bf16.gmra.mrb[92].mxu1 %vm804_vm0, %v8547_v50  ;;  %v8613_v50 = vld [vmem:[%s8782_s9 + $0x78] sm:$0xff]  }
  0xcf   : > { %7871 = vmatmul.mubr.msk.bf16.gmra.mrb[92].mxu0 %vm804_vm0, %v8548_v51  ;;  %7602 = vmatprep.mubr.msk.bf16.mxu1 %vm804_vm0, %v8549_v52  ;;  %v8614_v51 = vld [vmem:[%s8777_s6 + $0x88] sm:$0xff]   ;;  %v8615_v52 = vld [vmem:[%s8782_s9 + $0x80] sm:$0xff]  }
  0xd0   : > { %7874 = vmatprep.mubr.msk.bf16.mxu0 %vm804_vm0, %v8550_v53  ;;  %v8616_v53 = vld [vmem:[%s8777_s6 + $0x90] sm:$0xff]  }
  0xd6   : > { %7603 = vmatmul.mubr.msk.bf16.gmra.mrb[96].mxu1 %vm804_vm0, %v8551_v54  ;;  %v8617_v54 = vld [vmem:[%s8782_s9 + $0x88] sm:$0xff]  }
  0xd7   : > { %7875 = vmatmul.mubr.msk.bf16.gmra.mrb[96].mxu0 %vm804_vm0, %v8553_v55  ;;  %7606 = vmatprep.mubr.msk.bf16.mxu1 %vm804_vm0, %v8555_v56  ;;  %v8618_v55 = vld [vmem:[%s8777_s6 + $0x98] sm:$0xff]   ;;  %v8619_v56 = vld [vmem:[%s8782_s9 + $0x90] sm:$0xff]  }
  0xd8   : > { %7878 = vmatprep.mubr.msk.bf16.mxu0 %vm804_vm0, %v8556_v57  ;;  %v8620_v57 = vld [vmem:[%s8777_s6 + $0xa0] sm:$0xff]  }
  0xde   : > { %7607 = vmatmul.mubr.msk.bf16.gmra.mrb[100].mxu1 %vm804_vm0, %v8557_v58  ;;  %v8621_v58 = vld [vmem:[%s8782_s9 + $0x98] sm:$0xff]  }
  0xdf   : > { %7879 = vmatmul.mubr.msk.bf16.gmra.mrb[100].mxu0 %vm804_vm0, %v8558_v59  ;;  %7610 = vmatprep.mubr.msk.bf16.mxu1 %vm804_vm0, %v8559_v60  ;;  %v8622_v59 = vld [vmem:[%s8777_s6 + $0xa8] sm:$0xff]   ;;  %v8623_v60 = vld [vmem:[%s8782_s9 + $0xa0] sm:$0xff]  }
  0xe0   : > { %7882 = vmatprep.mubr.msk.bf16.mxu0 %vm804_vm0, %v8560_v61  ;;  %v8624_v61 = vld [vmem:[%s8777_s6 + $0xb0] sm:$0xff]  }
  0xe6   : > { %7611 = vmatmul.mubr.msk.bf16.gmra.mrb[104].mxu1 %vm804_vm0, %v8561_v62  ;;  %v8625_v62 = vld [vmem:[%s8782_s9 + $0xa8] sm:$0xff]  }
  0xe7   : > { %7883 = vmatmul.mubr.msk.bf16.gmra.mrb[104].mxu0 %vm804_vm0, %v8562_v63  ;;  %7614 = vmatprep.mubr.msk.bf16.mxu1 %vm804_vm0, %v8563_v0  ;;  %v8626_v63 = vld [vmem:[%s8777_s6 + $0xb8] sm:$0xff]   ;;  %v8627_v0 = vld [vmem:[%s8782_s9 + $0xb0] sm:$0xff]  }
  0xe8   : > { %7886 = vmatprep.mubr.msk.bf16.mxu0 %vm804_vm0, %v8564_v1  ;;  %v8628_v1 = vld [vmem:[%s8777_s6 + $0xc0] sm:$0xff]  }
  0xee   : > { %7615 = vmatmul.mubr.msk.bf16.gmra.mrb[108].mxu1 %vm804_vm0, %v8565_v2  ;;  %v8629_v2 = vld [vmem:[%s8782_s9 + $0xb8] sm:$0xff]  }
  0xef   : > { %7887 = vmatmul.mubr.msk.bf16.gmra.mrb[108].mxu0 %vm804_vm0, %v8566_v3  ;;  %7618 = vmatprep.mubr.msk.bf16.mxu1 %vm804_vm0, %v8567_v4  ;;  %v8630_v3 = vld [vmem:[%s8777_s6 + $0xc8] sm:$0xff]   ;;  %v8631_v4 = vld [vmem:[%s8782_s9 + $0xc0] sm:$0xff]  }
  0xf0   : > { %7890 = vmatprep.mubr.msk.bf16.mxu0 %vm804_vm0, %v8568_v5  ;;  %v8632_v5 = vld [vmem:[%s8777_s6 + $0xd0] sm:$0xff]  }
  0xf6   : > { %7619 = vmatmul.mubr.msk.bf16.gmra.mrb[112].mxu1 %vm804_vm0, %v8569_v6  ;;  %v8633_v6 = vld [vmem:[%s8782_s9 + $0xc8] sm:$0xff]  }
  0xf7   : > { %7891 = vmatmul.mubr.msk.bf16.gmra.mrb[112].mxu0 %vm804_vm0, %v8570_v7  ;;  %7622 = vmatprep.mubr.msk.bf16.mxu1 %vm804_vm0, %v8571_v8  ;;  %v8634_v7 = vld [vmem:[%s8777_s6 + $0xd8] sm:$0xff]   ;;  %v8635_v8 = vld [vmem:[%s8782_s9 + $0xd0] sm:$0xff]  }
  0xf8   : > { %7894 = vmatprep.mubr.msk.bf16.mxu0 %vm804_vm0, %v8572_v9  ;;  %v8636_v9 = vld [vmem:[%s8777_s6 + $0xe0] sm:$0xff]  }
  0xfe   : > { %7623 = vmatmul.mubr.msk.bf16.gmra.mrb[116].mxu1 %vm804_vm0, %v8573_v10  ;;  %v8637_v10 = vld [vmem:[%s8782_s9 + $0xd8] sm:$0xff]  }
  0xff   : > { %7895 = vmatmul.mubr.msk.bf16.gmra.mrb[116].mxu0 %vm804_vm0, %v8574_v11  ;;  %7626 = vmatprep.mubr.msk.bf16.mxu1 %vm804_vm0, %v8575_v12  ;;  %v8638_v11 = vld [vmem:[%s8777_s6 + $0xe8] sm:$0xff]   ;;  %v8639_v12 = vld [vmem:[%s8782_s9 + $0xe0] sm:$0xff]  }
 0x100   : > { %7898 = vmatprep.mubr.msk.bf16.mxu0 %vm804_vm0, %v8576_v13  ;;  %v8640_v13 = vld [vmem:[%s8777_s6 + $0xf0] sm:$0xff]  }
 0x106   : > { %7627 = vmatmul.mubr.msk.bf16.gmra.mrb[120].mxu1 %vm804_vm0, %v8577_v14  ;;  %v8641_v14 = vld [vmem:[%s8782_s9 + $0xe8] sm:$0xff]  }
 0x107   : > { %7899 = vmatmul.mubr.msk.bf16.gmra.mrb[120].mxu0 %vm804_vm0, %v8578_v15  ;;  %7630 = vmatprep.mubr.msk.bf16.mxu1 %vm804_vm0, %v8579_v16  ;;  %v8642_v15 = vld [vmem:[%s8777_s6 + $0xf8] sm:$0xff]   ;;  %v8643_v16 = vld [vmem:[%s8782_s9 + $0xf0] sm:$0xff]  }
 0x108   : > { %7902 = vmatprep.mubr.msk.bf16.mxu0 %vm804_vm0, %v8580_v17  ;;  %v8644_v17 = vld [vmem:[%s8777_s6 + $0x100] sm:$0xff]  }
 0x10e   : > { %7631 = vmatmul.mubr.msk.bf16.gmra.mrb[124].mxu1 %vm804_vm0, %v8581_v18  ;;  %v8645_v18 = vld [vmem:[%s8782_s9 + $0xf8] sm:$0xff]  }
 0x10f   : > { %7903 = vmatmul.mubr.msk.bf16.gmra.mrb[124].mxu0 %vm804_vm0, %v8582_v19  ;;  %7642 = vmatprep.mubr.msk.bf16.mxu1 %vm804_vm0, %v8583_v20  ;;  %v8646_v19 = vld [vmem:[%s8777_s6 + $0x108] sm:$0xff]   ;;  %v8647_v20 = vld [vmem:[%s8782_s9 + $0x100] sm:$0xff]  }
 0x110   : > { %7914 = vmatprep.mubr.msk.bf16.mxu0 %vm804_vm0, %v8584_v21  ;;  %v8648_v21 = vld [vmem:[%s8777_s6 + $0x110] sm:$0xff]  }
 0x116   : > { %7643 = vmatmul.mubr.msk.bf16.vlgmr.msra.gmra.mrb[0].mxu1 %vm804_vm0, %v8585_v22  ;;  %v8649_v22 = vld [vmem:[%s8782_s9 + $0x108] sm:$0xff]  }
 0x117   : > { %7915 = vmatmul.mubr.msk.bf16.vlgmr.msra.gmra.mrb[0].mxu0 %vm804_vm0, %v8586_v23  ;;  %7646 = vmatprep.mubr.msk.bf16.mxu1 %vm804_vm0, %v8587_v24  ;;  %v8650_v23 = vld [vmem:[%s8777_s6 + $0x118] sm:$0xff]   ;;  %v8651_v24 = vld [vmem:[%s8782_s9 + $0x110] sm:$0xff]  }
 0x118   : > { %7918 = vmatprep.mubr.msk.bf16.mxu0 %vm804_vm0, %v8588_v25  ;;  %v8652_v25 = vld [vmem:[%s8777_s6 + $0x120] sm:$0xff]  }
 0x11e   : > { %7647 = vmatmul.mubr.msk.bf16.gmra.mrb[4].mxu1 %vm804_vm0, %v8589_v26  ;;  %v8653_v26 = vld [vmem:[%s8782_s9 + $0x118] sm:$0xff]  }
 0x11f   : > { %7919 = vmatmul.mubr.msk.bf16.gmra.mrb[4].mxu0 %vm804_vm0, %v8590_v27  ;;  %7650 = vmatprep.mubr.msk.bf16.mxu1 %vm804_vm0, %v8591_v28  ;;  %v8654_v27 = vld [vmem:[%s8777_s6 + $0x128] sm:$0xff]   ;;  %v8655_v28 = vld [vmem:[%s8782_s9 + $0x120] sm:$0xff]  }
 0x120   : > { %7922 = vmatprep.mubr.msk.bf16.mxu0 %vm804_vm0, %v8592_v29  ;;  %v8656_v29 = vld [vmem:[%s8777_s6 + $0x130] sm:$0xff]  }
 0x126   : > { %7651 = vmatmul.mubr.msk.bf16.gmra.mrb[8].mxu1 %vm804_vm0, %v8593_v30  ;;  %v8657_v30 = vld [vmem:[%s8782_s9 + $0x128] sm:$0xff]  }
 0x127   : > { %7923 = vmatmul.mubr.msk.bf16.gmra.mrb[8].mxu0 %vm804_vm0, %v8594_v31  ;;  %7654 = vmatprep.mubr.msk.bf16.mxu1 %vm804_vm0, %v8595_v32  ;;  %v8658_v31 = vld [vmem:[%s8777_s6 + $0x138] sm:$0xff]   ;;  %v8659_v32 = vld [vmem:[%s8782_s9 + $0x130] sm:$0xff]  }
 0x128   : > { %7926 = vmatprep.mubr.msk.bf16.mxu0 %vm804_vm0, %v8596_v33  ;;  %v8660_v33 = vld [vmem:[%s8777_s6 + $0x140] sm:$0xff]  }
 0x12e   : > { %7655 = vmatmul.mubr.msk.bf16.gmra.mrb[12].mxu1 %vm804_vm0, %v8597_v34  ;;  %v8661_v34 = vld [vmem:[%s8782_s9 + $0x138] sm:$0xff]  }
 0x12f   : > { %7927 = vmatmul.mubr.msk.bf16.gmra.mrb[12].mxu0 %vm804_vm0, %v8598_v35  ;;  %7658 = vmatprep.mubr.msk.bf16.mxu1 %vm804_vm0, %v8599_v36  ;;  %v8662_v35 = vld [vmem:[%s8777_s6 + $0x148] sm:$0xff]   ;;  %v8663_v36 = vld [vmem:[%s8782_s9 + $0x140] sm:$0xff]  }
 0x130   : > { %7930 = vmatprep.mubr.msk.bf16.mxu0 %vm804_vm0, %v8600_v37  ;;  %v8664_v37 = vld [vmem:[%s8777_s6 + $0x150] sm:$0xff]  }
 0x136   : > { %7659 = vmatmul.mubr.msk.bf16.gmra.mrb[16].mxu1 %vm804_vm0, %v8601_v38  ;;  %v8665_v38 = vld [vmem:[%s8782_s9 + $0x148] sm:$0xff]  }
 0x137   : > { %7931 = vmatmul.mubr.msk.bf16.gmra.mrb[16].mxu0 %vm804_vm0, %v8602_v39  ;;  %7662 = vmatprep.mubr.msk.bf16.mxu1 %vm804_vm0, %v8603_v40  ;;  %v8666_v39 = vld [vmem:[%s8777_s6 + $0x158] sm:$0xff]   ;;  %v8667_v40 = vld [vmem:[%s8782_s9 + $0x150] sm:$0xff]  }
 0x138   : > { %7934 = vmatprep.mubr.msk.bf16.mxu0 %vm804_vm0, %v8604_v41  ;;  %v8668_v41 = vld [vmem:[%s8777_s6 + $0x160] sm:$0xff]  }
 0x13e   : > { %7663 = vmatmul.mubr.msk.bf16.gmra.mrb[20].mxu1 %vm804_vm0, %v8605_v42  ;;  %v8669_v42 = vld [vmem:[%s8782_s9 + $0x158] sm:$0xff]  }
 0x13f   : > { %7935 = vmatmul.mubr.msk.bf16.gmra.mrb[20].mxu0 %vm804_vm0, %v8606_v43  ;;  %7666 = vmatprep.mubr.msk.bf16.mxu1 %vm804_vm0, %v8607_v44  ;;  %v8670_v43 = vld [vmem:[%s8777_s6 + $0x168] sm:$0xff]   ;;  %v8671_v44 = vld [vmem:[%s8782_s9 + $0x160] sm:$0xff]  }
 0x140   : > { %7938 = vmatprep.mubr.msk.bf16.mxu0 %vm804_vm0, %v8608_v45  ;;  %v8672_v45 = vld [vmem:[%s8777_s6 + $0x170] sm:$0xff]  }
 0x146   : > { %7667 = vmatmul.mubr.msk.bf16.gmra.mrb[24].mxu1 %vm804_vm0, %v8609_v46  ;;  %v8673_v46 = vld [vmem:[%s8782_s9 + $0x168] sm:$0xff]  }
 0x147   : > { %7939 = vmatmul.mubr.msk.bf16.gmra.mrb[24].mxu0 %vm804_vm0, %v8610_v47  ;;  %7670 = vmatprep.mubr.msk.bf16.mxu1 %vm804_vm0, %v8611_v48  ;;  %v8674_v47 = vld [vmem:[%s8777_s6 + $0x178] sm:$0xff]   ;;  %v8675_v48 = vld [vmem:[%s8782_s9 + $0x170] sm:$0xff]  }
 0x148   : > { %7942 = vmatprep.mubr.msk.bf16.mxu0 %vm804_vm0, %v8612_v49  ;;  %v8676_v49 = vld [vmem:[%s8777_s6 + $0x180] sm:$0xff]  }
 0x14e   : > { %7671 = vmatmul.mubr.msk.bf16.gmra.mrb[28].mxu1 %vm804_vm0, %v8613_v50  ;;  %v8677_v50 = vld [vmem:[%s8782_s9 + $0x178] sm:$0xff]  }
 0x14f   : > { %7943 = vmatmul.mubr.msk.bf16.gmra.mrb[28].mxu0 %vm804_vm0, %v8614_v51  ;;  %7674 = vmatprep.mubr.msk.bf16.mxu1 %vm804_vm0, %v8615_v52  ;;  %v8678_v51 = vld [vmem:[%s8777_s6 + $0x188] sm:$0xff]   ;;  %v8679_v52 = vld [vmem:[%s8782_s9 + $0x180] sm:$0xff]  }
 0x150   : > { %7946 = vmatprep.mubr.msk.bf16.mxu0 %vm804_vm0, %v8616_v53  ;;  %v8680_v53 = vld [vmem:[%s8777_s6 + $0x190] sm:$0xff]  }
 0x156   : > { %7675 = vmatmul.mubr.msk.bf16.gmra.mrb[32].mxu1 %vm804_vm0, %v8617_v54  ;;  %v8681_v54 = vld [vmem:[%s8782_s9 + $0x188] sm:$0xff]  }
 0x157   : > { %7947 = vmatmul.mubr.msk.bf16.gmra.mrb[32].mxu0 %vm804_vm0, %v8618_v55  ;;  %7678 = vmatprep.mubr.msk.bf16.mxu1 %vm804_vm0, %v8619_v56  ;;  %v8682_v55 = vld [vmem:[%s8777_s6 + $0x198] sm:$0xff]   ;;  %v8683_v56 = vld [vmem:[%s8782_s9 + $0x190] sm:$0xff]  }
 0x158   : > { %7950 = vmatprep.mubr.msk.bf16.mxu0 %vm804_vm0, %v8620_v57  ;;  %v8684_v57 = vld [vmem:[%s8777_s6 + $0x1a0] sm:$0xff]  }
 0x15e   : > { %7679 = vmatmul.mubr.msk.bf16.gmra.mrb[36].mxu1 %vm804_vm0, %v8621_v58  ;;  %v8685_v58 = vld [vmem:[%s8782_s9 + $0x198] sm:$0xff]  }
 0x15f   : > { %7951 = vmatmul.mubr.msk.bf16.gmra.mrb[36].mxu0 %vm804_vm0, %v8622_v59  ;;  %7682 = vmatprep.mubr.msk.bf16.mxu1 %vm804_vm0, %v8623_v60  ;;  %v8686_v59 = vld [vmem:[%s8777_s6 + $0x1a8] sm:$0xff]   ;;  %v8687_v60 = vld [vmem:[%s8782_s9 + $0x1a0] sm:$0xff]  }
 0x160   : > { %7954 = vmatprep.mubr.msk.bf16.mxu0 %vm804_vm0, %v8624_v61  ;;  %v8688_v61 = vld [vmem:[%s8777_s6 + $0x1b0] sm:$0xff]  }
 0x166   : > { %7683 = vmatmul.mubr.msk.bf16.gmra.mrb[40].mxu1 %vm804_vm0, %v8625_v62  ;;  %v8689_v62 = vld [vmem:[%s8782_s9 + $0x1a8] sm:$0xff]  }
 0x167   : > { %7955 = vmatmul.mubr.msk.bf16.gmra.mrb[40].mxu0 %vm804_vm0, %v8626_v63  ;;  %7686 = vmatprep.mubr.msk.bf16.mxu1 %vm804_vm0, %v8627_v0  ;;  %v8690_v63 = vld [vmem:[%s8777_s6 + $0x1b8] sm:$0xff]   ;;  %v8691_v0 = vld [vmem:[%s8782_s9 + $0x1b0] sm:$0xff]  }
 0x168   : > { %7958 = vmatprep.mubr.msk.bf16.mxu0 %vm804_vm0, %v8628_v1  ;;  %v8692_v1 = vld [vmem:[%s8777_s6 + $0x1c0] sm:$0xff]  }
 0x16e   : > { %7687 = vmatmul.mubr.msk.bf16.gmra.mrb[44].mxu1 %vm804_vm0, %v8629_v2 }
 0x16f   : > { %7959 = vmatmul.mubr.msk.bf16.gmra.mrb[44].mxu0 %vm804_vm0, %v8630_v3  ;;  %7690 = vmatprep.mubr.msk.bf16.mxu1 %vm804_vm0, %v8631_v4 }
 0x170   : > { %7962 = vmatprep.mubr.msk.bf16.mxu0 %vm804_vm0, %v8632_v5  ;;  %v8693_v5 = vld [vmem:[%s8782_s9 + $0x1b8] sm:$0xff]  }
 0x176   : > { %7691 = vmatmul.mubr.msk.bf16.gmra.mrb[48].mxu1 %vm804_vm0, %v8633_v6 }
 0x177   : > { %7963 = vmatmul.mubr.msk.bf16.gmra.mrb[48].mxu0 %vm804_vm0, %v8634_v7  ;;  %7694 = vmatprep.mubr.msk.bf16.mxu1 %vm804_vm0, %v8635_v8 }
 0x178   : > { %7966 = vmatprep.mubr.msk.bf16.mxu0 %vm804_vm0, %v8636_v9  ;;  %v8694_v9 = vld [vmem:[%s8777_s6 + $0x1c8] sm:$0xff]  }
 0x17e   : > { %7695 = vmatmul.mubr.msk.bf16.gmra.mrb[52].mxu1 %vm804_vm0, %v8637_v10  ;;  %v8695_v10 = vld [vmem:[%s8782_s9 + $0x1c0] sm:$0xff]  }
 0x17f   : > { %7967 = vmatmul.mubr.msk.bf16.gmra.mrb[52].mxu0 %vm804_vm0, %v8638_v11  ;;  %7698 = vmatprep.mubr.msk.bf16.mxu1 %vm804_vm0, %v8639_v12 }
 0x180   : > { %7970 = vmatprep.mubr.msk.bf16.mxu0 %vm804_vm0, %v8640_v13 }
 0x186   : > { %7699 = vmatmul.mubr.msk.bf16.gmra.mrb[56].mxu1 %vm804_vm0, %v8641_v14  ;;  %v8696_v14 = vld [vmem:[%s8777_s6 + $0x1d0] sm:$0xff]  }
 0x187   : > { %7971 = vmatmul.mubr.msk.bf16.gmra.mrb[56].mxu0 %vm804_vm0, %v8642_v15  ;;  %7702 = vmatprep.mubr.msk.bf16.mxu1 %vm804_vm0, %v8643_v16 }
 0x188   : > { %7974 = vmatprep.mubr.msk.bf16.mxu0 %vm804_vm0, %v8644_v17 }
 0x18e   : > { %7703 = vmatmul.mubr.msk.bf16.gmra.mrb[60].mxu1 %vm804_vm0, %v8645_v18 }
 0x18f   : > { %7975 = vmatmul.mubr.msk.bf16.gmra.mrb[60].mxu0 %vm804_vm0, %v8646_v19  ;;  %7706 = vmatprep.mubr.msk.bf16.mxu1 %vm804_vm0, %v8647_v20 }
 0x190   : > { %7978 = vmatprep.mubr.msk.bf16.mxu0 %vm804_vm0, %v8648_v21 }
 0x196   : > { %7707 = vmatmul.mubr.msk.bf16.gmra.mrb[64].mxu1 %vm804_vm0, %v8649_v22 }
 0x197   : > { %7979 = vmatmul.mubr.msk.bf16.gmra.mrb[64].mxu0 %vm804_vm0, %v8650_v23  ;;  %7710 = vmatprep.mubr.msk.bf16.mxu1 %vm804_vm0, %v8651_v24 }
 0x198   : > { %7982 = vmatprep.mubr.msk.bf16.mxu0 %vm804_vm0, %v8652_v25 }
 0x19e   : > { %7711 = vmatmul.mubr.msk.bf16.gmra.mrb[68].mxu1 %vm804_vm0, %v8653_v26 }
 0x19f   : > { %7983 = vmatmul.mubr.msk.bf16.gmra.mrb[68].mxu0 %vm804_vm0, %v8654_v27  ;;  %7714 = vmatprep.mubr.msk.bf16.mxu1 %vm804_vm0, %v8655_v28 }
 0x1a0   : > { %7986 = vmatprep.mubr.msk.bf16.mxu0 %vm804_vm0, %v8656_v29 }
 0x1a6   : > { %7715 = vmatmul.mubr.msk.bf16.gmra.mrb[72].mxu1 %vm804_vm0, %v8657_v30 }
 0x1a7   : > { %7987 = vmatmul.mubr.msk.bf16.gmra.mrb[72].mxu0 %vm804_vm0, %v8658_v31  ;;  %7718 = vmatprep.mubr.msk.bf16.mxu1 %vm804_vm0, %v8659_v32  ;;  %v8697_v32 = vld [vmem:[%s8782_s9 + $0x1c8] sm:$0xff]  }
 0x1a8   : > { %7990 = vmatprep.mubr.msk.bf16.mxu0 %vm804_vm0, %v8660_v33 }
 0x1ae   : > { %7719 = vmatmul.mubr.msk.bf16.gmra.mrb[76].mxu1 %vm804_vm0, %v8661_v34 }
 0x1af   : > { %7991 = vmatmul.mubr.msk.bf16.gmra.mrb[76].mxu0 %vm804_vm0, %v8662_v35  ;;  %7722 = vmatprep.mubr.msk.bf16.mxu1 %vm804_vm0, %v8663_v36 }
 0x1b0   : > { %7994 = vmatprep.mubr.msk.bf16.mxu0 %vm804_vm0, %v8664_v37  ;;  %v8698_v37 = vld [vmem:[%s8777_s6 + $0x1d8] sm:$0xff]  }
 0x1b6   : > { %7723 = vmatmul.mubr.msk.bf16.gmra.mrb[80].mxu1 %vm804_vm0, %v8665_v38  ;;  %v8699_v38 = vld [vmem:[%s8782_s9 + $0x1d0] sm:$0xff]  }
 0x1b7   : > { %7995 = vmatmul.mubr.msk.bf16.gmra.mrb[80].mxu0 %vm804_vm0, %v8666_v39  ;;  %7726 = vmatprep.mubr.msk.bf16.mxu1 %vm804_vm0, %v8667_v40 }
 0x1b8   : > { %7998 = vmatprep.mubr.msk.bf16.mxu0 %vm804_vm0, %v8668_v41 }
 0x1be   : > { %7727 = vmatmul.mubr.msk.bf16.gmra.mrb[84].mxu1 %vm804_vm0, %v8669_v42  ;;  %v8700_v42 = vld [vmem:[%s8777_s6 + $0x1e0] sm:$0xff]  }
 0x1bf   : > { %7999 = vmatmul.mubr.msk.bf16.gmra.mrb[84].mxu0 %vm804_vm0, %v8670_v43  ;;  %7730 = vmatprep.mubr.msk.bf16.mxu1 %vm804_vm0, %v8671_v44 }
 0x1c0   : > { %8002 = vmatprep.mubr.msk.bf16.mxu0 %vm804_vm0, %v8672_v45 }
 0x1c6   : > { %7731 = vmatmul.mubr.msk.bf16.gmra.mrb[88].mxu1 %vm804_vm0, %v8673_v46 }
 0x1c7   : > { %8003 = vmatmul.mubr.msk.bf16.gmra.mrb[88].mxu0 %vm804_vm0, %v8674_v47  ;;  %7734 = vmatprep.mubr.msk.bf16.mxu1 %vm804_vm0, %v8675_v48 }
 0x1c8   : > { %8006 = vmatprep.mubr.msk.bf16.mxu0 %vm804_vm0, %v8676_v49 }
 0x1ce   : > { %7735 = vmatmul.mubr.msk.bf16.gmra.mrb[92].mxu1 %vm804_vm0, %v8677_v50 }
 0x1cf   : > { %8007 = vmatmul.mubr.msk.bf16.gmra.mrb[92].mxu0 %vm804_vm0, %v8678_v51  ;;  %7738 = vmatprep.mubr.msk.bf16.mxu1 %vm804_vm0, %v8679_v52 }
 0x1d0   : > { %8010 = vmatprep.mubr.msk.bf16.mxu0 %vm804_vm0, %v8680_v53 }
 0x1d6   : > { %7739 = vmatmul.mubr.msk.bf16.gmra.mrb[96].mxu1 %vm804_vm0, %v8681_v54 }
 0x1d7   : > { %8011 = vmatmul.mubr.msk.bf16.gmra.mrb[96].mxu0 %vm804_vm0, %v8682_v55  ;;  %7742 = vmatprep.mubr.msk.bf16.mxu1 %vm804_vm0, %v8683_v56 }
 0x1d8   : > { %8014 = vmatprep.mubr.msk.bf16.mxu0 %vm804_vm0, %v8684_v57 }
 0x1de   : > { %7743 = vmatmul.mubr.msk.bf16.gmra.mrb[100].mxu1 %vm804_vm0, %v8685_v58 }
 0x1df   : > { %8015 = vmatmul.mubr.msk.bf16.gmra.mrb[100].mxu0 %vm804_vm0, %v8686_v59  ;;  %7746 = vmatprep.mubr.msk.bf16.mxu1 %vm804_vm0, %v8687_v60  ;;  %v8701_v60 = vld [vmem:[%s8782_s9 + $0x1d8] sm:$0xff]  }
 0x1e0   : > { %8018 = vmatprep.mubr.msk.bf16.mxu0 %vm804_vm0, %v8688_v61 }
 0x1e6   : > { %7747 = vmatmul.mubr.msk.bf16.gmra.mrb[104].mxu1 %vm804_vm0, %v8689_v62 }
 0x1e7   : > { %8019 = vmatmul.mubr.msk.bf16.gmra.mrb[104].mxu0 %vm804_vm0, %v8690_v63  ;;  %7750 = vmatprep.mubr.msk.bf16.mxu1 %vm804_vm0, %v8691_v0 }
 0x1e8   : > { %8022 = vmatprep.mubr.msk.bf16.mxu0 %vm804_vm0, %v8692_v1  ;;  %v8702_v1 = vld [vmem:[%s8777_s6 + $0x1e8] sm:$0xff]  }
 0x1e9   : > { %v7644_v2 = vpop.f32.mrb[0].mxu1 }
 0x1ea   : > { %v7916_v3 = vpop.f32.mrb[0].mxu0  ;;  %v2116_v4 = vpop.f32.mrb[1].mxu1 }
 0x1eb   : > { %v8042_v6 = vadd.f32 %v7916_v3, %v7644_v2  ;;  %v4678_v7 = vpop.f32.mrb[1].mxu0  ;;  %v7645_v8 = vpop.f32.mrb[2].mxu1  ;;  %v8703_v2 = vld [vmem:[%s8782_s9 + $0x1e0] sm:$0xff]  }
 0x1ec   : > { %v8043_v11 = vadd.f32 %v4678_v7, %v2116_v4  ;;  %v7917_v12 = vpop.f32.mrb[2].mxu0  ;;  %v2119_v13 = vpop.f32.mrb[3].mxu1 }
 0x1ed   : > { %vm5319_vm2 = vcmp.ge.f32.partialorder %v8042_v6, 0.0  ;;  %v5447_v15 = vmul.f32 0.2, %v8042_v6  ;;  %v8044_v16 = vadd.f32 %v7917_v12, %v7645_v8  ;;  %v4681_v17 = vpop.f32.mrb[3].mxu0 }
 0x1ee   : > { %vm5317_vm3 = vcmp.ge.f32.partialorder %v8043_v11, 0.0  ;;  %v5445_v18 = vmul.f32 0.2, %v8043_v11  ;;  %v8045_v19 = vadd.f32 %v4681_v17, %v2119_v13  ;;  %7751 = vmatmul.mubr.msk.bf16.gmra.mrb[108].mxu1 %vm804_vm0, %v8693_v5 }
 0x1ef   : > { %v5575_v20 = vsel %vm5319_vm2, %v8042_v6, %v5447_v15  ;;  %vm5320_vm5 = vcmp.ge.f32.partialorder %v8044_v16, 0.0  ;;  %v5448_v21 = vmul.f32 0.2, %v8044_v16  ;;  %8023 = vmatmul.mubr.msk.bf16.gmra.mrb[108].mxu0 %vm804_vm0, %v8694_v9  ;;  %7754 = vmatprep.mubr.msk.bf16.mxu1 %vm804_vm0, %v8695_v10  ;;  %v8704_v6 = vld [vmem:[%s8777_s6 + $0x1f0] sm:$0xff]  }
 0x1f0   : > { %v7100_v22 = vpack.c.bf16 %v5575_v20, %v5575_v20  ;;  %v5573_v23 = vsel %vm5317_vm3, %v8043_v11, %v5445_v18  ;;  %vm5318_vm6 = vcmp.ge.f32.partialorder %v8045_v19, 0.0  ;;  %v5446_v24 = vmul.f32 0.2, %v8045_v19  ;;  %8026 = vmatprep.mubr.msk.bf16.mxu0 %vm804_vm0, %v8696_v14 }
 0x1f1   : > { %v7098_v25 = vpack.c.bf16 %v5573_v23, %v5573_v23  ;;  %v5576_v26 = vsel %vm5320_vm5, %v8044_v16, %v5448_v21  ;;  %v7648_v27 = vpop.f32.mrb[4].mxu1 }
 0x1f2   : > { %6216 = vst.msk [vmem:[%s9301_s4 + $0x8] sm:$0xf] %vm6213_vm4, %v7100_v22  ;;  %v7101_v28 = vpack.c.bf16 %v5576_v26, %v5576_v26  ;;  %v5574_v29 = vsel %vm5318_vm6, %v8045_v19, %v5446_v24  ;;  %v7920_v30 = vpop.f32.mrb[4].mxu0  ;;  %v2132_v31 = vpop.f32.mrb[5].mxu1  ;;  %v8705_v24 = vld [vmem:[%s8782_s9 + $0x1e8] sm:$0xff]  }
 0x1f3   : > { %6214 = vst.msk [vmem:[%s9301_s4] sm:$0xf] %vm6213_vm4, %v7098_v25  ;;  %v7099_v33 = vpack.c.bf16 %v5574_v29, %v5574_v29  ;;  %v8046_v34 = vadd.f32 %v7920_v30, %v7648_v27  ;;  %v4694_v35 = vpop.f32.mrb[5].mxu0  ;;  %v7649_v36 = vpop.f32.mrb[6].mxu1  ;;  %v8706_v29 = vld [vmem:[%s8777_s6 + $0x1f8] sm:$0xff]   ;;  %v8707_v30 = vld [vmem:[%s8782_s9 + $0x1f0] sm:$0xff]  }
 0x1f4   : > { %6217 = vst.msk [vmem:[%s9301_s4 + $0xc] sm:$0xf] %vm6213_vm4, %v7101_v28  ;;  %v8047_v39 = vadd.f32 %v4694_v35, %v2132_v31  ;;  %v7921_v40 = vpop.f32.mrb[6].mxu0  ;;  %v2135_v41 = vpop.f32.mrb[7].mxu1 }
 0x1f5   : > { %6215 = vst.msk [vmem:[%s9301_s4 + $0x4] sm:$0xf] %vm6213_vm4, %v7099_v33  ;;  %vm5323_vm7 = vcmp.ge.f32.partialorder %v8046_v34, 0.0  ;;  %v5451_v43 = vmul.f32 0.2, %v8046_v34  ;;  %v8048_v44 = vadd.f32 %v7921_v40, %v7649_v36  ;;  %v4697_v45 = vpop.f32.mrb[7].mxu0 }
 0x1f6   : > { %vm5321_vm8 = vcmp.ge.f32.partialorder %v8047_v39, 0.0  ;;  %v5449_v46 = vmul.f32 0.2, %v8047_v39  ;;  %v8049_v47 = vadd.f32 %v4697_v45, %v2135_v41  ;;  %7755 = vmatmul.mubr.msk.bf16.gmra.mrb[112].mxu1 %vm804_vm0, %v8697_v32 }
 0x1f7   : > { %v5579_v48 = vsel %vm5323_vm7, %v8046_v34, %v5451_v43  ;;  %vm5324_vm9 = vcmp.ge.f32.partialorder %v8048_v44, 0.0  ;;  %v5452_v49 = vmul.f32 0.2, %v8048_v44  ;;  %8027 = vmatmul.mubr.msk.bf16.gmra.mrb[112].mxu0 %vm804_vm0, %v8698_v37  ;;  %7758 = vmatprep.mubr.msk.bf16.mxu1 %vm804_vm0, %v8699_v38  ;;  %v8708_v34 = vld [vmem:[%s8777_s6 + $0x200] sm:$0xff]  }
 0x1f8   : > { %v7104_v50 = vpack.c.bf16 %v5579_v48, %v5579_v48  ;;  %v5577_v51 = vsel %vm5321_vm8, %v8047_v39, %v5449_v46  ;;  %vm5322_vm10 = vcmp.ge.f32.partialorder %v8049_v47, 0.0  ;;  %v5450_v52 = vmul.f32 0.2, %v8049_v47  ;;  %8030 = vmatprep.mubr.msk.bf16.mxu0 %vm804_vm0, %v8700_v42 }
 0x1f9   : > { %v7102_v53 = vpack.c.bf16 %v5577_v51, %v5577_v51  ;;  %v5580_v54 = vsel %vm5324_vm9, %v8048_v44, %v5452_v49  ;;  %v7652_v55 = vpop.f32.mrb[8].mxu1 }
 0x1fa   : > { %6220 = vst.msk [vmem:[%s9301_s4 + $0x18] sm:$0xf] %vm6213_vm4, %v7104_v50  ;;  %v7105_v56 = vpack.c.bf16 %v5580_v54, %v5580_v54  ;;  %v5578_v57 = vsel %vm5322_vm10, %v8049_v47, %v5450_v52  ;;  %v7924_v58 = vpop.f32.mrb[8].mxu0  ;;  %v2148_v59 = vpop.f32.mrb[9].mxu1  ;;  %v8709_v52 = vld [vmem:[%s8782_s9 + $0x1f8] sm:$0xff]  }
 0x1fb   : > { %6218 = vst.msk [vmem:[%s9301_s4 + $0x10] sm:$0xf] %vm6213_vm4, %v7102_v53  ;;  %v7103_v61 = vpack.c.bf16 %v5578_v57, %v5578_v57  ;;  %v8050_v62 = vadd.f32 %v7924_v58, %v7652_v55  ;;  %v4710_v63 = vpop.f32.mrb[9].mxu0  ;;  %v7653_v0 = vpop.f32.mrb[10].mxu1  ;;  %v8710_v57 = vld [vmem:[%s8777_s6 + $0x208] sm:$0xff]  }
 0x1fc   : > { %6221 = vst.msk [vmem:[%s9301_s4 + $0x1c] sm:$0xf] %vm6213_vm4, %v7105_v56  ;;  %v8051_v3 = vadd.f32 %v4710_v63, %v2148_v59  ;;  %v7925_v4 = vpop.f32.mrb[10].mxu0  ;;  %v2151_v5 = vpop.f32.mrb[11].mxu1 }
 0x1fd   : > { %6219 = vst.msk [vmem:[%s9301_s4 + $0x14] sm:$0xf] %vm6213_vm4, %v7103_v61  ;;  %vm5327_vm11 = vcmp.ge.f32.partialorder %v8050_v62, 0.0  ;;  %v5455_v7 = vmul.f32 0.2, %v8050_v62  ;;  %v8052_v8 = vadd.f32 %v7925_v4, %v7653_v0  ;;  %v4713_v9 = vpop.f32.mrb[11].mxu0 }
 0x1fe   : > { %vm5325_vm12 = vcmp.ge.f32.partialorder %v8051_v3, 0.0  ;;  %v5453_v10 = vmul.f32 0.2, %v8051_v3  ;;  %v8053_v11 = vadd.f32 %v4713_v9, %v2151_v5  ;;  %7759 = vmatmul.mubr.msk.bf16.gmra.mrb[116].mxu1 %vm804_vm0, %v8701_v60 }
 0x1ff   : > { %v5583_v12 = vsel %vm5327_vm11, %v8050_v62, %v5455_v7  ;;  %vm5328_vm13 = vcmp.ge.f32.partialorder %v8052_v8, 0.0  ;;  %v5456_v13 = vmul.f32 0.2, %v8052_v8  ;;  %8031 = vmatmul.mubr.msk.bf16.gmra.mrb[116].mxu0 %vm804_vm0, %v8702_v1  ;;  %7762 = vmatprep.mubr.msk.bf16.mxu1 %vm804_vm0, %v8703_v2 }
 0x200   : > { %v7108_v14 = vpack.c.bf16 %v5583_v12, %v5583_v12  ;;  %v5581_v15 = vsel %vm5325_vm12, %v8051_v3, %v5453_v10  ;;  %vm5326_vm14 = vcmp.ge.f32.partialorder %v8053_v11, 0.0  ;;  %v5454_v16 = vmul.f32 0.2, %v8053_v11  ;;  %8034 = vmatprep.mubr.msk.bf16.mxu0 %vm804_vm0, %v8704_v6 }
 0x201   : > { %v7106_v17 = vpack.c.bf16 %v5581_v15, %v5581_v15  ;;  %v5584_v18 = vsel %vm5328_vm13, %v8052_v8, %v5456_v13  ;;  %v7656_v19 = vpop.f32.mrb[12].mxu1 }
 0x202   : > { %6224 = vst.msk [vmem:[%s9301_s4 + $0x28] sm:$0xf] %vm6213_vm4, %v7108_v14  ;;  %v7109_v20 = vpack.c.bf16 %v5584_v18, %v5584_v18  ;;  %v5582_v21 = vsel %vm5326_vm14, %v8053_v11, %v5454_v16  ;;  %v7928_v22 = vpop.f32.mrb[12].mxu0  ;;  %v2164_v23 = vpop.f32.mrb[13].mxu1 }
 0x203   : > { %6222 = vst.msk [vmem:[%s9301_s4 + $0x20] sm:$0xf] %vm6213_vm4, %v7106_v17  ;;  %v7107_v25 = vpack.c.bf16 %v5582_v21, %v5582_v21  ;;  %v8054_v26 = vadd.f32 %v7928_v22, %v7656_v19  ;;  %v4726_v27 = vpop.f32.mrb[13].mxu0  ;;  %v7657_v28 = vpop.f32.mrb[14].mxu1 }
 0x204   : > { %6225 = vst.msk [vmem:[%s9301_s4 + $0x2c] sm:$0xf] %vm6213_vm4, %v7109_v20  ;;  %v8055_v31 = vadd.f32 %v4726_v27, %v2164_v23  ;;  %v7929_v32 = vpop.f32.mrb[14].mxu0  ;;  %v2167_v33 = vpop.f32.mrb[15].mxu1 }
 0x205   : > { %6223 = vst.msk [vmem:[%s9301_s4 + $0x24] sm:$0xf] %vm6213_vm4, %v7107_v25  ;;  %vm5331_vm15 = vcmp.ge.f32.partialorder %v8054_v26, 0.0  ;;  %v5459_v35 = vmul.f32 0.2, %v8054_v26  ;;  %v8056_v36 = vadd.f32 %v7929_v32, %v7657_v28  ;;  %v4729_v37 = vpop.f32.mrb[15].mxu0 }
 0x206   : > { %vm5329_vm1 = vcmp.ge.f32.partialorder %v8055_v31, 0.0  ;;  %v5457_v38 = vmul.f32 0.2, %v8055_v31  ;;  %v8057_v39 = vadd.f32 %v4729_v37, %v2167_v33  ;;  %7763 = vmatmul.mubr.msk.bf16.gmra.mrb[120].mxu1 %vm804_vm0, %v8705_v24 }
 0x207   : > { %v5587_v40 = vsel %vm5331_vm15, %v8054_v26, %v5459_v35  ;;  %vm5332_vm2 = vcmp.ge.f32.partialorder %v8056_v36, 0.0  ;;  %v5460_v41 = vmul.f32 0.2, %v8056_v36  ;;  %8035 = vmatmul.mubr.msk.bf16.gmra.mrb[120].mxu0 %vm804_vm0, %v8706_v29  ;;  %7766 = vmatprep.mubr.msk.bf16.mxu1 %vm804_vm0, %v8707_v30 }
 0x208   : > { %v7112_v42 = vpack.c.bf16 %v5587_v40, %v5587_v40  ;;  %v5585_v43 = vsel %vm5329_vm1, %v8055_v31, %v5457_v38  ;;  %vm5330_vm3 = vcmp.ge.f32.partialorder %v8057_v39, 0.0  ;;  %v5458_v44 = vmul.f32 0.2, %v8057_v39  ;;  %8038 = vmatprep.mubr.msk.bf16.mxu0 %vm804_vm0, %v8708_v34 }
 0x209   : > { %v7110_v45 = vpack.c.bf16 %v5585_v43, %v5585_v43  ;;  %v5588_v46 = vsel %vm5332_vm2, %v8056_v36, %v5460_v41  ;;  %v7660_v47 = vpop.f32.mrb[16].mxu1 }
 0x20a   : > { %6228 = vst.msk [vmem:[%s9301_s4 + $0x38] sm:$0xf] %vm6213_vm4, %v7112_v42  ;;  %v7113_v48 = vpack.c.bf16 %v5588_v46, %v5588_v46  ;;  %v5586_v49 = vsel %vm5330_vm3, %v8057_v39, %v5458_v44  ;;  %v7932_v50 = vpop.f32.mrb[16].mxu0  ;;  %v2180_v51 = vpop.f32.mrb[17].mxu1 }
 0x20b   : > { %6226 = vst.msk [vmem:[%s9301_s4 + $0x30] sm:$0xf] %vm6213_vm4, %v7110_v45  ;;  %v7111_v53 = vpack.c.bf16 %v5586_v49, %v5586_v49  ;;  %v8058_v54 = vadd.f32 %v7932_v50, %v7660_v47  ;;  %v4742_v55 = vpop.f32.mrb[17].mxu0  ;;  %v7661_v56 = vpop.f32.mrb[18].mxu1 }
 0x20c   : > { %6229 = vst.msk [vmem:[%s9301_s4 + $0x3c] sm:$0xf] %vm6213_vm4, %v7113_v48  ;;  %v8059_v58 = vadd.f32 %v4742_v55, %v2180_v51  ;;  %v7933_v59 = vpop.f32.mrb[18].mxu0  ;;  %v2183_v60 = vpop.f32.mrb[19].mxu1 }
 0x20d   : > { %6227 = vst.msk [vmem:[%s9301_s4 + $0x34] sm:$0xf] %vm6213_vm4, %v7111_v53  ;;  %vm5335_vm5 = vcmp.ge.f32.partialorder %v8058_v54, 0.0  ;;  %v5463_v61 = vmul.f32 0.2, %v8058_v54  ;;  %v8060_v62 = vadd.f32 %v7933_v59, %v7661_v56  ;;  %v4745_v63 = vpop.f32.mrb[19].mxu0 }
 0x20e   : > { %vm5333_vm6 = vcmp.ge.f32.partialorder %v8059_v58, 0.0  ;;  %v5461_v0 = vmul.f32 0.2, %v8059_v58  ;;  %v8061_v1 = vadd.f32 %v4745_v63, %v2183_v60  ;;  %7767 = vmatmul.mubr.msk.bf16.gmra.mrb[124].mxu1 %vm804_vm0, %v8709_v52 }
 0x20f   : > { %v5591_v2 = vsel %vm5335_vm5, %v8058_v54, %v5463_v61  ;;  %vm5336_vm7 = vcmp.ge.f32.partialorder %v8060_v62, 0.0  ;;  %v5464_v3 = vmul.f32 0.2, %v8060_v62  ;;  %8039 = vmatmul.mubr.msk.bf16.gmra.mrb[124].mxu0 %vm804_vm0, %v8710_v57 }
 0x210   : > { %v7116_v4 = vpack.c.bf16 %v5591_v2, %v5591_v2  ;;  %v5589_v5 = vsel %vm5333_vm6, %v8059_v58, %v5461_v0  ;;  %vm5334_vm8 = vcmp.ge.f32.partialorder %v8061_v1, 0.0  ;;  %v5462_v6 = vmul.f32 0.2, %v8061_v1 }
 0x211   : > { %v7114_v7 = vpack.c.bf16 %v5589_v5, %v5589_v5  ;;  %v5592_v8 = vsel %vm5336_vm7, %v8060_v62, %v5464_v3  ;;  %v7664_v9 = vpop.f32.mrb[20].mxu1 }
 0x212   : > { %6232 = vst.msk [vmem:[%s9301_s4 + $0x48] sm:$0xf] %vm6213_vm4, %v7116_v4  ;;  %v7117_v10 = vpack.c.bf16 %v5592_v8, %v5592_v8  ;;  %v5590_v11 = vsel %vm5334_vm8, %v8061_v1, %v5462_v6  ;;  %v7936_v12 = vpop.f32.mrb[20].mxu0  ;;  %v2196_v13 = vpop.f32.mrb[21].mxu1 }
 0x213   : > { %6230 = vst.msk [vmem:[%s9301_s4 + $0x40] sm:$0xf] %vm6213_vm4, %v7114_v7  ;;  %v7115_v14 = vpack.c.bf16 %v5590_v11, %v5590_v11  ;;  %v8062_v15 = vadd.f32 %v7936_v12, %v7664_v9  ;;  %v4758_v16 = vpop.f32.mrb[21].mxu0  ;;  %v7665_v17 = vpop.f32.mrb[22].mxu1 }
 0x214   : > { %6233 = vst.msk [vmem:[%s9301_s4 + $0x4c] sm:$0xf] %vm6213_vm4, %v7117_v10  ;;  %v8063_v18 = vadd.f32 %v4758_v16, %v2196_v13  ;;  %v7937_v19 = vpop.f32.mrb[22].mxu0  ;;  %v2199_v20 = vpop.f32.mrb[23].mxu1 }
 0x215   : > { %6231 = vst.msk [vmem:[%s9301_s4 + $0x44] sm:$0xf] %vm6213_vm4, %v7115_v14  ;;  %vm5339_vm0 = vcmp.ge.f32.partialorder %v8062_v15, 0.0  ;;  %v5467_v21 = vmul.f32 0.2, %v8062_v15  ;;  %v8064_v22 = vadd.f32 %v7937_v19, %v7665_v17  ;;  %v4761_v23 = vpop.f32.mrb[23].mxu0 }
 0x216   : > { %vm5337_vm9 = vcmp.ge.f32.partialorder %v8063_v18, 0.0  ;;  %v5465_v24 = vmul.f32 0.2, %v8063_v18  ;;  %v8065_v25 = vadd.f32 %v4761_v23, %v2199_v20 }
 0x217   : > { %v5595_v26 = vsel %vm5339_vm0, %v8062_v15, %v5467_v21  ;;  %vm5340_vm10 = vcmp.ge.f32.partialorder %v8064_v22, 0.0  ;;  %v5468_v27 = vmul.f32 0.2, %v8064_v22 }
 0x218   : > { %v7120_v28 = vpack.c.bf16 %v5595_v26, %v5595_v26  ;;  %v5593_v29 = vsel %vm5337_vm9, %v8063_v18, %v5465_v24  ;;  %vm5338_vm11 = vcmp.ge.f32.partialorder %v8065_v25, 0.0  ;;  %v5466_v30 = vmul.f32 0.2, %v8065_v25 }
 0x219   : > { %v7118_v31 = vpack.c.bf16 %v5593_v29, %v5593_v29  ;;  %v5596_v32 = vsel %vm5340_vm10, %v8064_v22, %v5468_v27  ;;  %v7668_v33 = vpop.f32.mrb[24].mxu1 }
 0x21a   : > { %6236 = vst.msk [vmem:[%s9301_s4 + $0x58] sm:$0xf] %vm6213_vm4, %v7120_v28  ;;  %v7121_v34 = vpack.c.bf16 %v5596_v32, %v5596_v32  ;;  %v5594_v35 = vsel %vm5338_vm11, %v8065_v25, %v5466_v30  ;;  %v7940_v36 = vpop.f32.mrb[24].mxu0  ;;  %v2212_v37 = vpop.f32.mrb[25].mxu1 }
 0x21b   : > { %6234 = vst.msk [vmem:[%s9301_s4 + $0x50] sm:$0xf] %vm6213_vm4, %v7118_v31  ;;  %v7119_v38 = vpack.c.bf16 %v5594_v35, %v5594_v35  ;;  %v8066_v39 = vadd.f32 %v7940_v36, %v7668_v33  ;;  %v4774_v40 = vpop.f32.mrb[25].mxu0  ;;  %v7669_v41 = vpop.f32.mrb[26].mxu1 }
 0x21c   : > { %6237 = vst.msk [vmem:[%s9301_s4 + $0x5c] sm:$0xf] %vm6213_vm4, %v7121_v34  ;;  %v8067_v42 = vadd.f32 %v4774_v40, %v2212_v37  ;;  %v7941_v43 = vpop.f32.mrb[26].mxu0  ;;  %v2215_v44 = vpop.f32.mrb[27].mxu1 }
 0x21d   : > { %6235 = vst.msk [vmem:[%s9301_s4 + $0x54] sm:$0xf] %vm6213_vm4, %v7119_v38  ;;  %vm5343_vm12 = vcmp.ge.f32.partialorder %v8066_v39, 0.0  ;;  %v5471_v45 = vmul.f32 0.2, %v8066_v39  ;;  %v8068_v46 = vadd.f32 %v7941_v43, %v7669_v41  ;;  %v4777_v47 = vpop.f32.mrb[27].mxu0 }
 0x21e   : > { %vm5341_vm13 = vcmp.ge.f32.partialorder %v8067_v42, 0.0  ;;  %v5469_v48 = vmul.f32 0.2, %v8067_v42  ;;  %v8069_v49 = vadd.f32 %v4777_v47, %v2215_v44 }
 0x21f   : > { %v5599_v50 = vsel %vm5343_vm12, %v8066_v39, %v5471_v45  ;;  %vm5344_vm14 = vcmp.ge.f32.partialorder %v8068_v46, 0.0  ;;  %v5472_v51 = vmul.f32 0.2, %v8068_v46 }
 0x220   : > { %v7124_v52 = vpack.c.bf16 %v5599_v50, %v5599_v50  ;;  %v5597_v53 = vsel %vm5341_vm13, %v8067_v42, %v5469_v48  ;;  %vm5342_vm15 = vcmp.ge.f32.partialorder %v8069_v49, 0.0  ;;  %v5470_v54 = vmul.f32 0.2, %v8069_v49 }
 0x221   : > { %v7122_v55 = vpack.c.bf16 %v5597_v53, %v5597_v53  ;;  %v5600_v56 = vsel %vm5344_vm14, %v8068_v46, %v5472_v51  ;;  %v7672_v57 = vpop.f32.mrb[28].mxu1 }
 0x222   : > { %6240 = vst.msk [vmem:[%s9301_s4 + $0x68] sm:$0xf] %vm6213_vm4, %v7124_v52  ;;  %v7125_v58 = vpack.c.bf16 %v5600_v56, %v5600_v56  ;;  %v5598_v59 = vsel %vm5342_vm15, %v8069_v49, %v5470_v54  ;;  %v7944_v60 = vpop.f32.mrb[28].mxu0  ;;  %v2228_v61 = vpop.f32.mrb[29].mxu1 }
 0x223   : > { %6238 = vst.msk [vmem:[%s9301_s4 + $0x60] sm:$0xf] %vm6213_vm4, %v7122_v55  ;;  %v7123_v62 = vpack.c.bf16 %v5598_v59, %v5598_v59  ;;  %v8070_v63 = vadd.f32 %v7944_v60, %v7672_v57  ;;  %v4790_v0 = vpop.f32.mrb[29].mxu0  ;;  %v7673_v1 = vpop.f32.mrb[30].mxu1 }
 0x224   : > { %6241 = vst.msk [vmem:[%s9301_s4 + $0x6c] sm:$0xf] %vm6213_vm4, %v7125_v58  ;;  %v8071_v2 = vadd.f32 %v4790_v0, %v2228_v61  ;;  %v7945_v3 = vpop.f32.mrb[30].mxu0  ;;  %v2231_v4 = vpop.f32.mrb[31].mxu1 }
 0x225   : > { %6239 = vst.msk [vmem:[%s9301_s4 + $0x64] sm:$0xf] %vm6213_vm4, %v7123_v62  ;;  %vm5347_vm1 = vcmp.ge.f32.partialorder %v8070_v63, 0.0  ;;  %v5475_v5 = vmul.f32 0.2, %v8070_v63  ;;  %v8072_v6 = vadd.f32 %v7945_v3, %v7673_v1  ;;  %v4793_v7 = vpop.f32.mrb[31].mxu0 }
 0x226   : > { %vm5345_vm2 = vcmp.ge.f32.partialorder %v8071_v2, 0.0  ;;  %v5473_v8 = vmul.f32 0.2, %v8071_v2  ;;  %v8073_v9 = vadd.f32 %v4793_v7, %v2231_v4 }
 0x227   : > { %v5603_v10 = vsel %vm5347_vm1, %v8070_v63, %v5475_v5  ;;  %vm5348_vm3 = vcmp.ge.f32.partialorder %v8072_v6, 0.0  ;;  %v5476_v11 = vmul.f32 0.2, %v8072_v6 }
 0x228   : > { %v7128_v12 = vpack.c.bf16 %v5603_v10, %v5603_v10  ;;  %v5601_v13 = vsel %vm5345_vm2, %v8071_v2, %v5473_v8  ;;  %vm5346_vm5 = vcmp.ge.f32.partialorder %v8073_v9, 0.0  ;;  %v5474_v14 = vmul.f32 0.2, %v8073_v9 }
 0x229   : > { %v7126_v15 = vpack.c.bf16 %v5601_v13, %v5601_v13  ;;  %v5604_v16 = vsel %vm5348_vm3, %v8072_v6, %v5476_v11  ;;  %v7676_v17 = vpop.f32.mrb[32].mxu1 }
 0x22a   : > { %6244 = vst.msk [vmem:[%s9301_s4 + $0x78] sm:$0xf] %vm6213_vm4, %v7128_v12  ;;  %v7129_v18 = vpack.c.bf16 %v5604_v16, %v5604_v16  ;;  %v5602_v19 = vsel %vm5346_vm5, %v8073_v9, %v5474_v14  ;;  %v7948_v20 = vpop.f32.mrb[32].mxu0  ;;  %v2244_v21 = vpop.f32.mrb[33].mxu1 }
 0x22b   : > { %6242 = vst.msk [vmem:[%s9301_s4 + $0x70] sm:$0xf] %vm6213_vm4, %v7126_v15  ;;  %v7127_v22 = vpack.c.bf16 %v5602_v19, %v5602_v19  ;;  %v8074_v23 = vadd.f32 %v7948_v20, %v7676_v17  ;;  %v4806_v24 = vpop.f32.mrb[33].mxu0  ;;  %v7677_v25 = vpop.f32.mrb[34].mxu1 }
 0x22c   : > { %6245 = vst.msk [vmem:[%s9301_s4 + $0x7c] sm:$0xf] %vm6213_vm4, %v7129_v18  ;;  %v8075_v26 = vadd.f32 %v4806_v24, %v2244_v21  ;;  %v7949_v27 = vpop.f32.mrb[34].mxu0  ;;  %v2247_v28 = vpop.f32.mrb[35].mxu1 }
 0x22d   : > { %6243 = vst.msk [vmem:[%s9301_s4 + $0x74] sm:$0xf] %vm6213_vm4, %v7127_v22  ;;  %vm5351_vm6 = vcmp.ge.f32.partialorder %v8074_v23, 0.0  ;;  %v5479_v29 = vmul.f32 0.2, %v8074_v23  ;;  %v8076_v30 = vadd.f32 %v7949_v27, %v7677_v25  ;;  %v4809_v31 = vpop.f32.mrb[35].mxu0 }
 0x22e   : > { %vm5349_vm7 = vcmp.ge.f32.partialorder %v8075_v26, 0.0  ;;  %v5477_v32 = vmul.f32 0.2, %v8075_v26  ;;  %v8077_v33 = vadd.f32 %v4809_v31, %v2247_v28 }
 0x22f   : > { %v5607_v34 = vsel %vm5351_vm6, %v8074_v23, %v5479_v29  ;;  %vm5352_vm8 = vcmp.ge.f32.partialorder %v8076_v30, 0.0  ;;  %v5480_v35 = vmul.f32 0.2, %v8076_v30 }
 0x230   : > { %v7132_v36 = vpack.c.bf16 %v5607_v34, %v5607_v34  ;;  %v5605_v37 = vsel %vm5349_vm7, %v8075_v26, %v5477_v32  ;;  %vm5350_vm0 = vcmp.ge.f32.partialorder %v8077_v33, 0.0  ;;  %v5478_v38 = vmul.f32 0.2, %v8077_v33 }
 0x231   : > { %v7130_v39 = vpack.c.bf16 %v5605_v37, %v5605_v37  ;;  %v5608_v40 = vsel %vm5352_vm8, %v8076_v30, %v5480_v35  ;;  %v7680_v41 = vpop.f32.mrb[36].mxu1 }
 0x232   : > { %6248 = vst.msk [vmem:[%s9301_s4 + $0x88] sm:$0xf] %vm6213_vm4, %v7132_v36  ;;  %v7133_v42 = vpack.c.bf16 %v5608_v40, %v5608_v40  ;;  %v5606_v43 = vsel %vm5350_vm0, %v8077_v33, %v5478_v38  ;;  %v7952_v44 = vpop.f32.mrb[36].mxu0  ;;  %v2260_v45 = vpop.f32.mrb[37].mxu1 }
 0x233   : > { %6246 = vst.msk [vmem:[%s9301_s4 + $0x80] sm:$0xf] %vm6213_vm4, %v7130_v39  ;;  %v7131_v46 = vpack.c.bf16 %v5606_v43, %v5606_v43  ;;  %v8078_v47 = vadd.f32 %v7952_v44, %v7680_v41  ;;  %v4822_v48 = vpop.f32.mrb[37].mxu0  ;;  %v7681_v49 = vpop.f32.mrb[38].mxu1 }
 0x234   : > { %6249 = vst.msk [vmem:[%s9301_s4 + $0x8c] sm:$0xf] %vm6213_vm4, %v7133_v42  ;;  %v8079_v50 = vadd.f32 %v4822_v48, %v2260_v45  ;;  %v7953_v51 = vpop.f32.mrb[38].mxu0  ;;  %v2263_v52 = vpop.f32.mrb[39].mxu1 }
 0x235   : > { %6247 = vst.msk [vmem:[%s9301_s4 + $0x84] sm:$0xf] %vm6213_vm4, %v7131_v46  ;;  %vm5355_vm9 = vcmp.ge.f32.partialorder %v8078_v47, 0.0  ;;  %v5483_v53 = vmul.f32 0.2, %v8078_v47  ;;  %v8080_v54 = vadd.f32 %v7953_v51, %v7681_v49  ;;  %v4825_v55 = vpop.f32.mrb[39].mxu0 }
 0x236   : > { %vm5353_vm10 = vcmp.ge.f32.partialorder %v8079_v50, 0.0  ;;  %v5481_v56 = vmul.f32 0.2, %v8079_v50  ;;  %v8081_v57 = vadd.f32 %v4825_v55, %v2263_v52 }
 0x237   : > { %v5611_v58 = vsel %vm5355_vm9, %v8078_v47, %v5483_v53  ;;  %vm5356_vm11 = vcmp.ge.f32.partialorder %v8080_v54, 0.0  ;;  %v5484_v59 = vmul.f32 0.2, %v8080_v54 }
 0x238   : > { %v7136_v60 = vpack.c.bf16 %v5611_v58, %v5611_v58  ;;  %v5609_v61 = vsel %vm5353_vm10, %v8079_v50, %v5481_v56  ;;  %vm5354_vm12 = vcmp.ge.f32.partialorder %v8081_v57, 0.0  ;;  %v5482_v62 = vmul.f32 0.2, %v8081_v57 }
 0x239   : > { %v7134_v63 = vpack.c.bf16 %v5609_v61, %v5609_v61  ;;  %v5612_v0 = vsel %vm5356_vm11, %v8080_v54, %v5484_v59  ;;  %v7684_v1 = vpop.f32.mrb[40].mxu1 }
 0x23a   : > { %6252 = vst.msk [vmem:[%s9301_s4 + $0x98] sm:$0xf] %vm6213_vm4, %v7136_v60  ;;  %v7137_v2 = vpack.c.bf16 %v5612_v0, %v5612_v0  ;;  %v5610_v3 = vsel %vm5354_vm12, %v8081_v57, %v5482_v62  ;;  %v7956_v4 = vpop.f32.mrb[40].mxu0  ;;  %v2276_v5 = vpop.f32.mrb[41].mxu1 }
 0x23b   : > { %6250 = vst.msk [vmem:[%s9301_s4 + $0x90] sm:$0xf] %vm6213_vm4, %v7134_v63  ;;  %v7135_v6 = vpack.c.bf16 %v5610_v3, %v5610_v3  ;;  %v8082_v7 = vadd.f32 %v7956_v4, %v7684_v1  ;;  %v4838_v8 = vpop.f32.mrb[41].mxu0  ;;  %v7685_v9 = vpop.f32.mrb[42].mxu1 }
 0x23c   : > { %6253 = vst.msk [vmem:[%s9301_s4 + $0x9c] sm:$0xf] %vm6213_vm4, %v7137_v2  ;;  %v8083_v10 = vadd.f32 %v4838_v8, %v2276_v5  ;;  %v7957_v11 = vpop.f32.mrb[42].mxu0  ;;  %v2279_v12 = vpop.f32.mrb[43].mxu1 }
 0x23d   : > { %6251 = vst.msk [vmem:[%s9301_s4 + $0x94] sm:$0xf] %vm6213_vm4, %v7135_v6  ;;  %vm5359_vm13 = vcmp.ge.f32.partialorder %v8082_v7, 0.0  ;;  %v5487_v13 = vmul.f32 0.2, %v8082_v7  ;;  %v8084_v14 = vadd.f32 %v7957_v11, %v7685_v9  ;;  %v4841_v15 = vpop.f32.mrb[43].mxu0 }
 0x23e   : > { %vm5357_vm14 = vcmp.ge.f32.partialorder %v8083_v10, 0.0  ;;  %v5485_v16 = vmul.f32 0.2, %v8083_v10  ;;  %v8085_v17 = vadd.f32 %v4841_v15, %v2279_v12 }
 0x23f   : > { %v5615_v18 = vsel %vm5359_vm13, %v8082_v7, %v5487_v13  ;;  %vm5360_vm15 = vcmp.ge.f32.partialorder %v8084_v14, 0.0  ;;  %v5488_v19 = vmul.f32 0.2, %v8084_v14 }
 0x240   : > { %v7140_v20 = vpack.c.bf16 %v5615_v18, %v5615_v18  ;;  %v5613_v21 = vsel %vm5357_vm14, %v8083_v10, %v5485_v16  ;;  %vm5358_vm1 = vcmp.ge.f32.partialorder %v8085_v17, 0.0  ;;  %v5486_v22 = vmul.f32 0.2, %v8085_v17 }
 0x241   : > { %v7138_v23 = vpack.c.bf16 %v5613_v21, %v5613_v21  ;;  %v5616_v24 = vsel %vm5360_vm15, %v8084_v14, %v5488_v19  ;;  %v7688_v25 = vpop.f32.mrb[44].mxu1 }
 0x242   : > { %6256 = vst.msk [vmem:[%s9301_s4 + $0xa8] sm:$0xf] %vm6213_vm4, %v7140_v20  ;;  %v7141_v26 = vpack.c.bf16 %v5616_v24, %v5616_v24  ;;  %v5614_v27 = vsel %vm5358_vm1, %v8085_v17, %v5486_v22  ;;  %v7960_v28 = vpop.f32.mrb[44].mxu0  ;;  %v2292_v29 = vpop.f32.mrb[45].mxu1 }
 0x243   : > { %6254 = vst.msk [vmem:[%s9301_s4 + $0xa0] sm:$0xf] %vm6213_vm4, %v7138_v23  ;;  %v7139_v30 = vpack.c.bf16 %v5614_v27, %v5614_v27  ;;  %v8086_v31 = vadd.f32 %v7960_v28, %v7688_v25  ;;  %v4854_v32 = vpop.f32.mrb[45].mxu0  ;;  %v7689_v33 = vpop.f32.mrb[46].mxu1 }
 0x244   : > { %6257 = vst.msk [vmem:[%s9301_s4 + $0xac] sm:$0xf] %vm6213_vm4, %v7141_v26  ;;  %v8087_v34 = vadd.f32 %v4854_v32, %v2292_v29  ;;  %v7961_v35 = vpop.f32.mrb[46].mxu0  ;;  %v2295_v36 = vpop.f32.mrb[47].mxu1 }
 0x245   : > { %6255 = vst.msk [vmem:[%s9301_s4 + $0xa4] sm:$0xf] %vm6213_vm4, %v7139_v30  ;;  %vm5363_vm2 = vcmp.ge.f32.partialorder %v8086_v31, 0.0  ;;  %v5491_v37 = vmul.f32 0.2, %v8086_v31  ;;  %v8088_v38 = vadd.f32 %v7961_v35, %v7689_v33  ;;  %v4857_v39 = vpop.f32.mrb[47].mxu0 }
 0x246   : > { %vm5361_vm3 = vcmp.ge.f32.partialorder %v8087_v34, 0.0  ;;  %v5489_v40 = vmul.f32 0.2, %v8087_v34  ;;  %v8089_v41 = vadd.f32 %v4857_v39, %v2295_v36 }
 0x247   : > { %v5619_v42 = vsel %vm5363_vm2, %v8086_v31, %v5491_v37  ;;  %vm5364_vm5 = vcmp.ge.f32.partialorder %v8088_v38, 0.0  ;;  %v5492_v43 = vmul.f32 0.2, %v8088_v38 }
 0x248   : > { %v7144_v44 = vpack.c.bf16 %v5619_v42, %v5619_v42  ;;  %v5617_v45 = vsel %vm5361_vm3, %v8087_v34, %v5489_v40  ;;  %vm5362_vm6 = vcmp.ge.f32.partialorder %v8089_v41, 0.0  ;;  %v5490_v46 = vmul.f32 0.2, %v8089_v41 }
 0x249   : > { %v7142_v47 = vpack.c.bf16 %v5617_v45, %v5617_v45  ;;  %v5620_v48 = vsel %vm5364_vm5, %v8088_v38, %v5492_v43  ;;  %v7692_v49 = vpop.f32.mrb[48].mxu1 }
 0x24a   : > { %6260 = vst.msk [vmem:[%s9301_s4 + $0xb8] sm:$0xf] %vm6213_vm4, %v7144_v44  ;;  %v7145_v50 = vpack.c.bf16 %v5620_v48, %v5620_v48  ;;  %v5618_v51 = vsel %vm5362_vm6, %v8089_v41, %v5490_v46  ;;  %v7964_v52 = vpop.f32.mrb[48].mxu0  ;;  %v2308_v53 = vpop.f32.mrb[49].mxu1 }
 0x24b   : > { %6258 = vst.msk [vmem:[%s9301_s4 + $0xb0] sm:$0xf] %vm6213_vm4, %v7142_v47  ;;  %v7143_v54 = vpack.c.bf16 %v5618_v51, %v5618_v51  ;;  %v8090_v55 = vadd.f32 %v7964_v52, %v7692_v49  ;;  %v4870_v56 = vpop.f32.mrb[49].mxu0  ;;  %v7693_v57 = vpop.f32.mrb[50].mxu1 }
 0x24c   : > { %6261 = vst.msk [vmem:[%s9301_s4 + $0xbc] sm:$0xf] %vm6213_vm4, %v7145_v50  ;;  %v8091_v58 = vadd.f32 %v4870_v56, %v2308_v53  ;;  %v7965_v59 = vpop.f32.mrb[50].mxu0  ;;  %v2311_v60 = vpop.f32.mrb[51].mxu1 }
 0x24d   : > { %6259 = vst.msk [vmem:[%s9301_s4 + $0xb4] sm:$0xf] %vm6213_vm4, %v7143_v54  ;;  %vm5367_vm7 = vcmp.ge.f32.partialorder %v8090_v55, 0.0  ;;  %v5495_v61 = vmul.f32 0.2, %v8090_v55  ;;  %v8092_v62 = vadd.f32 %v7965_v59, %v7693_v57  ;;  %v4873_v63 = vpop.f32.mrb[51].mxu0 }
 0x24e   : > { %vm5365_vm8 = vcmp.ge.f32.partialorder %v8091_v58, 0.0  ;;  %v5493_v0 = vmul.f32 0.2, %v8091_v58  ;;  %v8093_v1 = vadd.f32 %v4873_v63, %v2311_v60 }
 0x24f   : > { %v5623_v2 = vsel %vm5367_vm7, %v8090_v55, %v5495_v61  ;;  %vm5368_vm0 = vcmp.ge.f32.partialorder %v8092_v62, 0.0  ;;  %v5496_v3 = vmul.f32 0.2, %v8092_v62 }
 0x250   : > { %v7148_v4 = vpack.c.bf16 %v5623_v2, %v5623_v2  ;;  %v5621_v5 = vsel %vm5365_vm8, %v8091_v58, %v5493_v0  ;;  %vm5366_vm9 = vcmp.ge.f32.partialorder %v8093_v1, 0.0  ;;  %v5494_v6 = vmul.f32 0.2, %v8093_v1 }
 0x251   : > { %v7146_v7 = vpack.c.bf16 %v5621_v5, %v5621_v5  ;;  %v5624_v8 = vsel %vm5368_vm0, %v8092_v62, %v5496_v3  ;;  %v7696_v9 = vpop.f32.mrb[52].mxu1 }
 0x252   : > { %6264 = vst.msk [vmem:[%s9301_s4 + $0xc8] sm:$0xf] %vm6213_vm4, %v7148_v4  ;;  %v7149_v10 = vpack.c.bf16 %v5624_v8, %v5624_v8  ;;  %v5622_v11 = vsel %vm5366_vm9, %v8093_v1, %v5494_v6  ;;  %v7968_v12 = vpop.f32.mrb[52].mxu0  ;;  %v2324_v13 = vpop.f32.mrb[53].mxu1 }
 0x253   : > { %6262 = vst.msk [vmem:[%s9301_s4 + $0xc0] sm:$0xf] %vm6213_vm4, %v7146_v7  ;;  %v7147_v14 = vpack.c.bf16 %v5622_v11, %v5622_v11  ;;  %v8094_v15 = vadd.f32 %v7968_v12, %v7696_v9  ;;  %v4886_v16 = vpop.f32.mrb[53].mxu0  ;;  %v7697_v17 = vpop.f32.mrb[54].mxu1 }
 0x254   : > { %6265 = vst.msk [vmem:[%s9301_s4 + $0xcc] sm:$0xf] %vm6213_vm4, %v7149_v10  ;;  %v8095_v18 = vadd.f32 %v4886_v16, %v2324_v13  ;;  %v7969_v19 = vpop.f32.mrb[54].mxu0  ;;  %v2327_v20 = vpop.f32.mrb[55].mxu1 }
 0x255   : > { %6263 = vst.msk [vmem:[%s9301_s4 + $0xc4] sm:$0xf] %vm6213_vm4, %v7147_v14  ;;  %vm5371_vm10 = vcmp.ge.f32.partialorder %v8094_v15, 0.0  ;;  %v5499_v21 = vmul.f32 0.2, %v8094_v15  ;;  %v8096_v22 = vadd.f32 %v7969_v19, %v7697_v17  ;;  %v4889_v23 = vpop.f32.mrb[55].mxu0 }
 0x256   : > { %vm5369_vm11 = vcmp.ge.f32.partialorder %v8095_v18, 0.0  ;;  %v5497_v24 = vmul.f32 0.2, %v8095_v18  ;;  %v8097_v25 = vadd.f32 %v4889_v23, %v2327_v20 }
 0x257   : > { %v5627_v26 = vsel %vm5371_vm10, %v8094_v15, %v5499_v21  ;;  %vm5372_vm12 = vcmp.ge.f32.partialorder %v8096_v22, 0.0  ;;  %v5500_v27 = vmul.f32 0.2, %v8096_v22 }
 0x258   : > { %v7152_v28 = vpack.c.bf16 %v5627_v26, %v5627_v26  ;;  %v5625_v29 = vsel %vm5369_vm11, %v8095_v18, %v5497_v24  ;;  %vm5370_vm13 = vcmp.ge.f32.partialorder %v8097_v25, 0.0  ;;  %v5498_v30 = vmul.f32 0.2, %v8097_v25 }
 0x259   : > { %v7150_v31 = vpack.c.bf16 %v5625_v29, %v5625_v29  ;;  %v5628_v32 = vsel %vm5372_vm12, %v8096_v22, %v5500_v27  ;;  %v7700_v33 = vpop.f32.mrb[56].mxu1 }
 0x25a   : > { %6268 = vst.msk [vmem:[%s9301_s4 + $0xd8] sm:$0xf] %vm6213_vm4, %v7152_v28  ;;  %v7153_v34 = vpack.c.bf16 %v5628_v32, %v5628_v32  ;;  %v5626_v35 = vsel %vm5370_vm13, %v8097_v25, %v5498_v30  ;;  %v7972_v36 = vpop.f32.mrb[56].mxu0  ;;  %v2340_v37 = vpop.f32.mrb[57].mxu1 }
 0x25b   : > { %6266 = vst.msk [vmem:[%s9301_s4 + $0xd0] sm:$0xf] %vm6213_vm4, %v7150_v31  ;;  %v7151_v38 = vpack.c.bf16 %v5626_v35, %v5626_v35  ;;  %v8098_v39 = vadd.f32 %v7972_v36, %v7700_v33  ;;  %v4902_v40 = vpop.f32.mrb[57].mxu0  ;;  %v7701_v41 = vpop.f32.mrb[58].mxu1 }
 0x25c   : > { %6269 = vst.msk [vmem:[%s9301_s4 + $0xdc] sm:$0xf] %vm6213_vm4, %v7153_v34  ;;  %v8099_v42 = vadd.f32 %v4902_v40, %v2340_v37  ;;  %v7973_v43 = vpop.f32.mrb[58].mxu0  ;;  %v2343_v44 = vpop.f32.mrb[59].mxu1 }
 0x25d   : > { %6267 = vst.msk [vmem:[%s9301_s4 + $0xd4] sm:$0xf] %vm6213_vm4, %v7151_v38  ;;  %vm5375_vm14 = vcmp.ge.f32.partialorder %v8098_v39, 0.0  ;;  %v5503_v45 = vmul.f32 0.2, %v8098_v39  ;;  %v8100_v46 = vadd.f32 %v7973_v43, %v7701_v41  ;;  %v4905_v47 = vpop.f32.mrb[59].mxu0 }
 0x25e   : > { %vm5373_vm15 = vcmp.ge.f32.partialorder %v8099_v42, 0.0  ;;  %v5501_v48 = vmul.f32 0.2, %v8099_v42  ;;  %v8101_v49 = vadd.f32 %v4905_v47, %v2343_v44 }
 0x25f   : > { %v5631_v50 = vsel %vm5375_vm14, %v8098_v39, %v5503_v45  ;;  %vm5376_vm1 = vcmp.ge.f32.partialorder %v8100_v46, 0.0  ;;  %v5504_v51 = vmul.f32 0.2, %v8100_v46 }
 0x260   : > { %v7156_v52 = vpack.c.bf16 %v5631_v50, %v5631_v50  ;;  %v5629_v53 = vsel %vm5373_vm15, %v8099_v42, %v5501_v48  ;;  %vm5374_vm2 = vcmp.ge.f32.partialorder %v8101_v49, 0.0  ;;  %v5502_v54 = vmul.f32 0.2, %v8101_v49 }
 0x261   : > { %v7154_v55 = vpack.c.bf16 %v5629_v53, %v5629_v53  ;;  %v5632_v56 = vsel %vm5376_vm1, %v8100_v46, %v5504_v51  ;;  %v7704_v57 = vpop.f32.mrb[60].mxu1 }
 0x262   : > { %6272 = vst.msk [vmem:[%s9301_s4 + $0xe8] sm:$0xf] %vm6213_vm4, %v7156_v52  ;;  %v7157_v58 = vpack.c.bf16 %v5632_v56, %v5632_v56  ;;  %v5630_v59 = vsel %vm5374_vm2, %v8101_v49, %v5502_v54  ;;  %v7976_v60 = vpop.f32.mrb[60].mxu0  ;;  %v2356_v61 = vpop.f32.mrb[61].mxu1 }
 0x263   : > { %6270 = vst.msk [vmem:[%s9301_s4 + $0xe0] sm:$0xf] %vm6213_vm4, %v7154_v55  ;;  %v7155_v62 = vpack.c.bf16 %v5630_v59, %v5630_v59  ;;  %v8102_v63 = vadd.f32 %v7976_v60, %v7704_v57  ;;  %v4918_v0 = vpop.f32.mrb[61].mxu0  ;;  %v7705_v1 = vpop.f32.mrb[62].mxu1 }
 0x264   : > { %6273 = vst.msk [vmem:[%s9301_s4 + $0xec] sm:$0xf] %vm6213_vm4, %v7157_v58  ;;  %v8103_v2 = vadd.f32 %v4918_v0, %v2356_v61  ;;  %v7977_v3 = vpop.f32.mrb[62].mxu0  ;;  %v2359_v4 = vpop.f32.mrb[63].mxu1 }
 0x265   : > { %6271 = vst.msk [vmem:[%s9301_s4 + $0xe4] sm:$0xf] %vm6213_vm4, %v7155_v62  ;;  %vm5379_vm3 = vcmp.ge.f32.partialorder %v8102_v63, 0.0  ;;  %v5507_v5 = vmul.f32 0.2, %v8102_v63  ;;  %v8104_v6 = vadd.f32 %v7977_v3, %v7705_v1  ;;  %v4921_v7 = vpop.f32.mrb[63].mxu0 }
 0x266   : > { %vm5377_vm5 = vcmp.ge.f32.partialorder %v8103_v2, 0.0  ;;  %v5505_v8 = vmul.f32 0.2, %v8103_v2  ;;  %v8105_v9 = vadd.f32 %v4921_v7, %v2359_v4 }
 0x267   : > { %v5635_v10 = vsel %vm5379_vm3, %v8102_v63, %v5507_v5  ;;  %vm5380_vm6 = vcmp.ge.f32.partialorder %v8104_v6, 0.0  ;;  %v5508_v11 = vmul.f32 0.2, %v8104_v6 }
 0x268   : > { %v7160_v12 = vpack.c.bf16 %v5635_v10, %v5635_v10  ;;  %v5633_v13 = vsel %vm5377_vm5, %v8103_v2, %v5505_v8  ;;  %vm5378_vm7 = vcmp.ge.f32.partialorder %v8105_v9, 0.0  ;;  %v5506_v14 = vmul.f32 0.2, %v8105_v9 }
 0x269   : > { %v7158_v15 = vpack.c.bf16 %v5633_v13, %v5633_v13  ;;  %v5636_v16 = vsel %vm5380_vm6, %v8104_v6, %v5508_v11  ;;  %v7708_v17 = vpop.f32.mrb[64].mxu1 }
 0x26a   : > { %6276 = vst.msk [vmem:[%s9301_s4 + $0xf8] sm:$0xf] %vm6213_vm4, %v7160_v12  ;;  %v7161_v18 = vpack.c.bf16 %v5636_v16, %v5636_v16  ;;  %v5634_v19 = vsel %vm5378_vm7, %v8105_v9, %v5506_v14  ;;  %v7980_v20 = vpop.f32.mrb[64].mxu0  ;;  %v2372_v21 = vpop.f32.mrb[65].mxu1 }
 0x26b   : > { %6274 = vst.msk [vmem:[%s9301_s4 + $0xf0] sm:$0xf] %vm6213_vm4, %v7158_v15  ;;  %v7159_v22 = vpack.c.bf16 %v5634_v19, %v5634_v19  ;;  %v8106_v23 = vadd.f32 %v7980_v20, %v7708_v17  ;;  %v4934_v24 = vpop.f32.mrb[65].mxu0  ;;  %v7709_v25 = vpop.f32.mrb[66].mxu1 }
 0x26c   : > { %6277 = vst.msk [vmem:[%s9301_s4 + $0xfc] sm:$0xf] %vm6213_vm4, %v7161_v18  ;;  %v8107_v26 = vadd.f32 %v4934_v24, %v2372_v21  ;;  %v7981_v27 = vpop.f32.mrb[66].mxu0  ;;  %v2375_v28 = vpop.f32.mrb[67].mxu1 }
 0x26d   : > { %6275 = vst.msk [vmem:[%s9301_s4 + $0xf4] sm:$0xf] %vm6213_vm4, %v7159_v22  ;;  %vm5383_vm8 = vcmp.ge.f32.partialorder %v8106_v23, 0.0  ;;  %v5511_v29 = vmul.f32 0.2, %v8106_v23  ;;  %v8108_v30 = vadd.f32 %v7981_v27, %v7709_v25  ;;  %v4937_v31 = vpop.f32.mrb[67].mxu0 }
 0x26e   : > { %vm5381_vm0 = vcmp.ge.f32.partialorder %v8107_v26, 0.0  ;;  %v5509_v32 = vmul.f32 0.2, %v8107_v26  ;;  %v8109_v33 = vadd.f32 %v4937_v31, %v2375_v28 }
 0x26f   : > { %v5639_v34 = vsel %vm5383_vm8, %v8106_v23, %v5511_v29  ;;  %vm5384_vm9 = vcmp.ge.f32.partialorder %v8108_v30, 0.0  ;;  %v5512_v35 = vmul.f32 0.2, %v8108_v30 }
 0x270   : > { %v7164_v36 = vpack.c.bf16 %v5639_v34, %v5639_v34  ;;  %v5637_v37 = vsel %vm5381_vm0, %v8107_v26, %v5509_v32  ;;  %vm5382_vm10 = vcmp.ge.f32.partialorder %v8109_v33, 0.0  ;;  %v5510_v38 = vmul.f32 0.2, %v8109_v33 }
 0x271   : > { %v7162_v39 = vpack.c.bf16 %v5637_v37, %v5637_v37  ;;  %v5640_v40 = vsel %vm5384_vm9, %v8108_v30, %v5512_v35  ;;  %v7712_v41 = vpop.f32.mrb[68].mxu1 }
 0x272   : > { %6280 = vst.msk [vmem:[%s9301_s4 + $0x108] sm:$0xf] %vm6213_vm4, %v7164_v36  ;;  %v7165_v42 = vpack.c.bf16 %v5640_v40, %v5640_v40  ;;  %v5638_v43 = vsel %vm5382_vm10, %v8109_v33, %v5510_v38  ;;  %v7984_v44 = vpop.f32.mrb[68].mxu0  ;;  %v2388_v45 = vpop.f32.mrb[69].mxu1 }
 0x273   : > { %6278 = vst.msk [vmem:[%s9301_s4 + $0x100] sm:$0xf] %vm6213_vm4, %v7162_v39  ;;  %v7163_v46 = vpack.c.bf16 %v5638_v43, %v5638_v43  ;;  %v8110_v47 = vadd.f32 %v7984_v44, %v7712_v41  ;;  %v4950_v48 = vpop.f32.mrb[69].mxu0  ;;  %v7713_v49 = vpop.f32.mrb[70].mxu1 }
 0x274   : > { %6281 = vst.msk [vmem:[%s9301_s4 + $0x10c] sm:$0xf] %vm6213_vm4, %v7165_v42  ;;  %v8111_v50 = vadd.f32 %v4950_v48, %v2388_v45  ;;  %v7985_v51 = vpop.f32.mrb[70].mxu0  ;;  %v2391_v52 = vpop.f32.mrb[71].mxu1 }
 0x275   : > { %6279 = vst.msk [vmem:[%s9301_s4 + $0x104] sm:$0xf] %vm6213_vm4, %v7163_v46  ;;  %vm5387_vm11 = vcmp.ge.f32.partialorder %v8110_v47, 0.0  ;;  %v5515_v53 = vmul.f32 0.2, %v8110_v47  ;;  %v8112_v54 = vadd.f32 %v7985_v51, %v7713_v49  ;;  %v4953_v55 = vpop.f32.mrb[71].mxu0 }
 0x276   : > { %vm5385_vm12 = vcmp.ge.f32.partialorder %v8111_v50, 0.0  ;;  %v5513_v56 = vmul.f32 0.2, %v8111_v50  ;;  %v8113_v57 = vadd.f32 %v4953_v55, %v2391_v52 }
 0x277   : > { %v5643_v58 = vsel %vm5387_vm11, %v8110_v47, %v5515_v53  ;;  %vm5388_vm13 = vcmp.ge.f32.partialorder %v8112_v54, 0.0  ;;  %v5516_v59 = vmul.f32 0.2, %v8112_v54 }
 0x278   : > { %v7168_v60 = vpack.c.bf16 %v5643_v58, %v5643_v58  ;;  %v5641_v61 = vsel %vm5385_vm12, %v8111_v50, %v5513_v56  ;;  %vm5386_vm14 = vcmp.ge.f32.partialorder %v8113_v57, 0.0  ;;  %v5514_v62 = vmul.f32 0.2, %v8113_v57 }
 0x279   : > { %v7166_v63 = vpack.c.bf16 %v5641_v61, %v5641_v61  ;;  %v5644_v0 = vsel %vm5388_vm13, %v8112_v54, %v5516_v59  ;;  %v7716_v1 = vpop.f32.mrb[72].mxu1 }
 0x27a   : > { %6284 = vst.msk [vmem:[%s9301_s4 + $0x118] sm:$0xf] %vm6213_vm4, %v7168_v60  ;;  %v7169_v2 = vpack.c.bf16 %v5644_v0, %v5644_v0  ;;  %v5642_v3 = vsel %vm5386_vm14, %v8113_v57, %v5514_v62  ;;  %v7988_v4 = vpop.f32.mrb[72].mxu0  ;;  %v2404_v5 = vpop.f32.mrb[73].mxu1 }
 0x27b   : > { %6282 = vst.msk [vmem:[%s9301_s4 + $0x110] sm:$0xf] %vm6213_vm4, %v7166_v63  ;;  %v7167_v6 = vpack.c.bf16 %v5642_v3, %v5642_v3  ;;  %v8114_v7 = vadd.f32 %v7988_v4, %v7716_v1  ;;  %v4966_v8 = vpop.f32.mrb[73].mxu0  ;;  %v7717_v9 = vpop.f32.mrb[74].mxu1 }
 0x27c   : > { %6285 = vst.msk [vmem:[%s9301_s4 + $0x11c] sm:$0xf] %vm6213_vm4, %v7169_v2  ;;  %v8115_v10 = vadd.f32 %v4966_v8, %v2404_v5  ;;  %v7989_v11 = vpop.f32.mrb[74].mxu0  ;;  %v2407_v12 = vpop.f32.mrb[75].mxu1 }
 0x27d   : > { %6283 = vst.msk [vmem:[%s9301_s4 + $0x114] sm:$0xf] %vm6213_vm4, %v7167_v6  ;;  %vm5391_vm15 = vcmp.ge.f32.partialorder %v8114_v7, 0.0  ;;  %v5519_v13 = vmul.f32 0.2, %v8114_v7  ;;  %v8116_v14 = vadd.f32 %v7989_v11, %v7717_v9  ;;  %v4969_v15 = vpop.f32.mrb[75].mxu0 }
 0x27e   : > { %vm5389_vm1 = vcmp.ge.f32.partialorder %v8115_v10, 0.0  ;;  %v5517_v16 = vmul.f32 0.2, %v8115_v10  ;;  %v8117_v17 = vadd.f32 %v4969_v15, %v2407_v12 }
 0x27f   : > { %v5647_v18 = vsel %vm5391_vm15, %v8114_v7, %v5519_v13  ;;  %vm5392_vm2 = vcmp.ge.f32.partialorder %v8116_v14, 0.0  ;;  %v5520_v19 = vmul.f32 0.2, %v8116_v14 }
 0x280   : > { %v7172_v20 = vpack.c.bf16 %v5647_v18, %v5647_v18  ;;  %v5645_v21 = vsel %vm5389_vm1, %v8115_v10, %v5517_v16  ;;  %vm5390_vm3 = vcmp.ge.f32.partialorder %v8117_v17, 0.0  ;;  %v5518_v22 = vmul.f32 0.2, %v8117_v17 }
 0x281   : > { %v7170_v23 = vpack.c.bf16 %v5645_v21, %v5645_v21  ;;  %v5648_v24 = vsel %vm5392_vm2, %v8116_v14, %v5520_v19  ;;  %v7720_v25 = vpop.f32.mrb[76].mxu1 }
 0x282   : > { %6288 = vst.msk [vmem:[%s9301_s4 + $0x128] sm:$0xf] %vm6213_vm4, %v7172_v20  ;;  %v7173_v26 = vpack.c.bf16 %v5648_v24, %v5648_v24  ;;  %v5646_v27 = vsel %vm5390_vm3, %v8117_v17, %v5518_v22  ;;  %v7992_v28 = vpop.f32.mrb[76].mxu0  ;;  %v2420_v29 = vpop.f32.mrb[77].mxu1 }
 0x283   : > { %6286 = vst.msk [vmem:[%s9301_s4 + $0x120] sm:$0xf] %vm6213_vm4, %v7170_v23  ;;  %v7171_v30 = vpack.c.bf16 %v5646_v27, %v5646_v27  ;;  %v8118_v31 = vadd.f32 %v7992_v28, %v7720_v25  ;;  %v4982_v32 = vpop.f32.mrb[77].mxu0  ;;  %v7721_v33 = vpop.f32.mrb[78].mxu1 }
 0x284   : > { %6289 = vst.msk [vmem:[%s9301_s4 + $0x12c] sm:$0xf] %vm6213_vm4, %v7173_v26  ;;  %v8119_v34 = vadd.f32 %v4982_v32, %v2420_v29  ;;  %v7993_v35 = vpop.f32.mrb[78].mxu0  ;;  %v2423_v36 = vpop.f32.mrb[79].mxu1 }
 0x285   : > { %6287 = vst.msk [vmem:[%s9301_s4 + $0x124] sm:$0xf] %vm6213_vm4, %v7171_v30  ;;  %vm5395_vm5 = vcmp.ge.f32.partialorder %v8118_v31, 0.0  ;;  %v5523_v37 = vmul.f32 0.2, %v8118_v31  ;;  %v8120_v38 = vadd.f32 %v7993_v35, %v7721_v33  ;;  %v4985_v39 = vpop.f32.mrb[79].mxu0 }
 0x286   : > { %vm5393_vm6 = vcmp.ge.f32.partialorder %v8119_v34, 0.0  ;;  %v5521_v40 = vmul.f32 0.2, %v8119_v34  ;;  %v8121_v41 = vadd.f32 %v4985_v39, %v2423_v36 }
 0x287   : > { %v5651_v42 = vsel %vm5395_vm5, %v8118_v31, %v5523_v37  ;;  %vm5396_vm7 = vcmp.ge.f32.partialorder %v8120_v38, 0.0  ;;  %v5524_v43 = vmul.f32 0.2, %v8120_v38 }
 0x288   : > { %v7176_v44 = vpack.c.bf16 %v5651_v42, %v5651_v42  ;;  %v5649_v45 = vsel %vm5393_vm6, %v8119_v34, %v5521_v40  ;;  %vm5394_vm8 = vcmp.ge.f32.partialorder %v8121_v41, 0.0  ;;  %v5522_v46 = vmul.f32 0.2, %v8121_v41 }
 0x289   : > { %v7174_v47 = vpack.c.bf16 %v5649_v45, %v5649_v45  ;;  %v5652_v48 = vsel %vm5396_vm7, %v8120_v38, %v5524_v43  ;;  %v7724_v49 = vpop.f32.mrb[80].mxu1 }
 0x28a   : > { %6292 = vst.msk [vmem:[%s9301_s4 + $0x138] sm:$0xf] %vm6213_vm4, %v7176_v44  ;;  %v7177_v50 = vpack.c.bf16 %v5652_v48, %v5652_v48  ;;  %v5650_v51 = vsel %vm5394_vm8, %v8121_v41, %v5522_v46  ;;  %v7996_v52 = vpop.f32.mrb[80].mxu0  ;;  %v2436_v53 = vpop.f32.mrb[81].mxu1 }
 0x28b   : > { %6290 = vst.msk [vmem:[%s9301_s4 + $0x130] sm:$0xf] %vm6213_vm4, %v7174_v47  ;;  %v7175_v54 = vpack.c.bf16 %v5650_v51, %v5650_v51  ;;  %v8122_v55 = vadd.f32 %v7996_v52, %v7724_v49  ;;  %v4998_v56 = vpop.f32.mrb[81].mxu0  ;;  %v7725_v57 = vpop.f32.mrb[82].mxu1 }
 0x28c   : > { %6293 = vst.msk [vmem:[%s9301_s4 + $0x13c] sm:$0xf] %vm6213_vm4, %v7177_v50  ;;  %v8123_v58 = vadd.f32 %v4998_v56, %v2436_v53  ;;  %v7997_v59 = vpop.f32.mrb[82].mxu0  ;;  %v2439_v60 = vpop.f32.mrb[83].mxu1 }
 0x28d   : > { %6291 = vst.msk [vmem:[%s9301_s4 + $0x134] sm:$0xf] %vm6213_vm4, %v7175_v54  ;;  %vm5399_vm0 = vcmp.ge.f32.partialorder %v8122_v55, 0.0  ;;  %v5527_v61 = vmul.f32 0.2, %v8122_v55  ;;  %v8124_v62 = vadd.f32 %v7997_v59, %v7725_v57  ;;  %v5001_v63 = vpop.f32.mrb[83].mxu0 }
 0x28e   : > { %vm5397_vm9 = vcmp.ge.f32.partialorder %v8123_v58, 0.0  ;;  %v5525_v0 = vmul.f32 0.2, %v8123_v58  ;;  %v8125_v1 = vadd.f32 %v5001_v63, %v2439_v60 }
 0x28f   : > { %v5655_v2 = vsel %vm5399_vm0, %v8122_v55, %v5527_v61  ;;  %vm5400_vm10 = vcmp.ge.f32.partialorder %v8124_v62, 0.0  ;;  %v5528_v3 = vmul.f32 0.2, %v8124_v62 }
 0x290   : > { %v7180_v4 = vpack.c.bf16 %v5655_v2, %v5655_v2  ;;  %v5653_v5 = vsel %vm5397_vm9, %v8123_v58, %v5525_v0  ;;  %vm5398_vm11 = vcmp.ge.f32.partialorder %v8125_v1, 0.0  ;;  %v5526_v6 = vmul.f32 0.2, %v8125_v1 }
 0x291   : > { %v7178_v7 = vpack.c.bf16 %v5653_v5, %v5653_v5  ;;  %v5656_v8 = vsel %vm5400_vm10, %v8124_v62, %v5528_v3  ;;  %v7728_v9 = vpop.f32.mrb[84].mxu1 }
 0x292   : > { %6296 = vst.msk [vmem:[%s9301_s4 + $0x148] sm:$0xf] %vm6213_vm4, %v7180_v4  ;;  %v7181_v10 = vpack.c.bf16 %v5656_v8, %v5656_v8  ;;  %v5654_v11 = vsel %vm5398_vm11, %v8125_v1, %v5526_v6  ;;  %v8000_v12 = vpop.f32.mrb[84].mxu0  ;;  %v2452_v13 = vpop.f32.mrb[85].mxu1 }
 0x293   : > { %6294 = vst.msk [vmem:[%s9301_s4 + $0x140] sm:$0xf] %vm6213_vm4, %v7178_v7  ;;  %v7179_v14 = vpack.c.bf16 %v5654_v11, %v5654_v11  ;;  %v8126_v15 = vadd.f32 %v8000_v12, %v7728_v9  ;;  %v5014_v16 = vpop.f32.mrb[85].mxu0  ;;  %v7729_v17 = vpop.f32.mrb[86].mxu1 }
 0x294   : > { %6297 = vst.msk [vmem:[%s9301_s4 + $0x14c] sm:$0xf] %vm6213_vm4, %v7181_v10  ;;  %v8127_v18 = vadd.f32 %v5014_v16, %v2452_v13  ;;  %v8001_v19 = vpop.f32.mrb[86].mxu0  ;;  %v2455_v20 = vpop.f32.mrb[87].mxu1 }
 0x295   : > { %6295 = vst.msk [vmem:[%s9301_s4 + $0x144] sm:$0xf] %vm6213_vm4, %v7179_v14  ;;  %vm5403_vm12 = vcmp.ge.f32.partialorder %v8126_v15, 0.0  ;;  %v5531_v21 = vmul.f32 0.2, %v8126_v15  ;;  %v8128_v22 = vadd.f32 %v8001_v19, %v7729_v17  ;;  %v5017_v23 = vpop.f32.mrb[87].mxu0 }
 0x296   : > { %vm5401_vm13 = vcmp.ge.f32.partialorder %v8127_v18, 0.0  ;;  %v5529_v24 = vmul.f32 0.2, %v8127_v18  ;;  %v8129_v25 = vadd.f32 %v5017_v23, %v2455_v20 }
 0x297   : > { %v5659_v26 = vsel %vm5403_vm12, %v8126_v15, %v5531_v21  ;;  %vm5404_vm14 = vcmp.ge.f32.partialorder %v8128_v22, 0.0  ;;  %v5532_v27 = vmul.f32 0.2, %v8128_v22 }
 0x298   : > { %v7184_v28 = vpack.c.bf16 %v5659_v26, %v5659_v26  ;;  %v5657_v29 = vsel %vm5401_vm13, %v8127_v18, %v5529_v24  ;;  %vm5402_vm15 = vcmp.ge.f32.partialorder %v8129_v25, 0.0  ;;  %v5530_v30 = vmul.f32 0.2, %v8129_v25 }
 0x299   : > { %v7182_v31 = vpack.c.bf16 %v5657_v29, %v5657_v29  ;;  %v5660_v32 = vsel %vm5404_vm14, %v8128_v22, %v5532_v27  ;;  %v7732_v33 = vpop.f32.mrb[88].mxu1 }
 0x29a   : > { %6300 = vst.msk [vmem:[%s9301_s4 + $0x158] sm:$0xf] %vm6213_vm4, %v7184_v28  ;;  %v7185_v34 = vpack.c.bf16 %v5660_v32, %v5660_v32  ;;  %v5658_v35 = vsel %vm5402_vm15, %v8129_v25, %v5530_v30  ;;  %v8004_v36 = vpop.f32.mrb[88].mxu0  ;;  %v2468_v37 = vpop.f32.mrb[89].mxu1 }
 0x29b   : > { %6298 = vst.msk [vmem:[%s9301_s4 + $0x150] sm:$0xf] %vm6213_vm4, %v7182_v31  ;;  %v7183_v38 = vpack.c.bf16 %v5658_v35, %v5658_v35  ;;  %v8130_v39 = vadd.f32 %v8004_v36, %v7732_v33  ;;  %v5030_v40 = vpop.f32.mrb[89].mxu0  ;;  %v7733_v41 = vpop.f32.mrb[90].mxu1 }
 0x29c   : > { %6301 = vst.msk [vmem:[%s9301_s4 + $0x15c] sm:$0xf] %vm6213_vm4, %v7185_v34  ;;  %v8131_v42 = vadd.f32 %v5030_v40, %v2468_v37  ;;  %v8005_v43 = vpop.f32.mrb[90].mxu0  ;;  %v2471_v44 = vpop.f32.mrb[91].mxu1 }
 0x29d   : > { %6299 = vst.msk [vmem:[%s9301_s4 + $0x154] sm:$0xf] %vm6213_vm4, %v7183_v38  ;;  %vm5407_vm1 = vcmp.ge.f32.partialorder %v8130_v39, 0.0  ;;  %v5535_v45 = vmul.f32 0.2, %v8130_v39  ;;  %v8132_v46 = vadd.f32 %v8005_v43, %v7733_v41  ;;  %v5033_v47 = vpop.f32.mrb[91].mxu0 }
 0x29e   : > { %vm5405_vm2 = vcmp.ge.f32.partialorder %v8131_v42, 0.0  ;;  %v5533_v48 = vmul.f32 0.2, %v8131_v42  ;;  %v8133_v49 = vadd.f32 %v5033_v47, %v2471_v44 }
 0x29f   : > { %v5663_v50 = vsel %vm5407_vm1, %v8130_v39, %v5535_v45  ;;  %vm5408_vm3 = vcmp.ge.f32.partialorder %v8132_v46, 0.0  ;;  %v5536_v51 = vmul.f32 0.2, %v8132_v46 }
 0x2a0   : > { %v7188_v52 = vpack.c.bf16 %v5663_v50, %v5663_v50  ;;  %v5661_v53 = vsel %vm5405_vm2, %v8131_v42, %v5533_v48  ;;  %vm5406_vm5 = vcmp.ge.f32.partialorder %v8133_v49, 0.0  ;;  %v5534_v54 = vmul.f32 0.2, %v8133_v49 }
 0x2a1   : > { %v7186_v55 = vpack.c.bf16 %v5661_v53, %v5661_v53  ;;  %v5664_v56 = vsel %vm5408_vm3, %v8132_v46, %v5536_v51  ;;  %v7736_v57 = vpop.f32.mrb[92].mxu1 }
 0x2a2   : > { %6304 = vst.msk [vmem:[%s9301_s4 + $0x168] sm:$0xf] %vm6213_vm4, %v7188_v52  ;;  %v7189_v58 = vpack.c.bf16 %v5664_v56, %v5664_v56  ;;  %v5662_v59 = vsel %vm5406_vm5, %v8133_v49, %v5534_v54  ;;  %v8008_v60 = vpop.f32.mrb[92].mxu0  ;;  %v2484_v61 = vpop.f32.mrb[93].mxu1 }
 0x2a3   : > { %6302 = vst.msk [vmem:[%s9301_s4 + $0x160] sm:$0xf] %vm6213_vm4, %v7186_v55  ;;  %v7187_v62 = vpack.c.bf16 %v5662_v59, %v5662_v59  ;;  %v8134_v63 = vadd.f32 %v8008_v60, %v7736_v57  ;;  %v5046_v0 = vpop.f32.mrb[93].mxu0  ;;  %v7737_v1 = vpop.f32.mrb[94].mxu1 }
 0x2a4   : > { %6305 = vst.msk [vmem:[%s9301_s4 + $0x16c] sm:$0xf] %vm6213_vm4, %v7189_v58  ;;  %v8135_v2 = vadd.f32 %v5046_v0, %v2484_v61  ;;  %v8009_v3 = vpop.f32.mrb[94].mxu0  ;;  %v2487_v4 = vpop.f32.mrb[95].mxu1 }
 0x2a5   : > { %6303 = vst.msk [vmem:[%s9301_s4 + $0x164] sm:$0xf] %vm6213_vm4, %v7187_v62  ;;  %vm5411_vm6 = vcmp.ge.f32.partialorder %v8134_v63, 0.0  ;;  %v5539_v5 = vmul.f32 0.2, %v8134_v63  ;;  %v8136_v6 = vadd.f32 %v8009_v3, %v7737_v1  ;;  %v5049_v7 = vpop.f32.mrb[95].mxu0 }
 0x2a6   : > { %vm5409_vm7 = vcmp.ge.f32.partialorder %v8135_v2, 0.0  ;;  %v5537_v8 = vmul.f32 0.2, %v8135_v2  ;;  %v8137_v9 = vadd.f32 %v5049_v7, %v2487_v4 }
 0x2a7   : > { %v5667_v10 = vsel %vm5411_vm6, %v8134_v63, %v5539_v5  ;;  %vm5412_vm8 = vcmp.ge.f32.partialorder %v8136_v6, 0.0  ;;  %v5540_v11 = vmul.f32 0.2, %v8136_v6 }
 0x2a8   : > { %v7192_v12 = vpack.c.bf16 %v5667_v10, %v5667_v10  ;;  %v5665_v13 = vsel %vm5409_vm7, %v8135_v2, %v5537_v8  ;;  %vm5410_vm0 = vcmp.ge.f32.partialorder %v8137_v9, 0.0  ;;  %v5538_v14 = vmul.f32 0.2, %v8137_v9 }
 0x2a9   : > { %v7190_v15 = vpack.c.bf16 %v5665_v13, %v5665_v13  ;;  %v5668_v16 = vsel %vm5412_vm8, %v8136_v6, %v5540_v11  ;;  %v7740_v17 = vpop.f32.mrb[96].mxu1 }
 0x2aa   : > { %6308 = vst.msk [vmem:[%s9301_s4 + $0x178] sm:$0xf] %vm6213_vm4, %v7192_v12  ;;  %v7193_v18 = vpack.c.bf16 %v5668_v16, %v5668_v16  ;;  %v5666_v19 = vsel %vm5410_vm0, %v8137_v9, %v5538_v14  ;;  %v8012_v20 = vpop.f32.mrb[96].mxu0  ;;  %v2500_v21 = vpop.f32.mrb[97].mxu1 }
 0x2ab   : > { %6306 = vst.msk [vmem:[%s9301_s4 + $0x170] sm:$0xf] %vm6213_vm4, %v7190_v15  ;;  %v7191_v22 = vpack.c.bf16 %v5666_v19, %v5666_v19  ;;  %v8138_v23 = vadd.f32 %v8012_v20, %v7740_v17  ;;  %v5062_v24 = vpop.f32.mrb[97].mxu0  ;;  %v7741_v25 = vpop.f32.mrb[98].mxu1 }
 0x2ac   : > { %6309 = vst.msk [vmem:[%s9301_s4 + $0x17c] sm:$0xf] %vm6213_vm4, %v7193_v18  ;;  %v8139_v26 = vadd.f32 %v5062_v24, %v2500_v21  ;;  %v8013_v27 = vpop.f32.mrb[98].mxu0  ;;  %v2503_v28 = vpop.f32.mrb[99].mxu1 }
 0x2ad   : > { %6307 = vst.msk [vmem:[%s9301_s4 + $0x174] sm:$0xf] %vm6213_vm4, %v7191_v22  ;;  %vm5415_vm9 = vcmp.ge.f32.partialorder %v8138_v23, 0.0  ;;  %v5543_v29 = vmul.f32 0.2, %v8138_v23  ;;  %v8140_v30 = vadd.f32 %v8013_v27, %v7741_v25  ;;  %v5065_v31 = vpop.f32.mrb[99].mxu0 }
 0x2ae   : > { %vm5413_vm10 = vcmp.ge.f32.partialorder %v8139_v26, 0.0  ;;  %v5541_v32 = vmul.f32 0.2, %v8139_v26  ;;  %v8141_v33 = vadd.f32 %v5065_v31, %v2503_v28 }
 0x2af   : > { %v5671_v34 = vsel %vm5415_vm9, %v8138_v23, %v5543_v29  ;;  %vm5416_vm11 = vcmp.ge.f32.partialorder %v8140_v30, 0.0  ;;  %v5544_v35 = vmul.f32 0.2, %v8140_v30 }
 0x2b0   : > { %v7196_v36 = vpack.c.bf16 %v5671_v34, %v5671_v34  ;;  %v5669_v37 = vsel %vm5413_vm10, %v8139_v26, %v5541_v32  ;;  %vm5414_vm12 = vcmp.ge.f32.partialorder %v8141_v33, 0.0  ;;  %v5542_v38 = vmul.f32 0.2, %v8141_v33 }
 0x2b1   : > { %v7194_v39 = vpack.c.bf16 %v5669_v37, %v5669_v37  ;;  %v5672_v40 = vsel %vm5416_vm11, %v8140_v30, %v5544_v35  ;;  %v7744_v41 = vpop.f32.mrb[100].mxu1 }
 0x2b2   : > { %6312 = vst.msk [vmem:[%s9301_s4 + $0x188] sm:$0xf] %vm6213_vm4, %v7196_v36  ;;  %v7197_v42 = vpack.c.bf16 %v5672_v40, %v5672_v40  ;;  %v5670_v43 = vsel %vm5414_vm12, %v8141_v33, %v5542_v38  ;;  %v8016_v44 = vpop.f32.mrb[100].mxu0  ;;  %v2516_v45 = vpop.f32.mrb[101].mxu1 }
 0x2b3   : > { %6310 = vst.msk [vmem:[%s9301_s4 + $0x180] sm:$0xf] %vm6213_vm4, %v7194_v39  ;;  %v7195_v46 = vpack.c.bf16 %v5670_v43, %v5670_v43  ;;  %v8142_v47 = vadd.f32 %v8016_v44, %v7744_v41  ;;  %v5078_v48 = vpop.f32.mrb[101].mxu0  ;;  %v7745_v49 = vpop.f32.mrb[102].mxu1 }
 0x2b4   : > { %6313 = vst.msk [vmem:[%s9301_s4 + $0x18c] sm:$0xf] %vm6213_vm4, %v7197_v42  ;;  %v8143_v50 = vadd.f32 %v5078_v48, %v2516_v45  ;;  %v8017_v51 = vpop.f32.mrb[102].mxu0  ;;  %v2519_v52 = vpop.f32.mrb[103].mxu1 }
 0x2b5   : > { %6311 = vst.msk [vmem:[%s9301_s4 + $0x184] sm:$0xf] %vm6213_vm4, %v7195_v46  ;;  %vm5419_vm13 = vcmp.ge.f32.partialorder %v8142_v47, 0.0  ;;  %v5547_v53 = vmul.f32 0.2, %v8142_v47  ;;  %v8144_v54 = vadd.f32 %v8017_v51, %v7745_v49  ;;  %v5081_v55 = vpop.f32.mrb[103].mxu0 }
 0x2b6   : > { %vm5417_vm14 = vcmp.ge.f32.partialorder %v8143_v50, 0.0  ;;  %v5545_v56 = vmul.f32 0.2, %v8143_v50  ;;  %v8145_v57 = vadd.f32 %v5081_v55, %v2519_v52 }
 0x2b7   : > { %v5675_v58 = vsel %vm5419_vm13, %v8142_v47, %v5547_v53  ;;  %vm5420_vm15 = vcmp.ge.f32.partialorder %v8144_v54, 0.0  ;;  %v5548_v59 = vmul.f32 0.2, %v8144_v54 }
 0x2b8   : > { %v7200_v60 = vpack.c.bf16 %v5675_v58, %v5675_v58  ;;  %v5673_v61 = vsel %vm5417_vm14, %v8143_v50, %v5545_v56  ;;  %vm5418_vm1 = vcmp.ge.f32.partialorder %v8145_v57, 0.0  ;;  %v5546_v62 = vmul.f32 0.2, %v8145_v57 }
 0x2b9   : > { %v7198_v63 = vpack.c.bf16 %v5673_v61, %v5673_v61  ;;  %v5676_v0 = vsel %vm5420_vm15, %v8144_v54, %v5548_v59  ;;  %v7748_v1 = vpop.f32.mrb[104].mxu1 }
 0x2ba   : > { %6316 = vst.msk [vmem:[%s9301_s4 + $0x198] sm:$0xf] %vm6213_vm4, %v7200_v60  ;;  %v7201_v2 = vpack.c.bf16 %v5676_v0, %v5676_v0  ;;  %v5674_v3 = vsel %vm5418_vm1, %v8145_v57, %v5546_v62  ;;  %v8020_v4 = vpop.f32.mrb[104].mxu0  ;;  %v2532_v5 = vpop.f32.mrb[105].mxu1 }
 0x2bb   : > { %6314 = vst.msk [vmem:[%s9301_s4 + $0x190] sm:$0xf] %vm6213_vm4, %v7198_v63  ;;  %v7199_v6 = vpack.c.bf16 %v5674_v3, %v5674_v3  ;;  %v8146_v7 = vadd.f32 %v8020_v4, %v7748_v1  ;;  %v5094_v8 = vpop.f32.mrb[105].mxu0  ;;  %v7749_v9 = vpop.f32.mrb[106].mxu1 }
 0x2bc   : > { %6317 = vst.msk [vmem:[%s9301_s4 + $0x19c] sm:$0xf] %vm6213_vm4, %v7201_v2  ;;  %v8147_v10 = vadd.f32 %v5094_v8, %v2532_v5  ;;  %v8021_v11 = vpop.f32.mrb[106].mxu0  ;;  %v2535_v12 = vpop.f32.mrb[107].mxu1 }
 0x2bd   : > { %6315 = vst.msk [vmem:[%s9301_s4 + $0x194] sm:$0xf] %vm6213_vm4, %v7199_v6  ;;  %vm5423_vm2 = vcmp.ge.f32.partialorder %v8146_v7, 0.0  ;;  %v5551_v13 = vmul.f32 0.2, %v8146_v7  ;;  %v8148_v14 = vadd.f32 %v8021_v11, %v7749_v9  ;;  %v5097_v15 = vpop.f32.mrb[107].mxu0 }
 0x2be   : > { %vm5421_vm3 = vcmp.ge.f32.partialorder %v8147_v10, 0.0  ;;  %v5549_v16 = vmul.f32 0.2, %v8147_v10  ;;  %v8149_v17 = vadd.f32 %v5097_v15, %v2535_v12 }
 0x2bf   : > { %v5679_v18 = vsel %vm5423_vm2, %v8146_v7, %v5551_v13  ;;  %vm5424_vm5 = vcmp.ge.f32.partialorder %v8148_v14, 0.0  ;;  %v5552_v19 = vmul.f32 0.2, %v8148_v14 }
 0x2c0   : > { %v7204_v20 = vpack.c.bf16 %v5679_v18, %v5679_v18  ;;  %v5677_v21 = vsel %vm5421_vm3, %v8147_v10, %v5549_v16  ;;  %vm5422_vm6 = vcmp.ge.f32.partialorder %v8149_v17, 0.0  ;;  %v5550_v22 = vmul.f32 0.2, %v8149_v17 }
 0x2c1   : > { %v7202_v23 = vpack.c.bf16 %v5677_v21, %v5677_v21  ;;  %v5680_v24 = vsel %vm5424_vm5, %v8148_v14, %v5552_v19  ;;  %v7752_v25 = vpop.f32.mrb[108].mxu1 }
 0x2c2   : > { %6320 = vst.msk [vmem:[%s9301_s4 + $0x1a8] sm:$0xf] %vm6213_vm4, %v7204_v20  ;;  %v7205_v26 = vpack.c.bf16 %v5680_v24, %v5680_v24  ;;  %v5678_v27 = vsel %vm5422_vm6, %v8149_v17, %v5550_v22  ;;  %v8024_v28 = vpop.f32.mrb[108].mxu0  ;;  %v2548_v29 = vpop.f32.mrb[109].mxu1 }
 0x2c3   : > { %6318 = vst.msk [vmem:[%s9301_s4 + $0x1a0] sm:$0xf] %vm6213_vm4, %v7202_v23  ;;  %v7203_v30 = vpack.c.bf16 %v5678_v27, %v5678_v27  ;;  %v8150_v31 = vadd.f32 %v8024_v28, %v7752_v25  ;;  %v5110_v32 = vpop.f32.mrb[109].mxu0  ;;  %v7753_v33 = vpop.f32.mrb[110].mxu1 }
 0x2c4   : > { %6321 = vst.msk [vmem:[%s9301_s4 + $0x1ac] sm:$0xf] %vm6213_vm4, %v7205_v26  ;;  %v8151_v34 = vadd.f32 %v5110_v32, %v2548_v29  ;;  %v8025_v35 = vpop.f32.mrb[110].mxu0  ;;  %v2551_v36 = vpop.f32.mrb[111].mxu1 }
 0x2c5   : > { %6319 = vst.msk [vmem:[%s9301_s4 + $0x1a4] sm:$0xf] %vm6213_vm4, %v7203_v30  ;;  %vm5427_vm7 = vcmp.ge.f32.partialorder %v8150_v31, 0.0  ;;  %v5555_v37 = vmul.f32 0.2, %v8150_v31  ;;  %v8152_v38 = vadd.f32 %v8025_v35, %v7753_v33  ;;  %v5113_v39 = vpop.f32.mrb[111].mxu0 }
 0x2c6   : > { %vm5425_vm8 = vcmp.ge.f32.partialorder %v8151_v34, 0.0  ;;  %v5553_v40 = vmul.f32 0.2, %v8151_v34  ;;  %v8153_v41 = vadd.f32 %v5113_v39, %v2551_v36 }
 0x2c7   : > { %v5683_v42 = vsel %vm5427_vm7, %v8150_v31, %v5555_v37  ;;  %vm5428_vm0 = vcmp.ge.f32.partialorder %v8152_v38, 0.0  ;;  %v5556_v43 = vmul.f32 0.2, %v8152_v38 }
 0x2c8   : > { %v7208_v44 = vpack.c.bf16 %v5683_v42, %v5683_v42  ;;  %v5681_v45 = vsel %vm5425_vm8, %v8151_v34, %v5553_v40  ;;  %vm5426_vm9 = vcmp.ge.f32.partialorder %v8153_v41, 0.0  ;;  %v5554_v46 = vmul.f32 0.2, %v8153_v41 }
 0x2c9   : > { %v7206_v47 = vpack.c.bf16 %v5681_v45, %v5681_v45  ;;  %v5684_v48 = vsel %vm5428_vm0, %v8152_v38, %v5556_v43  ;;  %v7756_v49 = vpop.f32.mrb[112].mxu1 }
 0x2ca   : > { %6324 = vst.msk [vmem:[%s9301_s4 + $0x1b8] sm:$0xf] %vm6213_vm4, %v7208_v44  ;;  %v7209_v50 = vpack.c.bf16 %v5684_v48, %v5684_v48  ;;  %v5682_v51 = vsel %vm5426_vm9, %v8153_v41, %v5554_v46  ;;  %v8028_v52 = vpop.f32.mrb[112].mxu0  ;;  %v2564_v53 = vpop.f32.mrb[113].mxu1 }
 0x2cb   : > { %6322 = vst.msk [vmem:[%s9301_s4 + $0x1b0] sm:$0xf] %vm6213_vm4, %v7206_v47  ;;  %v7207_v54 = vpack.c.bf16 %v5682_v51, %v5682_v51  ;;  %v8154_v55 = vadd.f32 %v8028_v52, %v7756_v49  ;;  %v5126_v56 = vpop.f32.mrb[113].mxu0  ;;  %v7757_v57 = vpop.f32.mrb[114].mxu1 }
 0x2cc   : > { %6325 = vst.msk [vmem:[%s9301_s4 + $0x1bc] sm:$0xf] %vm6213_vm4, %v7209_v50  ;;  %v8155_v58 = vadd.f32 %v5126_v56, %v2564_v53  ;;  %v8029_v59 = vpop.f32.mrb[114].mxu0  ;;  %v2567_v60 = vpop.f32.mrb[115].mxu1 }
 0x2cd   : > { %6323 = vst.msk [vmem:[%s9301_s4 + $0x1b4] sm:$0xf] %vm6213_vm4, %v7207_v54  ;;  %vm5431_vm10 = vcmp.ge.f32.partialorder %v8154_v55, 0.0  ;;  %v5559_v61 = vmul.f32 0.2, %v8154_v55  ;;  %v8156_v62 = vadd.f32 %v8029_v59, %v7757_v57  ;;  %v5129_v63 = vpop.f32.mrb[115].mxu0 }
 0x2ce   : > { %vm5429_vm11 = vcmp.ge.f32.partialorder %v8155_v58, 0.0  ;;  %v5557_v0 = vmul.f32 0.2, %v8155_v58  ;;  %v8157_v1 = vadd.f32 %v5129_v63, %v2567_v60 }
 0x2cf   : > { %v5687_v2 = vsel %vm5431_vm10, %v8154_v55, %v5559_v61  ;;  %vm5432_vm12 = vcmp.ge.f32.partialorder %v8156_v62, 0.0  ;;  %v5560_v3 = vmul.f32 0.2, %v8156_v62 }
 0x2d0   : > { %v7212_v4 = vpack.c.bf16 %v5687_v2, %v5687_v2  ;;  %v5685_v5 = vsel %vm5429_vm11, %v8155_v58, %v5557_v0  ;;  %vm5430_vm13 = vcmp.ge.f32.partialorder %v8157_v1, 0.0  ;;  %v5558_v6 = vmul.f32 0.2, %v8157_v1 }
 0x2d1   : > { %v7210_v7 = vpack.c.bf16 %v5685_v5, %v5685_v5  ;;  %v5688_v8 = vsel %vm5432_vm12, %v8156_v62, %v5560_v3  ;;  %v7760_v9 = vpop.f32.mrb[116].mxu1 }
 0x2d2   : > { %6328 = vst.msk [vmem:[%s9301_s4 + $0x1c8] sm:$0xf] %vm6213_vm4, %v7212_v4  ;;  %v7213_v10 = vpack.c.bf16 %v5688_v8, %v5688_v8  ;;  %v5686_v11 = vsel %vm5430_vm13, %v8157_v1, %v5558_v6  ;;  %v8032_v12 = vpop.f32.mrb[116].mxu0  ;;  %v2580_v13 = vpop.f32.mrb[117].mxu1 }
 0x2d3   : > { %6326 = vst.msk [vmem:[%s9301_s4 + $0x1c0] sm:$0xf] %vm6213_vm4, %v7210_v7  ;;  %v7211_v14 = vpack.c.bf16 %v5686_v11, %v5686_v11  ;;  %v8158_v15 = vadd.f32 %v8032_v12, %v7760_v9  ;;  %v5142_v16 = vpop.f32.mrb[117].mxu0  ;;  %v7761_v17 = vpop.f32.mrb[118].mxu1 }
 0x2d4   : > { %6329 = vst.msk [vmem:[%s9301_s4 + $0x1cc] sm:$0xf] %vm6213_vm4, %v7213_v10  ;;  %v8159_v18 = vadd.f32 %v5142_v16, %v2580_v13  ;;  %v8033_v19 = vpop.f32.mrb[118].mxu0  ;;  %v2583_v20 = vpop.f32.mrb[119].mxu1 }
 0x2d5   : > { %6327 = vst.msk [vmem:[%s9301_s4 + $0x1c4] sm:$0xf] %vm6213_vm4, %v7211_v14  ;;  %vm5435_vm14 = vcmp.ge.f32.partialorder %v8158_v15, 0.0  ;;  %v5563_v21 = vmul.f32 0.2, %v8158_v15  ;;  %v8160_v22 = vadd.f32 %v8033_v19, %v7761_v17  ;;  %v5145_v23 = vpop.f32.mrb[119].mxu0 }
 0x2d6   : > { %vm5433_vm15 = vcmp.ge.f32.partialorder %v8159_v18, 0.0  ;;  %v5561_v24 = vmul.f32 0.2, %v8159_v18  ;;  %v8161_v25 = vadd.f32 %v5145_v23, %v2583_v20 }
 0x2d7   : > { %v5691_v26 = vsel %vm5435_vm14, %v8158_v15, %v5563_v21  ;;  %vm5436_vm1 = vcmp.ge.f32.partialorder %v8160_v22, 0.0  ;;  %v5564_v27 = vmul.f32 0.2, %v8160_v22 }
 0x2d8   : > { %v7216_v28 = vpack.c.bf16 %v5691_v26, %v5691_v26  ;;  %v5689_v29 = vsel %vm5433_vm15, %v8159_v18, %v5561_v24  ;;  %vm5434_vm2 = vcmp.ge.f32.partialorder %v8161_v25, 0.0  ;;  %v5562_v30 = vmul.f32 0.2, %v8161_v25 }
 0x2d9   : > { %v7214_v31 = vpack.c.bf16 %v5689_v29, %v5689_v29  ;;  %v5692_v32 = vsel %vm5436_vm1, %v8160_v22, %v5564_v27  ;;  %v7764_v33 = vpop.f32.mrb[120].mxu1 }
 0x2da   : > { %6332 = vst.msk [vmem:[%s9301_s4 + $0x1d8] sm:$0xf] %vm6213_vm4, %v7216_v28  ;;  %v7217_v34 = vpack.c.bf16 %v5692_v32, %v5692_v32  ;;  %v5690_v35 = vsel %vm5434_vm2, %v8161_v25, %v5562_v30  ;;  %v8036_v36 = vpop.f32.mrb[120].mxu0  ;;  %v2596_v37 = vpop.f32.mrb[121].mxu1 }
 0x2db   : > { %6330 = vst.msk [vmem:[%s9301_s4 + $0x1d0] sm:$0xf] %vm6213_vm4, %v7214_v31  ;;  %v7215_v38 = vpack.c.bf16 %v5690_v35, %v5690_v35  ;;  %v8162_v39 = vadd.f32 %v8036_v36, %v7764_v33  ;;  %v5158_v40 = vpop.f32.mrb[121].mxu0  ;;  %v7765_v41 = vpop.f32.mrb[122].mxu1 }
 0x2dc   : > { %6333 = vst.msk [vmem:[%s9301_s4 + $0x1dc] sm:$0xf] %vm6213_vm4, %v7217_v34  ;;  %v8163_v42 = vadd.f32 %v5158_v40, %v2596_v37  ;;  %v8037_v43 = vpop.f32.mrb[122].mxu0  ;;  %v2599_v44 = vpop.f32.mrb[123].mxu1 }
 0x2dd   : > { %6331 = vst.msk [vmem:[%s9301_s4 + $0x1d4] sm:$0xf] %vm6213_vm4, %v7215_v38  ;;  %vm5439_vm3 = vcmp.ge.f32.partialorder %v8162_v39, 0.0  ;;  %v5567_v45 = vmul.f32 0.2, %v8162_v39  ;;  %v8164_v46 = vadd.f32 %v8037_v43, %v7765_v41  ;;  %v5161_v47 = vpop.f32.mrb[123].mxu0 }
 0x2de   : > { %vm5437_vm5 = vcmp.ge.f32.partialorder %v8163_v42, 0.0  ;;  %v5565_v48 = vmul.f32 0.2, %v8163_v42  ;;  %v8165_v49 = vadd.f32 %v5161_v47, %v2599_v44 }
 0x2df   : > { %v5695_v50 = vsel %vm5439_vm3, %v8162_v39, %v5567_v45  ;;  %vm5440_vm6 = vcmp.ge.f32.partialorder %v8164_v46, 0.0  ;;  %v5568_v51 = vmul.f32 0.2, %v8164_v46 }
 0x2e0   : > { %v7220_v52 = vpack.c.bf16 %v5695_v50, %v5695_v50  ;;  %v5693_v53 = vsel %vm5437_vm5, %v8163_v42, %v5565_v48  ;;  %vm5438_vm7 = vcmp.ge.f32.partialorder %v8165_v49, 0.0  ;;  %v5566_v54 = vmul.f32 0.2, %v8165_v49 }
 0x2e1   : > { %v7218_v55 = vpack.c.bf16 %v5693_v53, %v5693_v53  ;;  %v5696_v56 = vsel %vm5440_vm6, %v8164_v46, %v5568_v51  ;;  %v7768_v57 = vpop.f32.mrb[124].mxu1 }
 0x2e2   : > { %6336 = vst.msk [vmem:[%s9301_s4 + $0x1e8] sm:$0xf] %vm6213_vm4, %v7220_v52  ;;  %v7221_v58 = vpack.c.bf16 %v5696_v56, %v5696_v56  ;;  %v5694_v59 = vsel %vm5438_vm7, %v8165_v49, %v5566_v54  ;;  %v8040_v60 = vpop.f32.mrb[124].mxu0  ;;  %v2612_v61 = vpop.f32.mrb[125].mxu1 }
 0x2e3   : > { %6334 = vst.msk [vmem:[%s9301_s4 + $0x1e0] sm:$0xf] %vm6213_vm4, %v7218_v55  ;;  %v7219_v62 = vpack.c.bf16 %v5694_v59, %v5694_v59  ;;  %v8166_v63 = vadd.f32 %v8040_v60, %v7768_v57  ;;  %v5174_v0 = vpop.f32.mrb[125].mxu0  ;;  %v7769_v1 = vpop.f32.mrb[126].mxu1 }
 0x2e4   : > { %6337 = vst.msk [vmem:[%s9301_s4 + $0x1ec] sm:$0xf] %vm6213_vm4, %v7221_v58  ;;  %v8167_v2 = vadd.f32 %v5174_v0, %v2612_v61  ;;  %v8041_v3 = vpop.f32.mrb[126].mxu0  ;;  %v2615_v4 = vpop.f32.mrb[127].mxu1 }
 0x2e5   : > { %6335 = vst.msk [vmem:[%s9301_s4 + $0x1e4] sm:$0xf] %vm6213_vm4, %v7219_v62  ;;  %vm5443_vm8 = vcmp.ge.f32.partialorder %v8166_v63, 0.0  ;;  %v5571_v5 = vmul.f32 0.2, %v8166_v63  ;;  %v8168_v6 = vadd.f32 %v8041_v3, %v7769_v1  ;;  %v5177_v7 = vpop.f32.mrb[127].mxu0 }
 0x2e6   : > { %vm5441_vm0 = vcmp.ge.f32.partialorder %v8167_v2, 0.0  ;;  %v5569_v8 = vmul.f32 0.2, %v8167_v2  ;;  %v8169_v9 = vadd.f32 %v5177_v7, %v2615_v4 }
 0x2e7   : > { %v5699_v10 = vsel %vm5443_vm8, %v8166_v63, %v5571_v5  ;;  %vm5444_vm9 = vcmp.ge.f32.partialorder %v8168_v6, 0.0  ;;  %v5572_v11 = vmul.f32 0.2, %v8168_v6 }
 0x2e8   : > { %v7224_v12 = vpack.c.bf16 %v5699_v10, %v5699_v10  ;;  %v5697_v13 = vsel %vm5441_vm0, %v8167_v2, %v5569_v8  ;;  %vm5442_vm10 = vcmp.ge.f32.partialorder %v8169_v9, 0.0  ;;  %v5570_v14 = vmul.f32 0.2, %v8169_v9 }
 0x2e9   : > { %v7222_v15 = vpack.c.bf16 %v5697_v13, %v5697_v13  ;;  %v5700_v16 = vsel %vm5444_vm9, %v8168_v6, %v5572_v11 }
 0x2ea   : > { %6340 = vst.msk [vmem:[%s9301_s4 + $0x1f8] sm:$0xf] %vm6213_vm4, %v7224_v12  ;;  %v7225_v17 = vpack.c.bf16 %v5700_v16, %v5700_v16  ;;  %v5698_v18 = vsel %vm5442_vm10, %v8169_v9, %v5570_v14 }
 0x2eb   : > { %6338 = vst.msk [vmem:[%s9301_s4 + $0x1f0] sm:$0xf] %vm6213_vm4, %v7222_v15  ;;  %v7223_v19 = vpack.c.bf16 %v5698_v18, %v5698_v18 }
 0x2ec   : > { %6341 = vst.msk [vmem:[%s9301_s4 + $0x1fc] sm:$0xf] %vm6213_vm4, %v7225_v17 }
 0x2ed   : > { %6339 = vst.msk [vmem:[%s9301_s4 + $0x1f4] sm:$0xf] %vm6213_vm4, %v7223_v19 }
 0x2ee PF: > { %s13_s12 = sadd.s32 1, %s8717_s12  }
 0x2ef   : > { %p10_p4 = scmp.ge.s32.totalorder %s13_s12, 4  }
 0x2f1   :  { %12 = sbr.rel (!%p10_p4) target bundleno = 1 (0x1), region = 68 }

// kernel: _forward_impl.5
= control target key start
LH: loop header
LB: loop body
LE: loop exit
PB: predicated region body
PF: predicated region fallthrough
CT: control target
= control target key end

     0   :  { %s2935_s12 = smov 0   ;;  %s3809_s0 = inlined_call_operand.vmem [shape: bf16[2,272,64], index: 0, kind: input, shape index: {}]   ;;  %s3810_s1 = inlined_call_operand.vmem [shape: bf16[2,272,64], index: 1, kind: input, shape index: {}]   ;;  %s3811_s2 = inlined_call_operand.vmem [shape: bf16[4,64,32], index: 2, kind: input, shape index: {}]   ;;  %s3812_s3 = inlined_call_operand.vmem [shape: bf16[2,256,32], index: 3, kind: output, shape index: {}]  }
   0x1 LB: > { %s2236_s13 = sadd.s32 4294967295, %s2913_s12   ;;  %p2240_p0 = scmp.ge.s32.totalorder %s2913_s12, 1  ;;  %s2913_s12 = sphi %s2935_s12, %s13_s12  }
   0x2   : > { %p147_p1 = scmp.lt.s32.totalorder %s2913_s12, 3 }
   0x4   : > { %p148_p2 = pnand %p2240_p0, %p147_p1 }
   0x5   : > { %v2825_v0 = vld [vmem:[%s3811_s2 + $0x20] sm:$0xff] (!%p148_p2)   ;;  %p176_p3 = scmp.lt.s32.totalorder (!%p148_p2), %s2236_s13, 1  ;;  %v2827_v2 = vld [vmem:[%s3811_s2 + $0x28] sm:$0xff] (!%p148_p2)   ;;  %v2829_v4 = vld [vmem:[%s3811_s2 + $0x30] sm:$0xff] (!%p148_p2)   ;;  %vm377_vm0 = vcmask (!%p148_p2), 523264   ;;  %vm1672_vm1 = vcmask (!%p148_p2), 261120  }
   0x6   : > { %151 = sbr.rel (%p148_p2) target bundleno = 531 (0x213), region = 32  ;;  %v2826_v1 = vld [vmem:[%s3811_s2 + $0x40] sm:$0xff] (!%p148_p2)   ;;  %2560 = vmatprep.subr.bf16.mxu1 (!%p148_p2), %v2825_v0  ;;  %v2828_v3 = vld [vmem:[%s3811_s2 + $0x48] sm:$0xff] (!%p148_p2)   ;;  %v2830_v5 = vld [vmem:[%s3811_s2 + $0x50] sm:$0xff] (!%p148_p2)  }
   0x7   : > { %2640 = vmatprep.subr.bf16.mxu0 (!%p148_p2), %v2826_v1  ;;  %2561 = vmatpush3.bf16.msra.mxu1 (!%p148_p2), %v2825_v0  ;;  %v2831_v6 = vld [vmem:[%s3811_s2 + $0x38] sm:$0xff] (!%p148_p2)   ;;  %v2836_v10 = vld [vmem:[%s3811_s2] sm:$0xff] (!%p148_p2)   ;;  %v2846_v18 = vld [vmem:[%s3811_s2 + $0x8] sm:$0xff] (!%p148_p2)  }
   0x8   : > { %2641 = vmatpush3.bf16.msra.mxu0 (!%p148_p2), %v2826_v1  ;;  %2562 = vmatprep.subr.bf16.mxu1 (!%p148_p2), %v2827_v2  ;;  %v2832_v7 = vld [vmem:[%s3811_s2 + $0x58] sm:$0xff] (!%p148_p2)   ;;  %v2838_v11 = vld [vmem:[%s3811_s2 + $0x60] sm:$0xff] (!%p148_p2)   ;;  %v2848_v20 = vld [vmem:[%s3811_s2 + $0x68] sm:$0xff] (!%p148_p2)  }
   0x9   : > { %2642 = vmatprep.subr.bf16.mxu0 (!%p148_p2), %v2828_v3  ;;  %v2856_v25 = vld [vmem:[%s3811_s2 + $0x10] sm:$0xff] (!%p148_p2)   ;;  %v2866_v32 = vld [vmem:[%s3811_s2 + $0x18] sm:$0xff] (!%p148_p2)  }
   0xa   : > { %v2858_v27 = vld [vmem:[%s3811_s2 + $0x70] sm:$0xff] (!%p148_p2)   ;;  %v2868_v33 = vld [vmem:[%s3811_s2 + $0x78] sm:$0xff] (!%p148_p2)  }
   0xb   : > { %2563 = vmatpush3.bf16.msra.mxu1 (!%p148_p2), %v2827_v2 }
   0xc   : > { %2643 = vmatpush3.bf16.msra.mxu0 (!%p148_p2), %v2828_v3  ;;  %2564 = vmatprep.subr.bf16.mxu1 (!%p148_p2), %v2829_v4 }
   0xd   : > { %s3828_s13 = smov (!%p176_p3, %s2236_s13), 1  ;;  %2644 = vmatprep.subr.bf16.mxu0 %v2830_v5 }
   0xe   : > { %s2816_s24 = smul.u32 136, %s3828_s13  ;;  %s2447_s28 = sshll.u32 %s3828_s13, 7 }
   0xf   : > { %2565 = vmatpush3.bf16.msra.mxu1 %v2829_v4  ;;  %s3674_s30 = scalar_lea.vmem %s3812_s3, %s2447_s28 }
  0x10   : > { %s2970_s4 = scalar_lea.vmem %s3810_s1, %s2816_s24  ;;  %s2975_s7 = scalar_lea.vmem %s3809_s0, %s2816_s24  ;;  %2645 = vmatpush3.bf16.msra.mxu0 %v2830_v5  ;;  %2566 = vmatprep.subr.bf16.mxu1 %v2831_v6 }
  0x11   : > { %v2833_v8 = vld [vmem:[%s2970_s4] sm:$0xff]   ;;  %v2834_v9 = vld [vmem:[%s2975_s7 + $0x8] sm:$0xff]   ;;  %2646 = vmatprep.subr.bf16.mxu0 %v2832_v7  ;;  %v2837_v13 = vld [vmem:[%s2975_s7 + $0x10] sm:$0xff]  }
  0x12   : > { %2568 = vmatprep.mubr.msk.bf16.mxu1 %vm377_vm0, %v2833_v8  ;;  %2648 = vmatprep.mubr.msk.bf16.mxu0 %vm377_vm0, %v2834_v9  ;;  %v2835_v12 = vld [vmem:[%s2970_s4 + $0x8] sm:$0xff]   ;;  %v2839_v14 = vld [vmem:[%s2970_s4 + $0x10] sm:$0xff]   ;;  %v2840_v15 = vld [vmem:[%s2975_s7 + $0x18] sm:$0xff]  }
  0x13   : > { %2567 = vmatpush3.bf16.msra.mxu1 %v2831_v6  ;;  %v2841_v16 = vld [vmem:[%s2970_s4 + $0x18] sm:$0xff]   ;;  %v2842_v17 = vld [vmem:[%s2975_s7 + $0x20] sm:$0xff]   ;;  %v2844_v21 = vld [vmem:[%s2975_s7 + $0x28] sm:$0xff]  }
  0x14   : > { %2647 = vmatpush3.bf16.msra.mxu0 %v2832_v7  ;;  %2600 = vmatprep.subr.bf16.mxu1 %v2836_v10  ;;  %v2843_v19 = vld [vmem:[%s2970_s4 + $0x20] sm:$0xff]   ;;  %v2845_v22 = vld [vmem:[%s2970_s4 + $0x28] sm:$0xff]   ;;  %v2847_v23 = vld [vmem:[%s2975_s7 + $0x30] sm:$0xff]  }
  0x15   : > { %2680 = vmatprep.subr.bf16.mxu0 %v2838_v11  ;;  %v2849_v24 = vld [vmem:[%s2970_s4 + $0x30] sm:$0xff]   ;;  %v2850_v26 = vld [vmem:[%s2975_s7 + $0x38] sm:$0xff]   ;;  %v2852_v29 = vld [vmem:[%s2975_s7 + $0x40] sm:$0xff]  }
  0x16   : > { %2569 = vmatmul.mubr.msk.bf16.vlgmr.msra.gmra.mrb[0].mxu1 %vm377_vm0, %v2835_v12  ;;  %v2851_v28 = vld [vmem:[%s2970_s4 + $0x38] sm:$0xff]   ;;  %v2853_v30 = vld [vmem:[%s2970_s4 + $0x40] sm:$0xff]   ;;  %v2854_v31 = vld [vmem:[%s2975_s7 + $0x48] sm:$0xff]  }
  0x17   : > { %2649 = vmatmul.mubr.msk.bf16.vlgmr.msra.gmra.mrb[0].mxu0 %vm377_vm0, %v2837_v13  ;;  %2601 = vmatpush3.bf16.msra.mxu1 %v2836_v10  ;;  %v2855_v34 = vld [vmem:[%s2970_s4 + $0x48] sm:$0xff]   ;;  %v2857_v35 = vld [vmem:[%s2975_s7 + $0x50] sm:$0xff]   ;;  %v2860_v37 = vld [vmem:[%s2975_s7 + $0x58] sm:$0xff]  }
  0x18   : > { %2681 = vmatpush3.bf16.msra.mxu0 %v2838_v11  ;;  %2572 = vmatprep.mubr.msk.bf16.mxu1 %vm377_vm0, %v2839_v14  ;;  %v2859_v36 = vld [vmem:[%s2970_s4 + $0x50] sm:$0xff]   ;;  %v2861_v38 = vld [vmem:[%s2970_s4 + $0x58] sm:$0xff]   ;;  %v2862_v39 = vld [vmem:[%s2975_s7 + $0x60] sm:$0xff]  }
  0x19   : > { %2652 = vmatprep.mubr.msk.bf16.mxu0 %vm377_vm0, %v2840_v15  ;;  %2602 = vmatprep.subr.bf16.mxu1 %v2846_v18  ;;  %v2863_v40 = vld [vmem:[%s2970_s4 + $0x60] sm:$0xff]   ;;  %v2864_v41 = vld [vmem:[%s2975_s7 + $0x68] sm:$0xff]   ;;  %v2867_v43 = vld [vmem:[%s2975_s7 + $0x70] sm:$0xff]  }
  0x1a   : > { %2682 = vmatprep.subr.bf16.mxu0 %v2848_v20  ;;  %v2865_v42 = vld [vmem:[%s2970_s4 + $0x68] sm:$0xff]   ;;  %v2869_v44 = vld [vmem:[%s2970_s4 + $0x70] sm:$0xff]   ;;  %v2870_v45 = vld [vmem:[%s2975_s7 + $0x78] sm:$0xff]  }
  0x1b   : > { %2603 = vmatpush3.bf16.msra.mxu1 %v2846_v18  ;;  %v2871_v46 = vld [vmem:[%s2970_s4 + $0x78] sm:$0xff]   ;;  %v2872_v47 = vld [vmem:[%s2975_s7 + $0x80] sm:$0xff]   ;;  %v2874_v49 = vld [vmem:[%s2970_s4 + $0x8] sm:$0xff]  }
  0x1c   : > { %2683 = vmatpush3.bf16.msra.mxu0 %v2848_v20  ;;  %2604 = vmatprep.subr.bf16.mxu1 %v2856_v25  ;;  %v2873_v48 = vld [vmem:[%s2975_s7] sm:$0xff]   ;;  %v2875_v50 = vld [vmem:[%s2975_s7 + $0x8] sm:$0xff]   ;;  %v2876_v51 = vld [vmem:[%s2970_s4 + $0x10] sm:$0xff]  }
  0x1d   : > { %2684 = vmatprep.subr.bf16.mxu0 %v2858_v27  ;;  %v2877_v52 = vld [vmem:[%s2975_s7 + $0x10] sm:$0xff]   ;;  %v2878_v53 = vld [vmem:[%s2970_s4 + $0x18] sm:$0xff]   ;;  %v2880_v55 = vld [vmem:[%s2970_s4 + $0x20] sm:$0xff]  }
  0x1e   : > { %2573 = vmatmul.mubr.msk.bf16.gmra.mrb[4].mxu1 %vm377_vm0, %v2841_v16  ;;  %v2879_v54 = vld [vmem:[%s2975_s7 + $0x18] sm:$0xff]   ;;  %v2881_v56 = vld [vmem:[%s2975_s7 + $0x20] sm:$0xff]   ;;  %v2882_v57 = vld [vmem:[%s2970_s4 + $0x28] sm:$0xff]  }
  0x1f   : > { %2653 = vmatmul.mubr.msk.bf16.gmra.mrb[4].mxu0 %vm377_vm0, %v2842_v17  ;;  %2576 = vmatprep.mubr.msk.bf16.mxu1 %vm377_vm0, %v2843_v19  ;;  %v2883_v58 = vld [vmem:[%s2975_s7 + $0x28] sm:$0xff]   ;;  %v2884_v59 = vld [vmem:[%s2970_s4 + $0x30] sm:$0xff]   ;;  %v2886_v61 = vld [vmem:[%s2970_s4 + $0x38] sm:$0xff]  }
  0x20   : > { %2656 = vmatprep.mubr.msk.bf16.mxu0 %vm377_vm0, %v2844_v21  ;;  %2605 = vmatpush3.bf16.msra.mxu1 %v2856_v25  ;;  %v2885_v60 = vld [vmem:[%s2975_s7 + $0x30] sm:$0xff]   ;;  %v2887_v62 = vld [vmem:[%s2975_s7 + $0x38] sm:$0xff]   ;;  %v2888_v63 = vld [vmem:[%s2970_s4 + $0x40] sm:$0xff]  }
  0x21   : > { %2685 = vmatpush3.bf16.msra.mxu0 %v2858_v27  ;;  %2606 = vmatprep.subr.bf16.mxu1 %v2866_v32  ;;  %v2889_v0 = vld [vmem:[%s2975_s7 + $0x40] sm:$0xff]   ;;  %v2890_v1 = vld [vmem:[%s2970_s4 + $0x48] sm:$0xff]   ;;  %v2892_v3 = vld [vmem:[%s2970_s4 + $0x50] sm:$0xff]  }
  0x22   : > { %2686 = vmatprep.subr.bf16.mxu0 %v2868_v33  ;;  %v2891_v2 = vld [vmem:[%s2975_s7 + $0x48] sm:$0xff]   ;;  %v2893_v4 = vld [vmem:[%s2975_s7 + $0x50] sm:$0xff]   ;;  %v2894_v5 = vld [vmem:[%s2970_s4 + $0x58] sm:$0xff]  }
  0x23   : > { %v2895_v6 = vld [vmem:[%s2975_s7 + $0x58] sm:$0xff]   ;;  %v2896_v7 = vld [vmem:[%s2970_s4 + $0x60] sm:$0xff]   ;;  %v2898_v9 = vld [vmem:[%s2970_s4 + $0x68] sm:$0xff]  }
  0x24   : > { %2607 = vmatpush3.bf16.msra.mxu1 %v2866_v32  ;;  %v2897_v8 = vld [vmem:[%s2975_s7 + $0x60] sm:$0xff]   ;;  %v2899_v10 = vld [vmem:[%s2975_s7 + $0x68] sm:$0xff]   ;;  %v2900_v11 = vld [vmem:[%s2970_s4 + $0x70] sm:$0xff]  }
  0x25   : > { %2687 = vmatpush3.bf16.msra.mxu0 %v2868_v33  ;;  %v2901_v12 = vld [vmem:[%s2975_s7 + $0x70] sm:$0xff]   ;;  %v2902_v13 = vld [vmem:[%s2970_s4 + $0x78] sm:$0xff]   ;;  %v2904_v15 = vld [vmem:[%s2970_s4 + $0x80] sm:$0xff]  }
  0x26   : > { %2577 = vmatmul.mubr.msk.bf16.gmra.mrb[8].mxu1 %vm377_vm0, %v2845_v22  ;;  %v2903_v14 = vld [vmem:[%s2975_s7 + $0x78] sm:$0xff]  }
  0x27   : > { %2657 = vmatmul.mubr.msk.bf16.gmra.mrb[8].mxu0 %vm377_vm0, %v2847_v23  ;;  %2580 = vmatprep.mubr.msk.bf16.mxu1 %vm377_vm0, %v2849_v24 }
  0x28   : > { %2660 = vmatprep.mubr.msk.bf16.mxu0 %vm377_vm0, %v2850_v26 }
  0x2e   : > { %2581 = vmatmul.mubr.msk.bf16.gmra.mrb[12].mxu1 %vm377_vm0, %v2851_v28 }
  0x2f   : > { %2661 = vmatmul.mubr.msk.bf16.gmra.mrb[12].mxu0 %vm377_vm0, %v2852_v29  ;;  %2584 = vmatprep.mubr.msk.bf16.mxu1 %vm377_vm0, %v2853_v30 }
  0x30   : > { %2664 = vmatprep.mubr.msk.bf16.mxu0 %vm377_vm0, %v2854_v31 }
  0x36   : > { %2585 = vmatmul.mubr.msk.bf16.gmra.mrb[16].mxu1 %vm377_vm0, %v2855_v34 }
  0x37   : > { %2665 = vmatmul.mubr.msk.bf16.gmra.mrb[16].mxu0 %vm377_vm0, %v2857_v35  ;;  %2588 = vmatprep.mubr.msk.bf16.mxu1 %vm377_vm0, %v2859_v36 }
  0x38   : > { %2668 = vmatprep.mubr.msk.bf16.mxu0 %vm377_vm0, %v2860_v37 }
  0x3e   : > { %2589 = vmatmul.mubr.msk.bf16.gmra.mrb[20].mxu1 %vm377_vm0, %v2861_v38 }
  0x3f   : > { %2669 = vmatmul.mubr.msk.bf16.gmra.mrb[20].mxu0 %vm377_vm0, %v2862_v39  ;;  %2592 = vmatprep.mubr.msk.bf16.mxu1 %vm377_vm0, %v2863_v40 }
  0x40   : > { %2672 = vmatprep.mubr.msk.bf16.mxu0 %vm377_vm0, %v2864_v41 }
  0x46   : > { %2593 = vmatmul.mubr.msk.bf16.gmra.mrb[24].mxu1 %vm377_vm0, %v2865_v42 }
  0x47   : > { %2673 = vmatmul.mubr.msk.bf16.gmra.mrb[24].mxu0 %vm377_vm0, %v2867_v43  ;;  %2596 = vmatprep.mubr.msk.bf16.mxu1 %vm377_vm0, %v2869_v44 }
  0x48   : > { %2676 = vmatprep.mubr.msk.bf16.mxu0 %vm377_vm0, %v2870_v45 }
  0x4e   : > { %2597 = vmatmul.mubr.msk.bf16.gmra.mrb[28].mxu1 %vm377_vm0, %v2871_v46 }
  0x4f   : > { %2677 = vmatmul.mubr.msk.bf16.gmra.mrb[28].mxu0 %vm377_vm0, %v2872_v47  ;;  %2608 = vmatprep.mubr.msk.bf16.mxu1 %vm377_vm0, %v2873_v48 }
  0x50   : > { %2688 = vmatprep.mubr.msk.bf16.mxu0 %vm377_vm0, %v2874_v49 }
  0x56   : > { %2609 = vmatmul.mubr.msk.bf16.vlgmr.msra.gmra.mrb[0].mxu1 %vm377_vm0, %v2875_v50 }
  0x57   : > { %2689 = vmatmul.mubr.msk.bf16.vlgmr.msra.gmra.mrb[0].mxu0 %vm377_vm0, %v2876_v51  ;;  %2612 = vmatprep.mubr.msk.bf16.mxu1 %vm377_vm0, %v2877_v52 }
  0x58   : > { %2692 = vmatprep.mubr.msk.bf16.mxu0 %vm377_vm0, %v2878_v53 }
  0x5e   : > { %2613 = vmatmul.mubr.msk.bf16.gmra.mrb[4].mxu1 %vm377_vm0, %v2879_v54 }
  0x5f   : > { %2693 = vmatmul.mubr.msk.bf16.gmra.mrb[4].mxu0 %vm377_vm0, %v2880_v55  ;;  %2616 = vmatprep.mubr.msk.bf16.mxu1 %vm377_vm0, %v2881_v56 }
  0x60   : > { %2696 = vmatprep.mubr.msk.bf16.mxu0 %vm377_vm0, %v2882_v57 }
  0x66   : > { %2617 = vmatmul.mubr.msk.bf16.gmra.mrb[8].mxu1 %vm377_vm0, %v2883_v58 }
  0x67   : > { %2697 = vmatmul.mubr.msk.bf16.gmra.mrb[8].mxu0 %vm377_vm0, %v2884_v59  ;;  %2620 = vmatprep.mubr.msk.bf16.mxu1 %vm377_vm0, %v2885_v60 }
  0x68   : > { %2700 = vmatprep.mubr.msk.bf16.mxu0 %vm377_vm0, %v2886_v61 }
  0x6e   : > { %2621 = vmatmul.mubr.msk.bf16.gmra.mrb[12].mxu1 %vm377_vm0, %v2887_v62 }
  0x6f   : > { %2701 = vmatmul.mubr.msk.bf16.gmra.mrb[12].mxu0 %vm377_vm0, %v2888_v63  ;;  %2624 = vmatprep.mubr.msk.bf16.mxu1 %vm377_vm0, %v2889_v0 }
  0x70   : > { %2704 = vmatprep.mubr.msk.bf16.mxu0 %vm377_vm0, %v2890_v1 }
  0x76   : > { %2625 = vmatmul.mubr.msk.bf16.gmra.mrb[16].mxu1 %vm377_vm0, %v2891_v2 }
  0x77   : > { %2705 = vmatmul.mubr.msk.bf16.gmra.mrb[16].mxu0 %vm377_vm0, %v2892_v3  ;;  %2628 = vmatprep.mubr.msk.bf16.mxu1 %vm377_vm0, %v2893_v4 }
  0x78   : > { %2708 = vmatprep.mubr.msk.bf16.mxu0 %vm377_vm0, %v2894_v5 }
  0x7e   : > { %2629 = vmatmul.mubr.msk.bf16.gmra.mrb[20].mxu1 %vm377_vm0, %v2895_v6 }
  0x7f   : > { %2709 = vmatmul.mubr.msk.bf16.gmra.mrb[20].mxu0 %vm377_vm0, %v2896_v7  ;;  %2632 = vmatprep.mubr.msk.bf16.mxu1 %vm377_vm0, %v2897_v8 }
  0x80   : > { %2712 = vmatprep.mubr.msk.bf16.mxu0 %vm377_vm0, %v2898_v9 }
  0x86   : > { %2633 = vmatmul.mubr.msk.bf16.gmra.mrb[24].mxu1 %vm377_vm0, %v2899_v10 }
  0x87   : > { %2713 = vmatmul.mubr.msk.bf16.gmra.mrb[24].mxu0 %vm377_vm0, %v2900_v11  ;;  %2636 = vmatprep.mubr.msk.bf16.mxu1 %vm377_vm0, %v2901_v12 }
  0x88   : > { %2716 = vmatprep.mubr.msk.bf16.mxu0 %vm377_vm0, %v2902_v13 }
  0x8e   : > { %2637 = vmatmul.mubr.msk.bf16.gmra.mrb[28].mxu1 %vm377_vm0, %v2903_v14 }
  0x8f   : > { %2717 = vmatmul.mubr.msk.bf16.gmra.mrb[28].mxu0 %vm377_vm0, %v2904_v15 }
 0x129   : > { %v2610_v16 = vpop.f32.mrb[0].mxu1 }
 0x12a   : > { %v2690_v17 = vpop.f32.mrb[0].mxu0  ;;  %v773_v18 = vpop.f32.mrb[1].mxu1 }
 0x12b   : > { %v3132_v19 = vadd.f32 %v2690_v17, %v2610_v16  ;;  %v1513_v20 = vpop.f32.mrb[1].mxu0  ;;  %v2611_v21 = vpop.f32.mrb[2].mxu1 }
 0x12c   : > { %v3134_v22 = vadd.f32 %v1513_v20, %v773_v18  ;;  %v2691_v23 = vpop.f32.mrb[2].mxu0  ;;  %v776_v24 = vpop.f32.mrb[3].mxu1 }
 0x12d   : > { %v3136_v25 = vadd.f32 %v2691_v23, %v2611_v21  ;;  %v1516_v26 = vpop.f32.mrb[3].mxu0  ;;  %v1676_v32 = vsel %vm1672_vm1, %v3132_v19, 0.0 }
 0x12e   : > { %v3138_v27 = vadd.f32 %v1516_v26, %v776_v24  ;;  %v1673_v28 = vsel %vm1672_vm1, %v3134_v22, 0.0 }
 0x12f   : > { %v1678_v39 = vsel %vm1672_vm1, %v3136_v25, 0.0 }
 0x130   : > { %v1674_v29 = vsel %vm1672_vm1, %v3138_v27, 0.0 }
 0x131   : > { %v1675_v30 = vadd.f32 %v1674_v29, %v1673_v28  ;;  %v2614_v31 = vpop.f32.mrb[4].mxu1 }
 0x132   : > { %v2694_v33 = vpop.f32.mrb[4].mxu0  ;;  %v789_v34 = vpop.f32.mrb[5].mxu1 }
 0x133   : > { %v1677_v35 = vadd.f32 %v1676_v32, %v1675_v30  ;;  %v3146_v36 = vadd.f32 %v2694_v33, %v2614_v31  ;;  %v1529_v37 = vpop.f32.mrb[5].mxu0  ;;  %v2615_v38 = vpop.f32.mrb[6].mxu1 }
 0x134   : > { %v3150_v40 = vadd.f32 %v1529_v37, %v789_v34  ;;  %v2695_v41 = vpop.f32.mrb[6].mxu0  ;;  %v792_v42 = vpop.f32.mrb[7].mxu1 }
 0x135   : > { %v1679_v43 = vadd.f32 %v1678_v39, %v1677_v35  ;;  %v3152_v44 = vadd.f32 %v2695_v41, %v2615_v38  ;;  %v1532_v45 = vpop.f32.mrb[7].mxu0  ;;  %v1684_v52 = vsel %vm1672_vm1, %v3146_v36, 0.0 }
 0x136   : > { %v1680_v46 = vsel %vm1672_vm1, %v3150_v40, 0.0  ;;  %v3156_v47 = vadd.f32 %v1532_v45, %v792_v42 }
 0x137   : > { %v1681_v48 = vadd.f32 %v1680_v46, %v1679_v43  ;;  %v1686_v59 = vsel %vm1672_vm1, %v3152_v44, 0.0 }
 0x138   : > { %v1682_v49 = vsel %vm1672_vm1, %v3156_v47, 0.0 }
 0x139   : > { %v1683_v50 = vadd.f32 %v1682_v49, %v1681_v48  ;;  %v2618_v51 = vpop.f32.mrb[8].mxu1 }
 0x13a   : > { %v2698_v53 = vpop.f32.mrb[8].mxu0  ;;  %v805_v54 = vpop.f32.mrb[9].mxu1 }
 0x13b   : > { %v1685_v55 = vadd.f32 %v1684_v52, %v1683_v50  ;;  %v3162_v56 = vadd.f32 %v2698_v53, %v2618_v51  ;;  %v1545_v57 = vpop.f32.mrb[9].mxu0  ;;  %v2619_v58 = vpop.f32.mrb[10].mxu1 }
 0x13c   : > { %v3166_v60 = vadd.f32 %v1545_v57, %v805_v54  ;;  %v2699_v61 = vpop.f32.mrb[10].mxu0  ;;  %v808_v62 = vpop.f32.mrb[11].mxu1 }
 0x13d   : > { %v1687_v63 = vadd.f32 %v1686_v59, %v1685_v55  ;;  %v3168_v0 = vadd.f32 %v2699_v61, %v2619_v58  ;;  %v1548_v1 = vpop.f32.mrb[11].mxu0  ;;  %v1692_v8 = vsel %vm1672_vm1, %v3162_v56, 0.0 }
 0x13e   : > { %v1688_v2 = vsel %vm1672_vm1, %v3166_v60, 0.0  ;;  %v3172_v3 = vadd.f32 %v1548_v1, %v808_v62 }
 0x13f   : > { %v1689_v4 = vadd.f32 %v1688_v2, %v1687_v63  ;;  %v1694_v15 = vsel %vm1672_vm1, %v3168_v0, 0.0 }
 0x140   : > { %v1690_v5 = vsel %vm1672_vm1, %v3172_v3, 0.0 }
 0x141   : > { %v1691_v6 = vadd.f32 %v1690_v5, %v1689_v4  ;;  %v2622_v7 = vpop.f32.mrb[12].mxu1 }
 0x142   : > { %v2702_v9 = vpop.f32.mrb[12].mxu0  ;;  %v821_v10 = vpop.f32.mrb[13].mxu1 }
 0x143   : > { %v1693_v11 = vadd.f32 %v1692_v8, %v1691_v6  ;;  %v3178_v12 = vadd.f32 %v2702_v9, %v2622_v7  ;;  %v1561_v13 = vpop.f32.mrb[13].mxu0  ;;  %v2623_v14 = vpop.f32.mrb[14].mxu1 }
 0x144   : > { %v3182_v16 = vadd.f32 %v1561_v13, %v821_v10  ;;  %v2703_v17 = vpop.f32.mrb[14].mxu0  ;;  %v824_v18 = vpop.f32.mrb[15].mxu1 }
 0x145   : > { %v1695_v20 = vadd.f32 %v1694_v15, %v1693_v11  ;;  %v3184_v21 = vadd.f32 %v2703_v17, %v2623_v14  ;;  %v1564_v23 = vpop.f32.mrb[15].mxu0  ;;  %v1700_v32 = vsel %vm1672_vm1, %v3178_v12, 0.0 }
 0x146   : > { %v1696_v24 = vsel %vm1672_vm1, %v3182_v16, 0.0  ;;  %v3188_v26 = vadd.f32 %v1564_v23, %v824_v18 }
 0x147   : > { %v1697_v28 = vadd.f32 %v1696_v24, %v1695_v20  ;;  %v1702_v41 = vsel %vm1672_vm1, %v3184_v21, 0.0 }
 0x148   : > { %v1698_v29 = vsel %vm1672_vm1, %v3188_v26, 0.0 }
 0x149   : > { %v1699_v30 = vadd.f32 %v1698_v29, %v1697_v28  ;;  %v2626_v31 = vpop.f32.mrb[16].mxu1 }
 0x14a   : > { %v2706_v33 = vpop.f32.mrb[16].mxu0  ;;  %v837_v34 = vpop.f32.mrb[17].mxu1 }
 0x14b   : > { %v1701_v35 = vadd.f32 %v1700_v32, %v1699_v30  ;;  %v3194_v37 = vadd.f32 %v2706_v33, %v2626_v31  ;;  %v1577_v38 = vpop.f32.mrb[17].mxu0  ;;  %v2627_v39 = vpop.f32.mrb[18].mxu1 }
 0x14c   : > { %v3198_v42 = vadd.f32 %v1577_v38, %v837_v34  ;;  %v2707_v43 = vpop.f32.mrb[18].mxu0  ;;  %v840_v45 = vpop.f32.mrb[19].mxu1 }
 0x14d   : > { %v1703_v46 = vadd.f32 %v1702_v41, %v1701_v35  ;;  %v3200_v48 = vadd.f32 %v2707_v43, %v2627_v39  ;;  %v1580_v49 = vpop.f32.mrb[19].mxu0  ;;  %v1708_v57 = vsel %vm1672_vm1, %v3194_v37, 0.0 }
 0x14e   : > { %v1704_v50 = vsel %vm1672_vm1, %v3198_v42, 0.0  ;;  %v3204_v51 = vadd.f32 %v1580_v49, %v840_v45 }
 0x14f   : > { %v1705_v52 = vadd.f32 %v1704_v50, %v1703_v46  ;;  %v1710_v2 = vsel %vm1672_vm1, %v3200_v48, 0.0 }
 0x150   : > { %v1706_v53 = vsel %vm1672_vm1, %v3204_v51, 0.0 }
 0x151   : > { %v1707_v54 = vadd.f32 %v1706_v53, %v1705_v52  ;;  %v2630_v55 = vpop.f32.mrb[20].mxu1 }
 0x152   : > { %v2710_v58 = vpop.f32.mrb[20].mxu0  ;;  %v853_v59 = vpop.f32.mrb[21].mxu1 }
 0x153   : > { %v1709_v61 = vadd.f32 %v1708_v57, %v1707_v54  ;;  %v3210_v62 = vadd.f32 %v2710_v58, %v2630_v55  ;;  %v1593_v63 = vpop.f32.mrb[21].mxu0  ;;  %v2631_v1 = vpop.f32.mrb[22].mxu1 }
 0x154   : > { %v3214_v4 = vadd.f32 %v1593_v63, %v853_v59  ;;  %v2711_v5 = vpop.f32.mrb[22].mxu0  ;;  %v856_v6 = vpop.f32.mrb[23].mxu1 }
 0x155   : > { %v1711_v7 = vadd.f32 %v1710_v2, %v1709_v61  ;;  %v3216_v8 = vadd.f32 %v2711_v5, %v2631_v1  ;;  %v1596_v9 = vpop.f32.mrb[23].mxu0  ;;  %v1716_v18 = vsel %vm1672_vm1, %v3210_v62, 0.0 }
 0x156   : > { %v1712_v10 = vsel %vm1672_vm1, %v3214_v4, 0.0  ;;  %v3220_v11 = vadd.f32 %v1596_v9, %v856_v6 }
 0x157   : > { %v1713_v13 = vadd.f32 %v1712_v10, %v1711_v7  ;;  %v1718_v31 = vsel %vm1672_vm1, %v3216_v8, 0.0 }
 0x158   : > { %v1714_v14 = vsel %vm1672_vm1, %v3220_v11, 0.0 }
 0x159   : > { %v1715_v15 = vadd.f32 %v1714_v14, %v1713_v13  ;;  %v2634_v17 = vpop.f32.mrb[24].mxu1 }
 0x15a   : > { %v2714_v20 = vpop.f32.mrb[24].mxu0  ;;  %v869_v23 = vpop.f32.mrb[25].mxu1 }
 0x15b   : > { %v1717_v24 = vadd.f32 %v1716_v18, %v1715_v15  ;;  %v2744_v28 = vadd.f32 %v2714_v20, %v2634_v17  ;;  %v1609_v29 = vpop.f32.mrb[25].mxu0  ;;  %v2635_v30 = vpop.f32.mrb[26].mxu1 }
 0x15c   : > { %v2745_v32 = vadd.f32 %v1609_v29, %v869_v23  ;;  %v2715_v33 = vpop.f32.mrb[26].mxu0  ;;  %v872_v34 = vpop.f32.mrb[27].mxu1 }
 0x15d   : > { %v1719_v35 = vadd.f32 %v1718_v31, %v1717_v24  ;;  %v2746_v38 = vadd.f32 %v2715_v33, %v2635_v30  ;;  %v1612_v39 = vpop.f32.mrb[27].mxu0  ;;  %v1724_v52 = vsel %vm1672_vm1, %v2744_v28, 0.0 }
 0x15e   : > { %v1720_v41 = vsel %vm1672_vm1, %v2745_v32, 0.0  ;;  %v2747_v43 = vadd.f32 %v1612_v39, %v872_v34 }
 0x15f   : > { %v1721_v45 = vadd.f32 %v1720_v41, %v1719_v35  ;;  %v1726_v61 = vsel %vm1672_vm1, %v2746_v38, 0.0 }
 0x160   : > { %v1722_v46 = vsel %vm1672_vm1, %v2747_v43, 0.0 }
 0x161   : > { %v1723_v49 = vadd.f32 %v1722_v46, %v1721_v45  ;;  %v2638_v50 = vpop.f32.mrb[28].mxu1 }
 0x162   : > { %v2718_v53 = vpop.f32.mrb[28].mxu0  ;;  %v885_v54 = vpop.f32.mrb[29].mxu1 }
 0x163   : > { %v1725_v55 = vadd.f32 %v1724_v52, %v1723_v49  ;;  %v2748_v57 = vadd.f32 %v2718_v53, %v2638_v50  ;;  %v1625_v58 = vpop.f32.mrb[29].mxu0  ;;  %v2639_v59 = vpop.f32.mrb[30].mxu1 }
 0x164   : > { %v2749_v63 = vadd.f32 %v1625_v58, %v885_v54  ;;  %v2719_v1 = vpop.f32.mrb[30].mxu0  ;;  %v888_v2 = vpop.f32.mrb[31].mxu1 }
 0x165   : > { %v1727_v5 = vadd.f32 %v1726_v61, %v1725_v55  ;;  %v2750_v6 = vadd.f32 %v2719_v1, %v2639_v59  ;;  %v1628_v7 = vpop.f32.mrb[31].mxu0  ;;  %v1732_v17 = vsel %vm1672_vm1, %v2748_v57, 0.0 }
 0x166   : > { %v1728_v9 = vsel %vm1672_vm1, %v2749_v63, 0.0  ;;  %v2751_v10 = vadd.f32 %v1628_v7, %v888_v2 }
 0x167   : > { %v1729_v13 = vadd.f32 %v1728_v9, %v1727_v5  ;;  %v1734_v20 = vsel %vm1672_vm1, %v2750_v6, 0.0 }
 0x168   : > { %v1730_v14 = vsel %vm1672_vm1, %v2751_v10, 0.0 }
 0x169   : > { %v1731_v15 = vadd.f32 %v1730_v14, %v1729_v13 }
 0x16b   : > { %v1733_v18 = vadd.f32 %v1732_v17, %v1731_v15 }
 0x16d   : > { %v1735_v23 = vadd.f32 %v1734_v20, %v1733_v18 }
 0x16f   : > { %v1736_v24 = vrot.slane %v1735_v23, 4 }
 0x171   : > { %v1737_v29 = vadd.f32 %v1736_v24, %v1735_v23 }
 0x173   : > { %v1738_v30 = vrot.slane %v1737_v29, 2 }
 0x175   : > { %v1739_v31 = vadd.f32 %v1738_v30, %v1737_v29 }
 0x177   : > { %v1740_v33 = vrot.slane %v1739_v31, 1 }
 0x179   : > { %v1741_v34 = vadd.f32 %v1740_v33, %v1739_v31 }
 0x17b   : > { %v1743_v35 = vmul.f32 0.00390625, %v1741_v34 }
 0x17d   : > { %v3237_v39 = vsub.f32 %v3172_v3, %v1743_v35  ;;  %v3240_v41 = vsub.f32 %v3168_v0, %v1743_v35  ;;  %v3243_v45 = vsub.f32 %v3182_v16, %v1743_v35  ;;  %v3246_v46 = vsub.f32 %v3188_v26, %v1743_v35 }
 0x17e   : > { %v3249_v49 = vsub.f32 %v3178_v12, %v1743_v35  ;;  %v3252_v50 = vsub.f32 %v3184_v21, %v1743_v35  ;;  %v3255_v52 = vsub.f32 %v3198_v42, %v1743_v35  ;;  %v3258_v3 = vsub.f32 %v3204_v51, %v1743_v35 }
 0x17f   : > { %v3261_v0 = vsub.f32 %v3194_v37, %v1743_v35  ;;  %v3264_v16 = vsub.f32 %v3200_v48, %v1743_v35  ;;  %v3267_v26 = vsub.f32 %v3214_v4, %v1743_v35  ;;  %v3270_v12 = vsub.f32 %v3220_v11, %v1743_v35 }
 0x180   : > { %v3273_v21 = vsub.f32 %v3210_v62, %v1743_v35  ;;  %v3276_v42 = vsub.f32 %v3216_v8, %v1743_v35  ;;  %v3278_v51 = vsub.f32 %v2745_v32, %v1743_v35  ;;  %v3280_v53 = vsub.f32 %v2747_v43, %v1743_v35 }
 0x181   : > { %v3282_v37 = vsub.f32 %v2744_v28, %v1743_v35  ;;  %v3284_v48 = vsub.f32 %v2746_v38, %v1743_v35  ;;  %v3286_v54 = vsub.f32 %v2749_v63, %v1743_v35  ;;  %v3288_v4 = vsub.f32 %v2751_v10, %v1743_v35 }
 0x182   : > { %v3290_v11 = vsub.f32 %v2748_v57, %v1743_v35  ;;  %v3292_v55 = vsub.f32 %v2750_v6, %v1743_v35  ;;  %v3295_v62 = vsub.f32 %v3134_v22, %v1743_v35  ;;  %v3298_v8 = vsub.f32 %v3138_v27, %v1743_v35 }
 0x183   : > { %v3301_v32 = vsub.f32 %v3132_v19, %v1743_v35  ;;  %v3304_v28 = vsub.f32 %v3136_v25, %v1743_v35  ;;  %v3311_v57 = vsub.f32 %v3150_v40, %v1743_v35  ;;  %v3316_v27 = vsub.f32 %v3156_v47, %v1743_v35 }
 0x184   : > { %v1776_v38 = vmul.f32 %v3295_v62, %v3295_v62  ;;  %v1777_v43 = vmul.f32 %v3298_v8, %v3298_v8  ;;  %v3323_v61 = vsub.f32 %v3146_v36, %v1743_v35  ;;  %v3329_v47 = vsub.f32 %v3152_v44, %v1743_v35 }
 0x185   : > { %v1778_v22 = vmul.f32 %v3301_v32, %v3301_v32  ;;  %v1779_v19 = vmul.f32 %v3304_v28, %v3304_v28  ;;  %v1780_v40 = vmul.f32 %v3311_v57, %v3311_v57  ;;  %v1781_v2 = vmul.f32 %v3316_v27, %v3316_v27 }
 0x186   : > { %v1808_v25 = vsel %vm1672_vm1, %v1776_v38, 0.0  ;;  %v1809_v58 = vsel %vm1672_vm1, %v1777_v43, 0.0  ;;  %v3335_v7 = vsub.f32 %v3166_v60, %v1743_v35  ;;  %v1782_v36 = vmul.f32 %v3323_v61, %v3323_v61 }
 0x187   : > { %v1810_v59 = vadd.f32 %v1809_v58, %v1808_v25  ;;  %v1811_v63 = vsel %vm1672_vm1, %v1778_v22, 0.0  ;;  %v1813_v5 = vsel %vm1672_vm1, %v1779_v19, 0.0  ;;  %v1815_v9 = vsel %vm1672_vm1, %v1780_v40, 0.0 }
 0x188   : > { %v1783_v13 = vmul.f32 %v3329_v47, %v3329_v47  ;;  %v1817_v44 = vsel %vm1672_vm1, %v1781_v2, 0.0  ;;  %v3344_v15 = vsub.f32 %v3162_v56, %v1743_v35  ;;  %v1784_v17 = vmul.f32 %v3335_v7, %v3335_v7 }
 0x189   : > { %v1812_v1 = vadd.f32 %v1811_v63, %v1810_v59  ;;  %v1819_v60 = vsel %vm1672_vm1, %v1782_v36, 0.0  ;;  %v1785_v20 = vmul.f32 %v3237_v39, %v3237_v39  ;;  %v1787_v56 = vmul.f32 %v3240_v41, %v3240_v41 }
 0x18a   : > { %v1821_v23 = vsel %vm1672_vm1, %v1783_v13, 0.0  ;;  %v1786_v29 = vmul.f32 %v3344_v15, %v3344_v15  ;;  %v1823_v30 = vsel %vm1672_vm1, %v1784_v17, 0.0  ;;  %v1788_v35 = vmul.f32 %v3243_v45, %v3243_v45 }
 0x18b   : > { %v1814_v6 = vadd.f32 %v1813_v5, %v1812_v1  ;;  %v1825_v33 = vsel %vm1672_vm1, %v1785_v20, 0.0  ;;  %v1789_v22 = vmul.f32 %v3246_v46, %v3246_v46  ;;  %v1829_v19 = vsel %vm1672_vm1, %v1787_v56, 0.0 }
 0x18c   : > { %v1827_v38 = vsel %vm1672_vm1, %v1786_v29, 0.0  ;;  %v1790_v58 = vmul.f32 %v3249_v49, %v3249_v49  ;;  %v1831_v59 = vsel %vm1672_vm1, %v1788_v35, 0.0  ;;  %v1791_v63 = vmul.f32 %v3252_v50, %v3252_v50 }
 0x18d   : > { %v1816_v10 = vadd.f32 %v1815_v9, %v1814_v6  ;;  %v1833_v1 = vsel %vm1672_vm1, %v1789_v22, 0.0  ;;  %v1792_v5 = vmul.f32 %v3255_v52, %v3255_v52  ;;  %v1793_v9 = vmul.f32 %v3258_v3, %v3258_v3 }
 0x18e   : > { %v1835_v6 = vsel %vm1672_vm1, %v1790_v58, 0.0 }
 0x18f   : > { %v1818_v14 = vadd.f32 %v1817_v44, %v1816_v10  ;;  %v1837_v10 = vsel %vm1672_vm1, %v1791_v63, 0.0  ;;  %v1794_v44 = vmul.f32 %v3261_v0, %v3261_v0 }
 0x191   : > { %v1820_v18 = vadd.f32 %v1819_v60, %v1818_v14  ;;  %v1839_v14 = vsel %vm1672_vm1, %v1792_v5, 0.0  ;;  %v1795_v60 = vmul.f32 %v3264_v16, %v3264_v16 }
 0x193   : > { %v1822_v24 = vadd.f32 %v1821_v23, %v1820_v18  ;;  %v1841_v18 = vsel %vm1672_vm1, %v1793_v9, 0.0  ;;  %v1796_v23 = vmul.f32 %v3267_v26, %v3267_v26 }
 0x195   : > { %v1824_v31 = vadd.f32 %v1823_v30, %v1822_v24  ;;  %v1843_v24 = vsel %vm1672_vm1, %v1794_v44, 0.0  ;;  %v1797_v30 = vmul.f32 %v3270_v12, %v3270_v12 }
 0x197   : > { %v1826_v34 = vadd.f32 %v1825_v33, %v1824_v31  ;;  %v1845_v31 = vsel %vm1672_vm1, %v1795_v60, 0.0  ;;  %v1798_v33 = vmul.f32 %v3273_v21, %v3273_v21 }
 0x199   : > { %v1828_v43 = vadd.f32 %v1827_v38, %v1826_v34  ;;  %v1847_v34 = vsel %vm1672_vm1, %v1796_v23, 0.0  ;;  %v1799_v38 = vmul.f32 %v3276_v42, %v3276_v42 }
 0x19b   : > { %v1830_v25 = vadd.f32 %v1829_v19, %v1828_v43  ;;  %v1849_v43 = vsel %vm1672_vm1, %v1797_v30, 0.0  ;;  %v1800_v19 = vmul.f32 %v3278_v51, %v3278_v51 }
 0x19d   : > { %v1832_v40 = vadd.f32 %v1831_v59, %v1830_v25  ;;  %v1851_v25 = vsel %vm1672_vm1, %v1798_v33, 0.0  ;;  %v1801_v59 = vmul.f32 %v3280_v53, %v3280_v53 }
 0x19f   : > { %v1834_v2 = vadd.f32 %v1833_v1, %v1832_v40  ;;  %v1853_v40 = vsel %vm1672_vm1, %v1799_v38, 0.0  ;;  %v1802_v1 = vmul.f32 %v3282_v37, %v3282_v37 }
 0x1a1   : > { %v1836_v36 = vadd.f32 %v1835_v6, %v1834_v2  ;;  %v1855_v2 = vsel %vm1672_vm1, %v1800_v19, 0.0  ;;  %v1803_v6 = vmul.f32 %v3284_v48, %v3284_v48 }
 0x1a3   : > { %v1838_v13 = vadd.f32 %v1837_v10, %v1836_v36  ;;  %v1857_v36 = vsel %vm1672_vm1, %v1801_v59, 0.0  ;;  %v1804_v10 = vmul.f32 %v3286_v54, %v3286_v54 }
 0x1a5   : > { %v1840_v17 = vadd.f32 %v1839_v14, %v1838_v13  ;;  %v1859_v13 = vsel %vm1672_vm1, %v1802_v1, 0.0  ;;  %v1805_v14 = vmul.f32 %v3288_v4, %v3288_v4 }
 0x1a7   : > { %v1842_v20 = vadd.f32 %v1841_v18, %v1840_v17  ;;  %v1861_v17 = vsel %vm1672_vm1, %v1803_v6, 0.0  ;;  %v1806_v18 = vmul.f32 %v3290_v11, %v3290_v11 }
 0x1a9   : > { %v1844_v29 = vadd.f32 %v1843_v24, %v1842_v20  ;;  %v1863_v20 = vsel %vm1672_vm1, %v1804_v10, 0.0  ;;  %v1807_v24 = vmul.f32 %v3292_v55, %v3292_v55 }
 0x1ab   : > { %v1846_v56 = vadd.f32 %v1845_v31, %v1844_v29  ;;  %v1865_v29 = vsel %vm1672_vm1, %v1805_v14, 0.0  ;;  %v1867_v31 = vsel %vm1672_vm1, %v1806_v18, 0.0  ;;  %v1869_v33 = vsel %vm1672_vm1, %v1807_v24, 0.0 }
 0x1ad   : > { %v1848_v35 = vadd.f32 %v1847_v34, %v1846_v56 }
 0x1af   : > { %v1850_v22 = vadd.f32 %v1849_v43, %v1848_v35 }
 0x1b1   : > { %v1852_v58 = vadd.f32 %v1851_v25, %v1850_v22 }
 0x1b3   : > { %v1854_v63 = vadd.f32 %v1853_v40, %v1852_v58 }
 0x1b5   : > { %v1856_v5 = vadd.f32 %v1855_v2, %v1854_v63 }
 0x1b7   : > { %v1858_v9 = vadd.f32 %v1857_v36, %v1856_v5 }
 0x1b9   : > { %v1860_v44 = vadd.f32 %v1859_v13, %v1858_v9 }
 0x1bb   : > { %v1862_v60 = vadd.f32 %v1861_v17, %v1860_v44 }
 0x1bd   : > { %v1864_v23 = vadd.f32 %v1863_v20, %v1862_v60 }
 0x1bf   : > { %v1866_v30 = vadd.f32 %v1865_v29, %v1864_v23 }
 0x1c1   : > { %v1868_v56 = vadd.f32 %v1867_v31, %v1866_v30 }
 0x1c3   : > { %v1870_v34 = vadd.f32 %v1869_v33, %v1868_v56 }
 0x1c5   : > { %v1871_v35 = vrot.slane %v1870_v34, 4 }
 0x1c7   : > { %v1872_v38 = vadd.f32 %v1871_v35, %v1870_v34 }
 0x1c9   : > { %v1873_v43 = vrot.slane %v1872_v38, 2 }
 0x1cb   : > { %v1874_v22 = vadd.f32 %v1873_v43, %v1872_v38 }
 0x1cd   : > { %v1875_v19 = vrot.slane %v1874_v22, 1 }
 0x1cf   : > { %v1876_v25 = vadd.f32 %v1875_v19, %v1874_v22 }
 0x1d1   : > { %v1877_v58 = vmul.f32 0.00390625, %v1876_v25 }
 0x1d3   : > { %v1878_v59 = vadd.f32 1e-05, %v1877_v58 }
 0x1d5   : > { %2905 = vrsqrt.f32 %v1878_v59 }
 0x1df   : > { %v2906_v40 = vpop.eup %2905 }
 0x1e0   : > { %v3421_v63 = vmul.f32 %v2906_v40, %v3258_v3  ;;  %v3424_v1 = vmul.f32 %v2906_v40, %v3261_v0  ;;  %v3427_v2 = vmul.f32 %v2906_v40, %v3264_v16  ;;  %v3430_v5 = vmul.f32 %v2906_v40, %v3267_v26 }
 0x1e1   : > { %v3433_v6 = vmul.f32 %v2906_v40, %v3270_v12  ;;  %v3436_v36 = vmul.f32 %v2906_v40, %v3273_v21  ;;  %v3439_v9 = vmul.f32 %v2906_v40, %v3276_v42  ;;  %v3442_v3 = vmul.f32 %v2906_v40, %v3278_v51 }
 0x1e2   : > { %v3445_v0 = vmul.f32 %v2906_v40, %v3280_v53  ;;  %v3448_v16 = vmul.f32 %v2906_v40, %v3282_v37  ;;  %v3451_v26 = vmul.f32 %v2906_v40, %v3284_v48  ;;  %v3454_v12 = vmul.f32 %v2906_v40, %v3286_v54 }
 0x1e3   : > { %v3457_v21 = vmul.f32 %v2906_v40, %v3288_v4  ;;  %v3460_v42 = vmul.f32 %v2906_v40, %v3290_v11  ;;  %v3463_v51 = vmul.f32 %v2906_v40, %v3292_v55  ;;  %v1880_v53 = vmul.f32 %v2906_v40, %v3295_v62 }
 0x1e4   : > { %v1881_v37 = vmul.f32 %v2906_v40, %v3298_v8  ;;  %v3468_v10 = vmul.f32 %v2906_v40, %v3301_v32  ;;  %v3471_v48 = vmul.f32 %v2906_v40, %v3304_v28  ;;  %v3474_v54 = vmul.f32 %v2906_v40, %v3311_v57 }
 0x1e5   : > { %v3477_v4 = vmul.f32 %v2906_v40, %v3316_v27  ;;  %v3480_v11 = vmul.f32 %v2906_v40, %v3323_v61  ;;  %v3483_v55 = vmul.f32 %v2906_v40, %v3329_v47  ;;  %v3486_v62 = vmul.f32 %v2906_v40, %v3335_v7 }
 0x1e6   : > { %v3489_v8 = vmul.f32 %v2906_v40, %v3237_v39  ;;  %v3492_v32 = vmul.f32 %v2906_v40, %v3344_v15  ;;  %v3495_v28 = vmul.f32 %v2906_v40, %v3240_v41  ;;  %v3498_v57 = vmul.f32 %v2906_v40, %v3243_v45 }
 0x1e7   : > { %v3501_v27 = vmul.f32 %v2906_v40, %v3246_v46  ;;  %v3504_v61 = vmul.f32 %v2906_v40, %v3249_v49  ;;  %v3507_v47 = vmul.f32 %v2906_v40, %v3252_v50  ;;  %v3510_v39 = vmul.f32 %v2906_v40, %v3255_v52 }
 0x1e8   : > { %vm1912_vm2 = vcmp.ge.f32.partialorder %v1880_v53, 0.0  ;;  %vm1913_vm3 = vcmp.ge.f32.partialorder %v1881_v37, 0.0  ;;  %vm1914_vm4 = vcmp.ge.f32.partialorder %v3468_v10, 0.0  ;;  %vm1915_vm5 = vcmp.ge.f32.partialorder %v3471_v48, 0.0 }
 0x1e9   : > { %vm1916_vm6 = vcmp.ge.f32.partialorder %v3474_v54, 0.0  ;;  %vm1917_vm7 = vcmp.ge.f32.partialorder %v3477_v4, 0.0  ;;  %vm1918_vm8 = vcmp.ge.f32.partialorder %v3480_v11, 0.0  ;;  %vm1919_vm9 = vcmp.ge.f32.partialorder %v3483_v55, 0.0 }
 0x1ea   : > { %vm1922_vm12 = vcmp.ge.f32.partialorder %v3492_v32, 0.0  ;;  %v1944_v41 = vmul.f32 0.2, %v1880_v53  ;;  %v1945_v45 = vmul.f32 0.2, %v1881_v37  ;;  %vm1927_vm1 = vcmp.ge.f32.partialorder %v3507_v47, 0.0 }
 0x1eb   : > { %v1946_v46 = vmul.f32 0.2, %v3468_v10  ;;  %v1947_v49 = vmul.f32 0.2, %v3471_v48  ;;  %v1948_v50 = vmul.f32 0.2, %v3474_v54 }
 0x1ec   : > { %v1949_v52 = vmul.f32 0.2, %v3477_v4  ;;  %vm1932_vm13 = vcmp.ge.f32.partialorder %v3430_v5, 0.0  ;;  %v1950_v7 = vmul.f32 0.2, %v3480_v11  ;;  %v3540_v44 = vsel %vm1912_vm2, %v1880_v53, %v1944_v41 }
 0x1ed   : > { %v1951_v15 = vmul.f32 0.2, %v3483_v55  ;;  %v1952_v13 = vmul.f32 0.2, %v3486_v62  ;;  %vm1936_vm15 = vcmp.ge.f32.partialorder %v3442_v3, 0.0  ;;  %vm1937_vm14 = vcmp.ge.f32.partialorder %v3445_v0, 0.0 }
 0x1ee   : > { %v1953_v14 = vmul.f32 0.2, %v3489_v8  ;;  %v1954_v17 = vmul.f32 0.2, %v3492_v32  ;;  %v1955_v60 = vmul.f32 0.2, %v3495_v28  ;;  %v3550_v18 = vsel %vm1913_vm3, %v1881_v37, %v1945_v45 }
 0x1ef   : > { %vm1939_vm0 = vcmp.ge.f32.partialorder %v3451_v26, 0.0  ;;  %vm1940_vm11 = vcmp.ge.f32.partialorder %v3454_v12, 0.0  ;;  %vm1941_vm10 = vcmp.ge.f32.partialorder %v3457_v21, 0.0  ;;  %v1956_v20 = vmul.f32 0.2, %v3498_v57 }
 0x1f0   : > { %v1957_v23 = vmul.f32 0.2, %v3501_v27  ;;  %v1958_v24 = vmul.f32 0.2, %v3504_v61  ;;  %v3562_v29 = vsel %vm1914_vm4, %v3468_v10, %v1946_v46  ;;  %vm1942_vm3 = vcmp.ge.f32.partialorder %v3460_v42, 0.0 }
 0x1f1   : > { %vm1943_vm2 = vcmp.ge.f32.partialorder %v3463_v51, 0.0  ;;  %v1959_v30 = vmul.f32 0.2, %v3507_v47  ;;  %v1960_v31 = vmul.f32 0.2, %v3510_v39  ;;  %v3572_v33 = vsel %vm1915_vm5, %v3471_v48, %v1947_v49 }
 0x1f2   : > { %v1961_v56 = vmul.f32 0.2, %v3421_v63  ;;  %v1962_v34 = vmul.f32 0.2, %v3424_v1  ;;  %v1963_v35 = vmul.f32 0.2, %v3427_v2  ;;  %v1980_v43 = vsel %vm1916_vm6, %v3474_v54, %v1948_v50 }
 0x1f3   : > { %v1964_v38 = vmul.f32 0.2, %v3430_v5  ;;  %v1965_v22 = vmul.f32 0.2, %v3433_v6  ;;  %v1966_v19 = vmul.f32 0.2, %v3436_v36  ;;  %v1981_v58 = vsel %vm1917_vm7, %v3477_v4, %v1949_v52 }
 0x1f4   : > { %v1967_v25 = vmul.f32 0.2, %v3439_v9  ;;  %vm2136_vm4 = vcmask 257024   ;;  %v1968_v59 = vmul.f32 0.2, %v3442_v3  ;;  %v1982_v37 = vsel %vm1918_vm8, %v3480_v11, %v1950_v7 }
 0x1f5   : > { %v1969_v40 = vmul.f32 0.2, %v3445_v0  ;;  %v1970_v53 = vmul.f32 0.2, %v3448_v16  ;;  %v1971_v10 = vmul.f32 0.2, %v3451_v26  ;;  %v1983_v4 = vsel %vm1919_vm9, %v3483_v55, %v1951_v15 }
 0x1f6   : > { %v1972_v48 = vmul.f32 0.2, %v3454_v12  ;;  %v1973_v54 = vmul.f32 0.2, %v3457_v21  ;;  %v1974_v41 = vmul.f32 0.2, %v3460_v42  ;;  %v1986_v49 = vsel %vm1922_vm12, %v3492_v32, %v1954_v17 }
 0x1f7   : > { %v1975_v45 = vmul.f32 0.2, %v3463_v51  ;;  %vm3813_vm5 = vcmp.ge.f32.partialorder %v3486_v62, 0.0  ;;  %vm3814_vm6 = vcmp.ge.f32.partialorder %v3489_v8, 0.0  ;;  %vm3815_vm7 = vcmp.ge.f32.partialorder %v3495_v28, 0.0 }
 0x1f8   : > { %v1984_v46 = vsel %vm3813_vm5, %v3486_v62, %v1952_v13  ;;  %v1985_v11 = vsel %vm3814_vm6, %v3489_v8, %v1953_v14  ;;  %v1987_v55 = vsel %vm3815_vm7, %v3495_v28, %v1955_v60  ;;  %vm3816_vm8 = vcmp.ge.f32.partialorder %v3498_v57, 0.0 }
 0x1f9   : > { %v1988_v50 = vsel %vm3816_vm8, %v3498_v57, %v1956_v20  ;;  %vm3817_vm9 = vcmp.ge.f32.partialorder %v3501_v27, 0.0  ;;  %vm3818_vm5 = vcmp.ge.f32.partialorder %v3504_v61, 0.0  ;;  %v1991_v32 = vsel %vm1927_vm1, %v3507_v47, %v1959_v30 }
 0x1fa   : > { %v1989_v62 = vsel %vm3817_vm9, %v3501_v27, %v1957_v23  ;;  %v1990_v8 = vsel %vm3818_vm5, %v3504_v61, %v1958_v24  ;;  %vm3819_vm12 = vcmp.ge.f32.partialorder %v3510_v39, 0.0  ;;  %vm3820_vm6 = vcmp.ge.f32.partialorder %v3421_v63, 0.0 }
 0x1fb   : > { %v1992_v28 = vsel %vm3819_vm12, %v3510_v39, %v1960_v31  ;;  %v1993_v57 = vsel %vm3820_vm6, %v3421_v63, %v1961_v56  ;;  %vm3821_vm7 = vcmp.ge.f32.partialorder %v3424_v1, 0.0  ;;  %vm3822_vm8 = vcmp.ge.f32.partialorder %v3427_v2, 0.0 }
 0x1fc   : > { %v3634_v27 = vsel %vm3821_vm7, %v3424_v1, %v1962_v34  ;;  %v3639_v61 = vsel %vm3822_vm8, %v3427_v2, %v1963_v35  ;;  %v3644_v47 = vsel %vm1932_vm13, %v3430_v5, %v1964_v38  ;;  %vm3823_vm1 = vcmp.ge.f32.partialorder %v3433_v6, 0.0 }
 0x1fd   : > { %v3649_v39 = vsel %vm3823_vm1, %v3433_v6, %v1965_v22  ;;  %vm3824_vm9 = vcmp.ge.f32.partialorder %v3436_v36, 0.0  ;;  %vm3825_vm5 = vcmp.ge.f32.partialorder %v3439_v9, 0.0  ;;  %v3664_v2 = vsel %vm1936_vm15, %v3442_v3, %v1968_v59 }
 0x1fe   : > { %v3654_v63 = vsel %vm3824_vm9, %v3436_v36, %v1966_v19  ;;  %v3659_v1 = vsel %vm3825_vm5, %v3439_v9, %v1967_v25  ;;  %v3669_v5 = vsel %vm1937_vm14, %v3445_v0, %v1969_v40  ;;  %vm3826_vm13 = vcmp.ge.f32.partialorder %v3448_v16, 0.0 }
 0x1ff   : > { %v3679_v6 = vsel %vm3826_vm13, %v3448_v16, %v1970_v53  ;;  %v3684_v36 = vsel %vm1939_vm0, %v3451_v26, %v1971_v10  ;;  %v3689_v9 = vsel %vm1940_vm11, %v3454_v12, %v1972_v48  ;;  %v3694_v3 = vsel %vm1941_vm10, %v3457_v21, %v1973_v54 }
 0x200   : > { %v3699_v0 = vsel %vm1942_vm3, %v3460_v42, %v1974_v41  ;;  %v3704_v16 = vsel %vm1943_vm2, %v3463_v51, %v1975_v45  ;;  %v2448_v26 = vpack.c.bf16 %v3540_v44, %v3540_v44  ;;  %v2449_v12 = vpack.c.bf16 %v3550_v18, %v3550_v18 }
 0x201   : > { %v2450_v21 = vpack.c.bf16 %v3562_v29, %v3562_v29  ;;  %v2451_v42 = vpack.c.bf16 %v3572_v33, %v3572_v33  ;;  %v2452_v52 = vpack.c.bf16 %v1980_v43, %v1980_v43  ;;  %v2453_v7 = vpack.c.bf16 %v1981_v58, %v1981_v58 }
 0x202   : > { %v2454_v51 = vpack.c.bf16 %v1982_v37, %v1982_v37  ;;  %v2455_v15 = vpack.c.bf16 %v1983_v4, %v1983_v4  ;;  %v2456_v13 = vpack.c.bf16 %v1984_v46, %v1984_v46  ;;  %v2457_v44 = vpack.c.bf16 %v1985_v11, %v1985_v11  ;;  %2137 = vst.msk [vmem:[%s3674_s30] sm:$0xf] %vm2136_vm4, %v2448_v26 }
 0x203   : > { %2138 = vst.msk [vmem:[%s3674_s30 + $0x4] sm:$0xf] %vm2136_vm4, %v2449_v12  ;;  %v2458_v14 = vpack.c.bf16 %v1986_v49, %v1986_v49  ;;  %v2459_v17 = vpack.c.bf16 %v1987_v55, %v1987_v55  ;;  %v2460_v60 = vpack.c.bf16 %v1988_v50, %v1988_v50  ;;  %v2461_v18 = vpack.c.bf16 %v1989_v62, %v1989_v62 }
 0x204   : > { %2139 = vst.msk [vmem:[%s3674_s30 + $0x8] sm:$0xf] %vm2136_vm4, %v2450_v21  ;;  %2140 = vst.msk [vmem:[%s3674_s30 + $0xc] sm:$0xf] %vm2136_vm4, %v2451_v42  ;;  %v2462_v20 = vpack.c.bf16 %v1990_v8, %v1990_v8  ;;  %v2463_v23 = vpack.c.bf16 %v1991_v32, %v1991_v32  ;;  %v2464_v24 = vpack.c.bf16 %v1992_v28, %v1992_v28 }
 0x205   : > { %2141 = vst.msk [vmem:[%s3674_s30 + $0x10] sm:$0xf] %vm2136_vm4, %v2452_v52  ;;  %2142 = vst.msk [vmem:[%s3674_s30 + $0x14] sm:$0xf] %vm2136_vm4, %v2453_v7  ;;  %v2465_v29 = vpack.c.bf16 %v1993_v57, %v1993_v57  ;;  %v2466_v30 = vpack.c.bf16 %v3634_v27, %v3634_v27  ;;  %v2467_v31 = vpack.c.bf16 %v3639_v61, %v3639_v61 }
 0x206   : > { %2143 = vst.msk [vmem:[%s3674_s30 + $0x18] sm:$0xf] %vm2136_vm4, %v2454_v51  ;;  %2144 = vst.msk [vmem:[%s3674_s30 + $0x1c] sm:$0xf] %vm2136_vm4, %v2455_v15  ;;  %v2468_v56 = vpack.c.bf16 %v3644_v47, %v3644_v47  ;;  %v2469_v33 = vpack.c.bf16 %v3649_v39, %v3649_v39  ;;  %v2470_v34 = vpack.c.bf16 %v3654_v63, %v3654_v63 }
 0x207   : > { %2145 = vst.msk [vmem:[%s3674_s30 + $0x20] sm:$0xf] %vm2136_vm4, %v2456_v13  ;;  %2146 = vst.msk [vmem:[%s3674_s30 + $0x24] sm:$0xf] %vm2136_vm4, %v2457_v44  ;;  %v2471_v35 = vpack.c.bf16 %v3659_v1, %v3659_v1  ;;  %v2472_v38 = vpack.c.bf16 %v3664_v2, %v3664_v2  ;;  %v2473_v43 = vpack.c.bf16 %v3669_v5, %v3669_v5 }
 0x208   : > { %2147 = vst.msk [vmem:[%s3674_s30 + $0x28] sm:$0xf] %vm2136_vm4, %v2458_v14  ;;  %2148 = vst.msk [vmem:[%s3674_s30 + $0x2c] sm:$0xf] %vm2136_vm4, %v2459_v17  ;;  %v2474_v22 = vpack.c.bf16 %v3679_v6, %v3679_v6  ;;  %v2475_v19 = vpack.c.bf16 %v3684_v36, %v3684_v36  ;;  %v2476_v25 = vpack.c.bf16 %v3689_v9, %v3689_v9 }
 0x209   : > { %2149 = vst.msk [vmem:[%s3674_s30 + $0x30] sm:$0xf] %vm2136_vm4, %v2460_v60  ;;  %2150 = vst.msk [vmem:[%s3674_s30 + $0x34] sm:$0xf] %vm2136_vm4, %v2461_v18  ;;  %v2477_v58 = vpack.c.bf16 %v3694_v3, %v3694_v3  ;;  %v2478_v59 = vpack.c.bf16 %v3699_v0, %v3699_v0  ;;  %v2479_v40 = vpack.c.bf16 %v3704_v16, %v3704_v16 }
 0x20a   : > { %2151 = vst.msk [vmem:[%s3674_s30 + $0x38] sm:$0xf] %vm2136_vm4, %v2462_v20  ;;  %2152 = vst.msk [vmem:[%s3674_s30 + $0x3c] sm:$0xf] %vm2136_vm4, %v2463_v23 }
 0x20b   : > { %2153 = vst.msk [vmem:[%s3674_s30 + $0x40] sm:$0xf] %vm2136_vm4, %v2464_v24  ;;  %2154 = vst.msk [vmem:[%s3674_s30 + $0x44] sm:$0xf] %vm2136_vm4, %v2465_v29 }
 0x20c   : > { %2155 = vst.msk [vmem:[%s3674_s30 + $0x48] sm:$0xf] %vm2136_vm4, %v2466_v30  ;;  %2156 = vst.msk [vmem:[%s3674_s30 + $0x4c] sm:$0xf] %vm2136_vm4, %v2467_v31 }
 0x20d   : > { %2157 = vst.msk [vmem:[%s3674_s30 + $0x50] sm:$0xf] %vm2136_vm4, %v2468_v56  ;;  %2158 = vst.msk [vmem:[%s3674_s30 + $0x54] sm:$0xf] %vm2136_vm4, %v2469_v33 }
 0x20e   : > { %2159 = vst.msk [vmem:[%s3674_s30 + $0x58] sm:$0xf] %vm2136_vm4, %v2470_v34  ;;  %2160 = vst.msk [vmem:[%s3674_s30 + $0x5c] sm:$0xf] %vm2136_vm4, %v2471_v35 }
 0x20f   : > { %2161 = vst.msk [vmem:[%s3674_s30 + $0x60] sm:$0xf] %vm2136_vm4, %v2472_v38  ;;  %2162 = vst.msk [vmem:[%s3674_s30 + $0x64] sm:$0xf] %vm2136_vm4, %v2473_v43 }
 0x210   : > { %2163 = vst.msk [vmem:[%s3674_s30 + $0x68] sm:$0xf] %vm2136_vm4, %v2474_v22  ;;  %2164 = vst.msk [vmem:[%s3674_s30 + $0x6c] sm:$0xf] %vm2136_vm4, %v2475_v19 }
 0x211   : > { %2165 = vst.msk [vmem:[%s3674_s30 + $0x70] sm:$0xf] %vm2136_vm4, %v2476_v25  ;;  %2166 = vst.msk [vmem:[%s3674_s30 + $0x74] sm:$0xf] %vm2136_vm4, %v2477_v58 }
 0x212   : > { %2167 = vst.msk [vmem:[%s3674_s30 + $0x78] sm:$0xf] %vm2136_vm4, %v2478_v59  ;;  %2168 = vst.msk [vmem:[%s3674_s30 + $0x7c] sm:$0xf] %vm2136_vm4, %v2479_v40 }
 0x213 PF: > { %s13_s12 = sadd.s32 1, %s2913_s12  }
 0x214   : > { %p10_p4 = scmp.ge.s32.totalorder %s13_s12, 4  }
 0x216   :  { %12 = sbr.rel (!%p10_p4) target bundleno = 1 (0x1), region = 68 }

// kernel: _forward_impl.6
= control target key start
LH: loop header
LB: loop body
LE: loop exit
PB: predicated region body
PF: predicated region fallthrough
CT: control target
= control target key end

     0   :  { %s1438_s12 = smov 0   ;;  %s1610_s0 = inlined_call_operand.vmem [shape: bf16[2,72,128], index: 0, kind: input, shape index: {}]   ;;  %s1611_s1 = inlined_call_operand.vmem [shape: bf16[2,72,128], index: 1, kind: input, shape index: {}]   ;;  %s1612_s2 = inlined_call_operand.vmem [shape: bf16[4,128,64], index: 2, kind: input, shape index: {}]   ;;  %s1613_s3 = inlined_call_operand.vmem [shape: bf16[2,64,64], index: 3, kind: output, shape index: {}]  }
   0x1 LB: > { %s1059_s13 = sadd.s32 4294967295, %s1416_s12   ;;  %p1063_p0 = scmp.ge.s32.totalorder %s1416_s12, 1  ;;  %s1416_s12 = sphi %s1438_s12, %s13_s12  }
   0x2   : > { %p147_p1 = scmp.lt.s32.totalorder %s1416_s12, 3 }
   0x4   : > { %p148_p2 = pnand %p1063_p0, %p147_p1 }
   0x5   : > { %v1360_v0 = vld [vmem:[%s1612_s2 + $0x40] sm:$0xff] (!%p148_p2)   ;;  %p176_p3 = scmp.lt.s32.totalorder (!%p148_p2), %s1059_s13, 1  ;;  %v1362_v2 = vld [vmem:[%s1612_s2 + $0x48] sm:$0xff] (!%p148_p2)   ;;  %v1364_v4 = vld [vmem:[%s1612_s2 + $0x50] sm:$0xff] (!%p148_p2)   ;;  %vm855_vm0 = vcmask (!%p148_p2), 523264   ;;  %vm983_vm1 = vcmask (!%p148_p2), 519168  }
   0x6   : > { %151 = sbr.rel (%p148_p2) target bundleno = 377 (0x179), region = 32  ;;  %v1361_v1 = vld [vmem:[%s1612_s2 + $0x80] sm:$0xff] (!%p148_p2)   ;;  %1231 = vmatprep.subr.bf16.mxu1 (!%p148_p2), %v1360_v0  ;;  %v1363_v3 = vld [vmem:[%s1612_s2 + $0x88] sm:$0xff] (!%p148_p2)   ;;  %v1365_v5 = vld [vmem:[%s1612_s2 + $0x90] sm:$0xff] (!%p148_p2)  }
   0x7   : > { %1279 = vmatprep.subr.bf16.mxu0 (!%p148_p2), %v1361_v1  ;;  %1232 = vmatpush3.bf16.msra.mxu1 (!%p148_p2), %v1360_v0  ;;  %v1366_v6 = vld [vmem:[%s1612_s2 + $0x58] sm:$0xff] (!%p148_p2)   ;;  %v1368_v8 = vld [vmem:[%s1612_s2 + $0x60] sm:$0xff] (!%p148_p2)   ;;  %v1370_v10 = vld [vmem:[%s1612_s2 + $0x68] sm:$0xff] (!%p148_p2)  }
   0x8   : > { %1280 = vmatpush3.bf16.msra.mxu0 (!%p148_p2), %v1361_v1  ;;  %1233 = vmatprep.subr.bf16.mxu1 (!%p148_p2), %v1362_v2  ;;  %v1367_v7 = vld [vmem:[%s1612_s2 + $0x98] sm:$0xff] (!%p148_p2)   ;;  %v1369_v9 = vld [vmem:[%s1612_s2 + $0xa0] sm:$0xff] (!%p148_p2)   ;;  %v1371_v12 = vld [vmem:[%s1612_s2 + $0xa8] sm:$0xff] (!%p148_p2)  }
   0x9   : > { %1281 = vmatprep.subr.bf16.mxu0 (!%p148_p2), %v1363_v3  ;;  %v1372_v14 = vld [vmem:[%s1612_s2 + $0x70] sm:$0xff] (!%p148_p2)   ;;  %v1374_v16 = vld [vmem:[%s1612_s2 + $0x78] sm:$0xff] (!%p148_p2)   ;;  %v1377_v18 = vld [vmem:[%s1612_s2] sm:$0xff] (!%p148_p2)  }
   0xa   : > { %v1373_v15 = vld [vmem:[%s1612_s2 + $0xb0] sm:$0xff] (!%p148_p2)   ;;  %v1375_v17 = vld [vmem:[%s1612_s2 + $0xb8] sm:$0xff] (!%p148_p2)   ;;  %v1379_v19 = vld [vmem:[%s1612_s2 + $0xc0] sm:$0xff] (!%p148_p2)  }
   0xb   : > { %1234 = vmatpush3.bf16.msra.mxu1 (!%p148_p2), %v1362_v2  ;;  %v1382_v22 = vld [vmem:[%s1612_s2 + $0x8] sm:$0xff] (!%p148_p2)   ;;  %v1384_v26 = vld [vmem:[%s1612_s2 + $0x10] sm:$0xff] (!%p148_p2)   ;;  %v1386_v28 = vld [vmem:[%s1612_s2 + $0x18] sm:$0xff] (!%p148_p2)  }
   0xc   : > { %1282 = vmatpush3.bf16.msra.mxu0 (!%p148_p2), %v1363_v3  ;;  %1235 = vmatprep.subr.bf16.mxu1 (!%p148_p2), %v1364_v4  ;;  %v1383_v23 = vld [vmem:[%s1612_s2 + $0xc8] sm:$0xff] (!%p148_p2)   ;;  %v1385_v27 = vld [vmem:[%s1612_s2 + $0xd0] sm:$0xff] (!%p148_p2)   ;;  %v1387_v31 = vld [vmem:[%s1612_s2 + $0xd8] sm:$0xff] (!%p148_p2)  }
   0xd   : > { %s1615_s13 = smov (!%p176_p3, %s1059_s13), 1  ;;  %1283 = vmatprep.subr.bf16.mxu0 %v1365_v5  ;;  %v1388_v34 = vld [vmem:[%s1612_s2 + $0x20] sm:$0xff]   ;;  %v1390_v36 = vld [vmem:[%s1612_s2 + $0x28] sm:$0xff]   ;;  %v1395_v38 = vld [vmem:[%s1612_s2 + $0x30] sm:$0xff]  }
   0xe   : > { %s1351_s30 = smul.u32 36, %s1615_s13  ;;  %v1389_v35 = vld [vmem:[%s1612_s2 + $0xe0] sm:$0xff]   ;;  %v1391_v37 = vld [vmem:[%s1612_s2 + $0xe8] sm:$0xff]   ;;  %v1397_v39 = vld [vmem:[%s1612_s2 + $0xf0] sm:$0xff]  }
   0xf   : > { %1236 = vmatpush3.bf16.msra.mxu1 %v1364_v4  ;;  %v1398_v40 = vld [vmem:[%s1612_s2 + $0x38] sm:$0xff]  }
  0x10   : > { %1284 = vmatpush3.bf16.msra.mxu0 %v1365_v5  ;;  %1237 = vmatprep.subr.bf16.mxu1 %v1366_v6  ;;  %s1482_s10 = scalar_lea.vmem %s1611_s1, %s1351_s30  ;;  %s1490_s17 = scalar_lea.vmem %s1610_s0, %s1351_s30  ;;  %v1399_v41 = vld [vmem:[%s1612_s2 + $0xf8] sm:$0xff]  }
  0x11   : > { %1285 = vmatprep.subr.bf16.mxu0 %v1367_v7  ;;  %v1376_v11 = vld [vmem:[%s1482_s10] sm:$0xff]   ;;  %v1380_v20 = vld [vmem:[%s1482_s10 + $0x8] sm:$0xff]   ;;  %v1392_v24 = vld [vmem:[%s1482_s10 + $0x10] sm:$0xff]  }
  0x12   : > { %1247 = vmatprep.mubr.bf16.mxu1 %v1376_v11  ;;  %v1378_v13 = vld [vmem:[%s1490_s17 + $0x4] sm:$0xff]   ;;  %v1381_v21 = vld [vmem:[%s1490_s17 + $0xc] sm:$0xff]   ;;  %v1393_v25 = vld [vmem:[%s1490_s17 + $0x14] sm:$0xff]  }
  0x13   : > { %1238 = vmatpush3.bf16.msra.mxu1 %v1366_v6  ;;  %1295 = vmatprep.mubr.bf16.mxu0 %v1378_v13  ;;  %v1394_v29 = vld [vmem:[%s1482_s10 + $0x18] sm:$0xff]   ;;  %v1400_v32 = vld [vmem:[%s1490_s17] sm:$0xff]   ;;  %v1402_v42 = vld [vmem:[%s1490_s17 + $0x8] sm:$0xff]  }
  0x14   : > { %1286 = vmatpush3.bf16.msra.mxu0 %v1367_v7  ;;  %1239 = vmatprep.subr.bf16.mxu1 %v1368_v8  ;;  %v1396_v30 = vld [vmem:[%s1490_s17 + $0x1c] sm:$0xff]   ;;  %v1401_v33 = vld [vmem:[%s1482_s10 + $0x4] sm:$0xff]   ;;  %v1403_v43 = vld [vmem:[%s1482_s10 + $0xc] sm:$0xff]  }
  0x15   : > { %1287 = vmatprep.subr.bf16.mxu0 %v1369_v9  ;;  %v1404_v44 = vld [vmem:[%s1490_s17 + $0x10] sm:$0xff]   ;;  %v1406_v46 = vld [vmem:[%s1490_s17 + $0x18] sm:$0xff]  }
  0x16   : > { %v1405_v45 = vld [vmem:[%s1482_s10 + $0x14] sm:$0xff]   ;;  %v1407_v47 = vld [vmem:[%s1482_s10 + $0x1c] sm:$0xff]   ;;  %s1174_s10 = sshll.u32 %s1615_s13, 5 }
  0x17   : > { %1240 = vmatpush3.bf16.msra.mxu1 %v1368_v8  ;;  %s190_s13 = scalar_lea.vmem %s1613_s3, %s1174_s10 }
  0x18   : > { %1288 = vmatpush3.bf16.msra.mxu0 %v1369_v9  ;;  %1241 = vmatprep.subr.bf16.mxu1 %v1370_v10 }
  0x19   : > { %1289 = vmatprep.subr.bf16.mxu0 %v1371_v12 }
  0x1b   : > { %1242 = vmatpush3.bf16.msra.mxu1 %v1370_v10 }
  0x1c   : > { %1290 = vmatpush3.bf16.msra.mxu0 %v1371_v12  ;;  %1243 = vmatprep.subr.bf16.mxu1 %v1372_v14 }
  0x1d   : > { %1291 = vmatprep.subr.bf16.mxu0 %v1373_v15 }
  0x1f   : > { %1244 = vmatpush3.bf16.msra.mxu1 %v1372_v14 }
  0x20   : > { %1292 = vmatpush3.bf16.msra.mxu0 %v1373_v15  ;;  %1245 = vmatprep.subr.bf16.mxu1 %v1374_v16 }
  0x21   : > { %1293 = vmatprep.subr.bf16.mxu0 %v1375_v17 }
  0x23   : > { %1246 = vmatpush3.bf16.msra.mxu1 %v1374_v16 }
  0x24   : > { %1294 = vmatpush3.bf16.msra.mxu0 %v1375_v17  ;;  %1255 = vmatprep.subr.bf16.mxu1 %v1377_v18 }
  0x25   : > { %1303 = vmatprep.subr.bf16.mxu0 %v1379_v19 }
  0x26   : > { %1248 = vmatmul.mubr.bf16.vlgmr.msra.gmra.mrb[0].mxu1 %v1380_v20 }
  0x27   : > { %1256 = vmatpush3.bf16.msra.mxu1 %v1377_v18  ;;  %1296 = vmatmul.mubr.bf16.vlgmr.msra.gmra.mrb[0].mxu0 %v1381_v21 }
  0x28   : > { %1304 = vmatpush3.bf16.msra.mxu0 %v1379_v19  ;;  %1257 = vmatprep.subr.bf16.mxu1 %v1382_v22 }
  0x29   : > { %1305 = vmatprep.subr.bf16.mxu0 %v1383_v23  ;;  %1251 = vmatprep.mubr.bf16.mxu1 %v1392_v24 }
  0x2a   : > { %1299 = vmatprep.mubr.bf16.mxu0 %v1393_v25 }
  0x2b   : > { %1258 = vmatpush3.bf16.msra.mxu1 %v1382_v22 }
  0x2c   : > { %1306 = vmatpush3.bf16.msra.mxu0 %v1383_v23  ;;  %1259 = vmatprep.subr.bf16.mxu1 %v1384_v26 }
  0x2d   : > { %1307 = vmatprep.subr.bf16.mxu0 %v1385_v27 }
  0x2e   : > { %1252 = vmatmul.mubr.bf16.gmra.mrb[4].mxu1 %v1394_v29 }
  0x2f   : > { %1260 = vmatpush3.bf16.msra.mxu1 %v1384_v26  ;;  %1300 = vmatmul.mubr.bf16.gmra.mrb[4].mxu0 %v1396_v30 }
  0x30   : > { %1308 = vmatpush3.bf16.msra.mxu0 %v1385_v27  ;;  %1261 = vmatprep.subr.bf16.mxu1 %v1386_v28 }
  0x31   : > { %1309 = vmatprep.subr.bf16.mxu0 %v1387_v31  ;;  %1271 = vmatprep.mubr.bf16.mxu1 %v1400_v32 }
  0x32   : > { %1319 = vmatprep.mubr.bf16.mxu0 %v1401_v33 }
  0x33   : > { %1262 = vmatpush3.bf16.msra.mxu1 %v1386_v28 }
  0x34   : > { %1310 = vmatpush3.bf16.msra.mxu0 %v1387_v31  ;;  %1263 = vmatprep.subr.bf16.mxu1 %v1388_v34 }
  0x35   : > { %1311 = vmatprep.subr.bf16.mxu0 %v1389_v35 }
  0x37   : > { %1264 = vmatpush3.bf16.msra.mxu1 %v1388_v34 }
  0x38   : > { %1312 = vmatpush3.bf16.msra.mxu0 %v1389_v35  ;;  %1265 = vmatprep.subr.bf16.mxu1 %v1390_v36 }
  0x39   : > { %1313 = vmatprep.subr.bf16.mxu0 %v1391_v37 }
  0x3b   : > { %1266 = vmatpush3.bf16.msra.mxu1 %v1390_v36 }
  0x3c   : > { %1314 = vmatpush3.bf16.msra.mxu0 %v1391_v37  ;;  %1267 = vmatprep.subr.bf16.mxu1 %v1395_v38 }
  0x3d   : > { %1315 = vmatprep.subr.bf16.mxu0 %v1397_v39 }
  0x3f   : > { %1268 = vmatpush3.bf16.msra.mxu1 %v1395_v38 }
  0x40   : > { %1316 = vmatpush3.bf16.msra.mxu0 %v1397_v39  ;;  %1269 = vmatprep.subr.bf16.mxu1 %v1398_v40 }
  0x41   : > { %1317 = vmatprep.subr.bf16.mxu0 %v1399_v41 }
  0x43   : > { %1270 = vmatpush3.bf16.msra.mxu1 %v1398_v40 }
  0x44   : > { %1318 = vmatpush3.bf16.msra.mxu0 %v1399_v41 }
  0x46   : > { %1272 = vmatmul.mubr.bf16.vlgmr.msra.gmra.mrb[0].mxu1 %v1402_v42 }
  0x47   : > { %1320 = vmatmul.mubr.bf16.vlgmr.msra.gmra.mrb[0].mxu0 %v1403_v43  ;;  %1275 = vmatprep.mubr.bf16.mxu1 %v1404_v44 }
  0x48   : > { %1323 = vmatprep.mubr.bf16.mxu0 %v1405_v45 }
  0x4e   : > { %1276 = vmatmul.mubr.bf16.gmra.mrb[4].mxu1 %v1406_v46 }
  0x4f   : > { %1324 = vmatmul.mubr.bf16.gmra.mrb[4].mxu0 %v1407_v47 }
 0x119   : > { %v1273_v48 = vpop.f32.mrb[0].mxu1 }
 0x11a   : > { %v1321_v49 = vpop.f32.mrb[0].mxu0  ;;  %v484_v50 = vpop.f32.mrb[1].mxu1 }
 0x11b   : > { %v1327_v51 = vadd.f32 %v1321_v49, %v1273_v48  ;;  %v816_v52 = vpop.f32.mrb[1].mxu0  ;;  %v1274_v53 = vpop.f32.mrb[2].mxu1 }
 0x11c   : > { %v1328_v54 = vadd.f32 %v816_v52, %v484_v50  ;;  %v1322_v55 = vpop.f32.mrb[2].mxu0  ;;  %v487_v56 = vpop.f32.mrb[3].mxu1 }
 0x11d   : > { %v1329_v57 = vadd.f32 %v1322_v55, %v1274_v53  ;;  %v819_v58 = vpop.f32.mrb[3].mxu0  ;;  %v859_v0 = vsel %vm855_vm0, %v1327_v51, 0.0 }
 0x11e   : > { %v1330_v59 = vadd.f32 %v819_v58, %v487_v56  ;;  %v856_v60 = vsel %vm855_vm0, %v1328_v54, 0.0 }
 0x11f   : > { %v861_v7 = vsel %vm855_vm0, %v1329_v57, 0.0 }
 0x120   : > { %v857_v61 = vsel %vm855_vm0, %v1330_v59, 0.0 }
 0x121   : > { %v858_v62 = vadd.f32 %v857_v61, %v856_v60  ;;  %v1277_v63 = vpop.f32.mrb[4].mxu1 }
 0x122   : > { %v1325_v1 = vpop.f32.mrb[4].mxu0  ;;  %v500_v2 = vpop.f32.mrb[5].mxu1 }
 0x123   : > { %v860_v3 = vadd.f32 %v859_v0, %v858_v62  ;;  %v1331_v4 = vadd.f32 %v1325_v1, %v1277_v63  ;;  %v832_v5 = vpop.f32.mrb[5].mxu0  ;;  %v1278_v6 = vpop.f32.mrb[6].mxu1 }
 0x124   : > { %v1332_v8 = vadd.f32 %v832_v5, %v500_v2  ;;  %v1326_v9 = vpop.f32.mrb[6].mxu0  ;;  %v503_v10 = vpop.f32.mrb[7].mxu1 }
 0x125   : > { %v862_v11 = vadd.f32 %v861_v7, %v860_v3  ;;  %v1333_v12 = vadd.f32 %v1326_v9, %v1278_v6  ;;  %v835_v13 = vpop.f32.mrb[7].mxu0  ;;  %v867_v19 = vsel %vm855_vm0, %v1331_v4, 0.0 }
 0x126   : > { %v863_v14 = vsel %vm855_vm0, %v1332_v8, 0.0  ;;  %v1334_v15 = vadd.f32 %v835_v13, %v503_v10 }
 0x127   : > { %v864_v16 = vadd.f32 %v863_v14, %v862_v11  ;;  %v869_v21 = vsel %vm855_vm0, %v1333_v12, 0.0 }
 0x128   : > { %v865_v17 = vsel %vm855_vm0, %v1334_v15, 0.0 }
 0x129   : > { %v866_v18 = vadd.f32 %v865_v17, %v864_v16 }
 0x12b   : > { %v868_v20 = vadd.f32 %v867_v19, %v866_v18 }
 0x12d   : > { %v870_v22 = vadd.f32 %v869_v21, %v868_v20 }
 0x12f   : > { %v871_v23 = vrot.slane %v870_v22, 4 }
 0x131   : > { %v872_v24 = vadd.f32 %v871_v23, %v870_v22 }
 0x133   : > { %v873_v25 = vrot.slane %v872_v24, 2 }
 0x135   : > { %v874_v26 = vadd.f32 %v873_v25, %v872_v24 }
 0x137   : > { %v875_v27 = vrot.slane %v874_v26, 1 }
 0x139   : > { %v876_v28 = vadd.f32 %v875_v27, %v874_v26 }
 0x13b   : > { %v878_v29 = vmul.f32 0.015625, %v876_v28 }
 0x13d   : > { %v879_v30 = vsub.f32 %v1328_v54, %v878_v29  ;;  %v880_v31 = vsub.f32 %v1330_v59, %v878_v29  ;;  %v881_v32 = vsub.f32 %v1327_v51, %v878_v29  ;;  %v882_v33 = vsub.f32 %v1329_v57, %v878_v29 }
 0x13e   : > { %v883_v34 = vsub.f32 %v1332_v8, %v878_v29  ;;  %v884_v35 = vsub.f32 %v1334_v15, %v878_v29  ;;  %v885_v36 = vsub.f32 %v1331_v4, %v878_v29  ;;  %v886_v37 = vsub.f32 %v1333_v12, %v878_v29 }
 0x13f   : > { %v887_v38 = vmul.f32 %v879_v30, %v879_v30  ;;  %v888_v39 = vmul.f32 %v880_v31, %v880_v31  ;;  %v889_v40 = vmul.f32 %v881_v32, %v881_v32  ;;  %v890_v41 = vmul.f32 %v882_v33, %v882_v33 }
 0x140   : > { %v891_v45 = vmul.f32 %v883_v34, %v883_v34  ;;  %v892_v48 = vmul.f32 %v884_v35, %v884_v35  ;;  %v893_v51 = vmul.f32 %v885_v36, %v885_v36  ;;  %v894_v54 = vmul.f32 %v886_v37, %v886_v37 }
 0x141   : > { %v895_v42 = vsel %vm855_vm0, %v887_v38, 0.0  ;;  %v896_v43 = vsel %vm855_vm0, %v888_v39, 0.0  ;;  %v898_v46 = vsel %vm855_vm0, %v889_v40, 0.0  ;;  %v900_v49 = vsel %vm855_vm0, %v890_v41, 0.0 }
 0x142   : > { %v897_v44 = vadd.f32 %v896_v43, %v895_v42  ;;  %v902_v52 = vsel %vm855_vm0, %v891_v45, 0.0  ;;  %v904_v55 = vsel %vm855_vm0, %v892_v48, 0.0  ;;  %v906_v57 = vsel %vm855_vm0, %v893_v51, 0.0 }
 0x143   : > { %v908_v59 = vsel %vm855_vm0, %v894_v54, 0.0 }
 0x144   : > { %v899_v47 = vadd.f32 %v898_v46, %v897_v44 }
 0x146   : > { %v901_v50 = vadd.f32 %v900_v49, %v899_v47 }
 0x148   : > { %v903_v53 = vadd.f32 %v902_v52, %v901_v50 }
 0x14a   : > { %v905_v56 = vadd.f32 %v904_v55, %v903_v53 }
 0x14c   : > { %v907_v58 = vadd.f32 %v906_v57, %v905_v56 }
 0x14e   : > { %v909_v60 = vadd.f32 %v908_v59, %v907_v58 }
 0x150   : > { %v910_v61 = vrot.slane %v909_v60, 4 }
 0x152   : > { %v911_v62 = vadd.f32 %v910_v61, %v909_v60 }
 0x154   : > { %v912_v63 = vrot.slane %v911_v62, 2 }
 0x156   : > { %v913_v0 = vadd.f32 %v912_v63, %v911_v62 }
 0x158   : > { %v914_v1 = vrot.slane %v913_v0, 1 }
 0x15a   : > { %v915_v2 = vadd.f32 %v914_v1, %v913_v0 }
 0x15c   : > { %v916_v3 = vmul.f32 0.015625, %v915_v2 }
 0x15e   : > { %v917_v4 = vadd.f32 1e-05, %v916_v3 }
 0x160   : > { %1408 = vrsqrt.f32 %v917_v4 }
 0x16a   : > { %v1409_v5 = vpop.eup %1408 }
 0x16b   : > { %v919_v6 = vmul.f32 %v1409_v5, %v879_v30  ;;  %v920_v7 = vmul.f32 %v1409_v5, %v880_v31  ;;  %v921_v8 = vmul.f32 %v1409_v5, %v881_v32  ;;  %v922_v9 = vmul.f32 %v1409_v5, %v882_v33 }
 0x16c   : > { %v923_v10 = vmul.f32 %v1409_v5, %v883_v34  ;;  %v924_v11 = vmul.f32 %v1409_v5, %v884_v35  ;;  %v925_v12 = vmul.f32 %v1409_v5, %v885_v36  ;;  %v926_v13 = vmul.f32 %v1409_v5, %v886_v37 }
 0x16d   : > { %vm927_vm2 = vcmp.ge.f32.partialorder %v919_v6, 0.0  ;;  %vm928_vm3 = vcmp.ge.f32.partialorder %v920_v7, 0.0  ;;  %vm929_vm4 = vcmp.ge.f32.partialorder %v921_v8, 0.0  ;;  %vm930_vm5 = vcmp.ge.f32.partialorder %v922_v9, 0.0 }
 0x16e   : > { %vm931_vm6 = vcmp.ge.f32.partialorder %v923_v10, 0.0  ;;  %vm932_vm7 = vcmp.ge.f32.partialorder %v924_v11, 0.0  ;;  %vm933_vm8 = vcmp.ge.f32.partialorder %v925_v12, 0.0  ;;  %vm934_vm9 = vcmp.ge.f32.partialorder %v926_v13, 0.0 }
 0x16f   : > { %v935_v14 = vmul.f32 0.2, %v919_v6  ;;  %v936_v15 = vmul.f32 0.2, %v920_v7  ;;  %v937_v16 = vmul.f32 0.2, %v921_v8 }
 0x170   : > { %v938_v17 = vmul.f32 0.2, %v922_v9  ;;  %v939_v18 = vmul.f32 0.2, %v923_v10  ;;  %v940_v19 = vmul.f32 0.2, %v924_v11 }
 0x171   : > { %v941_v20 = vmul.f32 0.2, %v925_v12  ;;  %v942_v21 = vmul.f32 0.2, %v926_v13  ;;  %v943_v22 = vsel %vm927_vm2, %v919_v6, %v935_v14  ;;  %v944_v23 = vsel %vm928_vm3, %v920_v7, %v936_v15 }
 0x172   : > { %v945_v24 = vsel %vm929_vm4, %v921_v8, %v937_v16  ;;  %v946_v25 = vsel %vm930_vm5, %v922_v9, %v938_v17  ;;  %v947_v26 = vsel %vm931_vm6, %v923_v10, %v939_v18  ;;  %v948_v27 = vsel %vm932_vm7, %v924_v11, %v940_v19 }
 0x173   : > { %v949_v28 = vsel %vm933_vm8, %v925_v12, %v941_v20  ;;  %v950_v29 = vsel %vm934_vm9, %v926_v13, %v942_v21  ;;  %v1175_v30 = vpack.c.bf16 %v943_v22, %v943_v22  ;;  %v1176_v31 = vpack.c.bf16 %v944_v23, %v944_v23 }
 0x174   : > { %v1177_v32 = vpack.c.bf16 %v945_v24, %v945_v24  ;;  %v1178_v33 = vpack.c.bf16 %v946_v25, %v946_v25  ;;  %v1179_v34 = vpack.c.bf16 %v947_v26, %v947_v26  ;;  %v1180_v35 = vpack.c.bf16 %v948_v27, %v948_v27 }
 0x175   : > { %v1181_v36 = vpack.c.bf16 %v949_v28, %v949_v28  ;;  %v1182_v37 = vpack.c.bf16 %v950_v29, %v950_v29  ;;  %984 = vst.msk [vmem:[%s190_s13] sm:$0xf] %vm983_vm1, %v1175_v30  ;;  %985 = vst.msk [vmem:[%s190_s13 + $0x4] sm:$0xf] %vm983_vm1, %v1176_v31 }
 0x176   : > { %986 = vst.msk [vmem:[%s190_s13 + $0x8] sm:$0xf] %vm983_vm1, %v1177_v32  ;;  %987 = vst.msk [vmem:[%s190_s13 + $0xc] sm:$0xf] %vm983_vm1, %v1178_v33 }
 0x177   : > { %988 = vst.msk [vmem:[%s190_s13 + $0x10] sm:$0xf] %vm983_vm1, %v1179_v34  ;;  %989 = vst.msk [vmem:[%s190_s13 + $0x14] sm:$0xf] %vm983_vm1, %v1180_v35 }
 0x178   : > { %990 = vst.msk [vmem:[%s190_s13 + $0x18] sm:$0xf] %vm983_vm1, %v1181_v36  ;;  %991 = vst.msk [vmem:[%s190_s13 + $0x1c] sm:$0xf] %vm983_vm1, %v1182_v37 }
 0x179 PF: > { %s13_s12 = sadd.s32 1, %s1416_s12  }
 0x17a   : > { %p10_p4 = scmp.ge.s32.totalorder %s13_s12, 4  }
 0x17c   :  { %12 = sbr.rel (!%p10_p4) target bundleno = 1 (0x1), region = 68 }

// kernel: _forward_impl.7
= control target key start
LH: loop header
LB: loop body
LE: loop exit
PB: predicated region body
PF: predicated region fallthrough
CT: control target
= control target key end

     0   :  { %s1480_s15 = smov 0   ;;  %s1734_s0 = inlined_call_operand.vmem [shape: bf16[2,20,256], index: 0, kind: input, shape index: {}]   ;;  %s1735_s1 = inlined_call_operand.vmem [shape: bf16[2,20,256], index: 1, kind: input, shape index: {}]   ;;  %s1736_s2 = inlined_call_operand.vmem [shape: bf16[4,256,128], index: 2, kind: input, shape index: {}]   ;;  %s1737_s3 = inlined_call_operand.vmem [shape: f32[16,128], index: 3, kind: input, shape index: {}]   ;;  %s1738_s4 = inlined_call_operand.vmem [shape: f32[2,1,1], index: 4, kind: output, shape index: {}]  }
   0x1 LB: > { %s1084_s16 = sadd.s32 4294967295, %s1453_s15   ;;  %p1088_p0 = scmp.ge.s32.totalorder %s1453_s15, 1  ;;  %s1453_s15 = sphi %s1480_s15, %s14_s15  }
   0x2   : > { %p172_p1 = scmp.lt.s32.totalorder %s1453_s15, 3 }
   0x4   : > { %p173_p2 = pnand %p1088_p0, %p172_p1 }
   0x5   : > { %v1365_v0 = vld [vmem:[%s1736_s2 + $0xc0] sm:$0xff] (!%p173_p2)   ;;  %v1369_v4 = vld [vmem:[%s1736_s2 + $0xc8] sm:$0xff] (!%p173_p2)   ;;  %v1373_v8 = vld [vmem:[%s1736_s2 + $0xd0] sm:$0xff] (!%p173_p2)   ;;  %p201_p3 = scmp.lt.s32.totalorder (!%p173_p2), %s1084_s16, 1  ;;  %vm627_vm0 = vcmask (!%p173_p2), 1045504   ;;  %vm1023_vm3 = vcmask (!%p173_p2), 0  }
   0x6   : > { %176 = sbr.rel (%p173_p2) target bundleno = 582 (0x246), region = 36  ;;  %v1366_v1 = vld [vmem:[%s1736_s2 + $0x40] sm:$0xff] (!%p173_p2)   ;;  %1266 = vmatprep.subr.bf16.mxu0 (!%p173_p2), %v1365_v0  ;;  %v1370_v5 = vld [vmem:[%s1736_s2 + $0x48] sm:$0xff] (!%p173_p2)   ;;  %v1374_v9 = vld [vmem:[%s1736_s2 + $0x50] sm:$0xff] (!%p173_p2)  }
   0x7   : > { %v1367_v2 = vld [vmem:[%s1736_s2 + $0x80] sm:$0xff] (!%p173_p2)   ;;  %1288 = vmatprep.subr.bf16.mxu1 (!%p173_p2), %v1366_v1  ;;  %v1371_v6 = vld [vmem:[%s1736_s2 + $0x88] sm:$0xff] (!%p173_p2)   ;;  %v1375_v10 = vld [vmem:[%s1736_s2 + $0x90] sm:$0xff] (!%p173_p2)  }
   0x8   : > { %v1368_v3 = vld [vmem:[%s1736_s2] sm:$0xff] (!%p173_p2)   ;;  %1267 = vmatpush3.bf16.msra.mxu0 (!%p173_p2), %v1367_v2  ;;  %v1372_v7 = vld [vmem:[%s1736_s2 + $0x8] sm:$0xff] (!%p173_p2)   ;;  %v1376_v11 = vld [vmem:[%s1736_s2 + $0x10] sm:$0xff] (!%p173_p2)  }
   0x9   : > { %1289 = vmatpush3.bf16.msra.mxu1 (!%p173_p2), %v1368_v3  ;;  %1268 = vmatprep.subr.bf16.mxu0 (!%p173_p2), %v1369_v4  ;;  %v1377_v12 = vld [vmem:[%s1736_s2 + $0xd8] sm:$0xff] (!%p173_p2)   ;;  %v1381_v16 = vld [vmem:[%s1736_s2 + $0xe0] sm:$0xff] (!%p173_p2)   ;;  %v1385_v20 = vld [vmem:[%s1736_s2 + $0xe8] sm:$0xff] (!%p173_p2)  }
   0xa   : > { %1290 = vmatprep.subr.bf16.mxu1 (!%p173_p2), %v1370_v5  ;;  %v1378_v13 = vld [vmem:[%s1736_s2 + $0x58] sm:$0xff] (!%p173_p2)   ;;  %v1382_v17 = vld [vmem:[%s1736_s2 + $0x60] sm:$0xff] (!%p173_p2)   ;;  %v1386_v21 = vld [vmem:[%s1736_s2 + $0x68] sm:$0xff] (!%p173_p2)  }
   0xb   : > { %v1379_v14 = vld [vmem:[%s1736_s2 + $0x98] sm:$0xff] (!%p173_p2)   ;;  %v1383_v18 = vld [vmem:[%s1736_s2 + $0xa0] sm:$0xff] (!%p173_p2)   ;;  %v1387_v22 = vld [vmem:[%s1736_s2 + $0xa8] sm:$0xff] (!%p173_p2)  }
   0xc   : > { %1269 = vmatpush3.bf16.msra.mxu0 (!%p173_p2), %v1371_v6  ;;  %v1380_v15 = vld [vmem:[%s1736_s2 + $0x18] sm:$0xff] (!%p173_p2)   ;;  %v1384_v19 = vld [vmem:[%s1736_s2 + $0x20] sm:$0xff] (!%p173_p2)   ;;  %v1388_v23 = vld [vmem:[%s1736_s2 + $0x28] sm:$0xff] (!%p173_p2)  }
   0xd   : > { %1291 = vmatpush3.bf16.msra.mxu1 %v1372_v7  ;;  %1270 = vmatprep.subr.bf16.mxu0 %v1373_v8  ;;  %s1740_s16 = smov (!%p201_p3, %s1084_s16), 1  ;;  %v1389_v24 = vld [vmem:[%s1736_s2 + $0xf0] sm:$0xff]   ;;  %v1393_v28 = vld [vmem:[%s1736_s2 + $0xf8] sm:$0xff]   ;;  %v1401_v40 = vld [vmem:[%s1736_s2 + $0x140] sm:$0xff]  }
   0xe   : > { %1292 = vmatprep.subr.bf16.mxu1 %v1374_v9  ;;  %v1390_v25 = vld [vmem:[%s1736_s2 + $0x70] sm:$0xff]   ;;  %s1354_s21 = smul.u32 24, %s1740_s16  ;;  %v1394_v29 = vld [vmem:[%s1736_s2 + $0x78] sm:$0xff]   ;;  %v1402_v41 = vld [vmem:[%s1736_s2 + $0x1c0] sm:$0xff]   ;;  %s213_s19 = scalar_lea.vmem %s1738_s4, %s1740_s16 }
   0xf   : > { %v1391_v26 = vld [vmem:[%s1736_s2 + $0xb0] sm:$0xff]   ;;  %v1395_v30 = vld [vmem:[%s1736_s2 + $0xb8] sm:$0xff]   ;;  %v1403_v42 = vld [vmem:[%s1736_s2 + $0x100] sm:$0xff]  }
  0x10   : > { %1271 = vmatpush3.bf16.msra.mxu0 %v1375_v10  ;;  %v1392_v27 = vld [vmem:[%s1736_s2 + $0x30] sm:$0xff]   ;;  %s1588_s6 = scalar_lea.vmem %s1735_s1, %s1354_s21  ;;  %s1593_s9 = scalar_lea.vmem %s1734_s0, %s1354_s21  ;;  %v1396_v31 = vld [vmem:[%s1736_s2 + $0x38] sm:$0xff]   ;;  %v1404_v43 = vld [vmem:[%s1736_s2 + $0x180] sm:$0xff]  }
  0x11   : > { %1293 = vmatpush3.bf16.msra.mxu1 %v1376_v11  ;;  %1272 = vmatprep.subr.bf16.mxu0 %v1377_v12  ;;  %v249_v32 = vld [vmem:[%s1588_s6] sm:$0xff]  ;;  %v1603_v33 = vld [vmem:[%s1588_s6 + $0x8] sm:$0xff]  ;;  %v1409_v48 = vld [vmem:[%s1736_s2 + $0x150] sm:$0xff]  }
  0x12   : > { %1294 = vmatprep.subr.bf16.mxu1 %v1378_v13  ;;  %v215_v34 = vld [vmem:[%s1593_s9] sm:$0xff]  ;;  %v1123_v35 = vcombine.low %v249_v32, %v1603_v33  ;;  %v1124_v36 = vcombine.high %v249_v32, %v1603_v33  ;;  %v1609_v37 = vld [vmem:[%s1593_s9 + $0x8] sm:$0xff]  ;;  %v1410_v49 = vld [vmem:[%s1736_s2 + $0x1d0] sm:$0xff]  }
  0x13   : > { %v1141_v38 = vcombine.low %v215_v34, %v1609_v37  ;;  %v1142_v39 = vcombine.high %v215_v34, %v1609_v37  ;;  %v1405_v44 = vld [vmem:[%s1736_s2 + $0x148] sm:$0xff]   ;;  %v1411_v50 = vld [vmem:[%s1736_s2 + $0x110] sm:$0xff]   ;;  %v1413_v52 = vld [vmem:[%s1736_s2 + $0x158] sm:$0xff]  }
  0x14   : > { %1273 = vmatpush3.bf16.msra.mxu0 %v1379_v14  ;;  %422 = vmatprep.mubr.bf16.mxu0 %v1124_v36  ;;  %v1406_v45 = vld [vmem:[%s1736_s2 + $0x1c8] sm:$0xff]   ;;  %v1412_v51 = vld [vmem:[%s1736_s2 + $0x190] sm:$0xff]   ;;  %v1414_v53 = vld [vmem:[%s1736_s2 + $0x1d8] sm:$0xff]  }
  0x15   : > { %1295 = vmatpush3.bf16.msra.mxu1 %v1380_v15  ;;  %1274 = vmatprep.subr.bf16.mxu0 %v1381_v16  ;;  %v1407_v46 = vld [vmem:[%s1736_s2 + $0x108] sm:$0xff]   ;;  %v1415_v54 = vld [vmem:[%s1736_s2 + $0x118] sm:$0xff]   ;;  %v1417_v56 = vld [vmem:[%s1736_s2 + $0x160] sm:$0xff]  }
  0x16   : > { %1296 = vmatprep.subr.bf16.mxu1 %v1382_v17  ;;  %569 = vmatprep.mubr.bf16.mxu1 %v1142_v39  ;;  %v1408_v47 = vld [vmem:[%s1736_s2 + $0x188] sm:$0xff]   ;;  %v1416_v55 = vld [vmem:[%s1736_s2 + $0x198] sm:$0xff]   ;;  %v1418_v57 = vld [vmem:[%s1736_s2 + $0x1e0] sm:$0xff]  }
  0x17   : > { %v1419_v58 = vld [vmem:[%s1736_s2 + $0x120] sm:$0xff]   ;;  %v1421_v60 = vld [vmem:[%s1736_s2 + $0x168] sm:$0xff]   ;;  %v1425_v0 = vld [vmem:[%s1736_s2 + $0x170] sm:$0xff]  }
  0x18   : > { %1275 = vmatpush3.bf16.msra.mxu0 %v1383_v18  ;;  %v1420_v59 = vld [vmem:[%s1736_s2 + $0x1a0] sm:$0xff]   ;;  %v1422_v61 = vld [vmem:[%s1736_s2 + $0x1e8] sm:$0xff]   ;;  %v1426_v1 = vld [vmem:[%s1736_s2 + $0x1f0] sm:$0xff]  }
  0x19   : > { %1297 = vmatpush3.bf16.msra.mxu1 %v1384_v19  ;;  %1276 = vmatprep.subr.bf16.mxu0 %v1385_v20  ;;  %v1423_v62 = vld [vmem:[%s1736_s2 + $0x128] sm:$0xff]   ;;  %v1427_v2 = vld [vmem:[%s1736_s2 + $0x130] sm:$0xff]   ;;  %v1429_v4 = vld [vmem:[%s1736_s2 + $0x178] sm:$0xff]  }
  0x1a   : > { %1298 = vmatprep.subr.bf16.mxu1 %v1386_v21  ;;  %v1424_v63 = vld [vmem:[%s1736_s2 + $0x1a8] sm:$0xff]   ;;  %v1428_v3 = vld [vmem:[%s1736_s2 + $0x1b0] sm:$0xff]   ;;  %v1430_v5 = vld [vmem:[%s1736_s2 + $0x1f8] sm:$0xff]  }
  0x1b   : > { %v1431_v6 = vld [vmem:[%s1736_s2 + $0x138] sm:$0xff]   ;;  %v578_v8 = vld [vmem:[%s1593_s9] sm:$0xcc]  ;;  %v580_v9 = vld [vmem:[%s1593_s9 + $0x10] sm:$0x33] }
  0x1c   : > { %1277 = vmatpush3.bf16.msra.mxu0 %v1387_v22  ;;  %v1432_v7 = vld [vmem:[%s1736_s2 + $0x1b8] sm:$0xff]   ;;  %v1192_v10 = vcombine.high %v578_v8, %v1609_v37  ;;  %v1194_v11 = vcombine.high %v580_v9, %v580_v9  ;;  %v775_v12 = vld [vmem:[%s1588_s6] sm:$0xcc]  ;;  %v777_v13 = vld [vmem:[%s1588_s6 + $0x10] sm:$0x33]  ;;  %v1191_v14 = vcombine.low %v578_v8, %v1609_v37  ;;  %v1193_v15 = vcombine.low %v580_v9, %v580_v9 }
  0x1d   : > { %1299 = vmatpush3.bf16.msra.mxu1 %v1388_v23  ;;  %1278 = vmatprep.subr.bf16.mxu0 %v1389_v24  ;;  %v1244_v16 = vcombine.high %v775_v12, %v1603_v33  ;;  %v1246_v17 = vcombine.high %v777_v13, %v777_v13  ;;  %v1243_v18 = vcombine.low %v775_v12, %v1603_v33 }
  0x1e   : > { %1300 = vmatprep.subr.bf16.mxu1 %v1390_v25  ;;  %v1245_v19 = vcombine.low %v777_v13, %v777_v13  ;;  %v631_v20 = vrot.slane %v1192_v10, 2  ;;  %v632_v21 = vrot.slane %v1194_v11, 2  ;;  %v628_v22 = vrot.slane %v1191_v14, 2 }
  0x1f   : > { %v629_v23 = vrot.slane %v1193_v15, 2  ;;  %v827_v24 = vrot.slane %v1244_v16, 2  ;;  %v828_v25 = vrot.slane %v1246_v17, 2 }
  0x20   : > { %1279 = vmatpush3.bf16.msra.mxu0 %v1391_v26  ;;  %v824_v26 = vrot.slane %v1243_v18, 2 }
  0x21   : > { %1301 = vmatpush3.bf16.msra.mxu1 %v1392_v27  ;;  %1280 = vmatprep.subr.bf16.mxu0 %v1393_v28  ;;  %v825_v27 = vrot.slane %v1245_v19, 2  ;;  %v633_v28 = vsel %vm627_vm0, %v631_v20, %v632_v21 }
  0x22   : > { %1302 = vmatprep.subr.bf16.mxu1 %v1394_v29  ;;  %v630_v29 = vsel %vm627_vm0, %v628_v22, %v629_v23  ;;  %v1002_v22 = vld [vmem:[%s1737_s3] sm:$0xff]  ;;  %v1003_v23 = vld [vmem:[%s1737_s3 + $0x8] sm:$0xff] }
  0x24   : > { %1281 = vmatpush3.bf16.msra.mxu0 %v1395_v30  ;;  %v829_v30 = vsel %vm627_vm0, %v827_v24, %v828_v25 }
  0x25   : > { %1303 = vmatpush3.bf16.msra.mxu1 %v1396_v31  ;;  %1310 = vmatprep.subr.bf16.mxu0 %v1401_v40  ;;  %v826_v31 = vsel %vm627_vm0, %v824_v26, %v825_v27 }
  0x26   : > { %1332 = vmatprep.subr.bf16.mxu1 %v1402_v41 }
  0x27   : > { %423 = vmatmul.mubr.bf16.vlgmr.msra.gmra.mrb[0].mxu0 %v1123_v35 }
  0x28   : > { %570 = vmatmul.mubr.bf16.vlgmr.msra.gmra.mrb[0].mxu1 %v1141_v38  ;;  %1311 = vmatpush3.bf16.msra.mxu0 %v1403_v42 }
  0x29   : > { %1333 = vmatpush3.bf16.msra.mxu1 %v1404_v43  ;;  %1312 = vmatprep.subr.bf16.mxu0 %v1405_v44 }
  0x2a   : > { %1334 = vmatprep.subr.bf16.mxu1 %v1406_v45  ;;  %764 = vmatprep.mubr.bf16.mxu0 %v633_v28 }
  0x2b   : > { %960 = vmatprep.mubr.bf16.mxu1 %v829_v30 }
  0x2c   : > { %1313 = vmatpush3.bf16.msra.mxu0 %v1407_v46 }
  0x2d   : > { %1335 = vmatpush3.bf16.msra.mxu1 %v1408_v47  ;;  %1314 = vmatprep.subr.bf16.mxu0 %v1409_v48 }
  0x2e   : > { %1336 = vmatprep.subr.bf16.mxu1 %v1410_v49 }
  0x30   : > { %1315 = vmatpush3.bf16.msra.mxu0 %v1411_v50 }
  0x31   : > { %1337 = vmatpush3.bf16.msra.mxu1 %v1412_v51  ;;  %1316 = vmatprep.subr.bf16.mxu0 %v1413_v52 }
  0x32   : > { %1338 = vmatprep.subr.bf16.mxu1 %v1414_v53 }
  0x34   : > { %1317 = vmatpush3.bf16.msra.mxu0 %v1415_v54 }
  0x35   : > { %1339 = vmatpush3.bf16.msra.mxu1 %v1416_v55  ;;  %1318 = vmatprep.subr.bf16.mxu0 %v1417_v56 }
  0x36   : > { %1340 = vmatprep.subr.bf16.mxu1 %v1418_v57 }
  0x38   : > { %1319 = vmatpush3.bf16.msra.mxu0 %v1419_v58 }
  0x39   : > { %1341 = vmatpush3.bf16.msra.mxu1 %v1420_v59  ;;  %1320 = vmatprep.subr.bf16.mxu0 %v1421_v60 }
  0x3a   : > { %1342 = vmatprep.subr.bf16.mxu1 %v1422_v61 }
  0x3c   : > { %1321 = vmatpush3.bf16.msra.mxu0 %v1423_v62 }
  0x3d   : > { %1343 = vmatpush3.bf16.msra.mxu1 %v1424_v63  ;;  %1322 = vmatprep.subr.bf16.mxu0 %v1425_v0 }
  0x3e   : > { %1344 = vmatprep.subr.bf16.mxu1 %v1426_v1 }
  0x40   : > { %1323 = vmatpush3.bf16.msra.mxu0 %v1427_v2 }
  0x41   : > { %1345 = vmatpush3.bf16.msra.mxu1 %v1428_v3  ;;  %1324 = vmatprep.subr.bf16.mxu0 %v1429_v4 }
  0x42   : > { %1346 = vmatprep.subr.bf16.mxu1 %v1430_v5 }
  0x44   : > { %1325 = vmatpush3.bf16.msra.mxu0 %v1431_v6 }
  0x45   : > { %1347 = vmatpush3.bf16.msra.mxu1 %v1432_v7 }
  0x47   : > { %765 = vmatmul.mubr.bf16.vlgmr.msra.gmra.mrb[4].mxu0 %v630_v29 }
  0x48   : > { %961 = vmatmul.mubr.bf16.vlgmr.msra.gmra.mrb[4].mxu1 %v826_v31 }
  0xfa   : > { %v1282_v32 = vpop.f32.mrb[0].mxu0 }
  0xfb   : > { %v1304_v33 = vpop.f32.mrb[0].mxu1  ;;  %v1283_v34 = vpop.f32.mrb[1].mxu0 }
  0xfc   : > { %v1284_v35 = vadd.f32 %v1283_v34, %v1282_v32  ;;  %v1305_v36 = vpop.f32.mrb[1].mxu1  ;;  %v1285_v37 = vpop.f32.mrb[2].mxu0 }
  0xfd   : > { %v1306_v38 = vadd.f32 %v1305_v36, %v1304_v33  ;;  %v1307_v39 = vpop.f32.mrb[2].mxu1  ;;  %v1286_v40 = vpop.f32.mrb[3].mxu0 }
  0xfe   : > { %v1287_v41 = vadd.f32 %v1286_v40, %v1285_v37  ;;  %v1308_v42 = vpop.f32.mrb[3].mxu1 }
  0xff   : > { %v572_v43 = vadd.f32 %v1306_v38, %v1284_v35  ;;  %v1309_v44 = vadd.f32 %v1308_v42, %v1307_v39 }
 0x101   : > { %v575_v45 = vadd.f32 %v1309_v44, %v1287_v41 }
 0x11a   : > { %v1326_v46 = vpop.f32.mrb[4].mxu0 }
 0x11b   : > { %v1348_v47 = vpop.f32.mrb[4].mxu1  ;;  %v1327_v48 = vpop.f32.mrb[5].mxu0 }
 0x11c   : > { %v1328_v49 = vadd.f32 %v1327_v48, %v1326_v46  ;;  %v1349_v50 = vpop.f32.mrb[5].mxu1  ;;  %v1329_v51 = vpop.f32.mrb[6].mxu0 }
 0x11d   : > { %v1350_v52 = vadd.f32 %v1349_v50, %v1348_v47  ;;  %v1351_v53 = vpop.f32.mrb[6].mxu1  ;;  %v1330_v54 = vpop.f32.mrb[7].mxu0 }
 0x11e   : > { %v773_v55 = vadd.f32 %v1328_v49, %v572_v43  ;;  %v1331_v56 = vadd.f32 %v1330_v54, %v1329_v51  ;;  %v1352_v57 = vpop.f32.mrb[7].mxu1 }
 0x11f   : > { %v1353_v58 = vadd.f32 %v1352_v57, %v1351_v53 }
 0x120   : > { %v969_v59 = vadd.f32 %v1350_v52, %v773_v55  ;;  %v774_v60 = vadd.f32 %v1331_v56, %v575_v45 }
 0x122   : > { %v970_v61 = vadd.f32 %v1353_v58, %v774_v60 }
 0x124   : > { %v971_v62 = vadd.f32 %v970_v61, %v969_v59 }
 0x126   : > { %v972_v63 = vrot.slane %v971_v62, 4 }
 0x128   : > { %v973_v0 = vadd.f32 %v972_v63, %v971_v62 }
 0x12a   : > { %v974_v1 = vrot.slane %v973_v0, 2 }
 0x12c   : > { %v975_v2 = vadd.f32 %v974_v1, %v973_v0 }
 0x12e   : > { %v976_v3 = vrot.slane %v975_v2, 1 }
 0x130   : > { %v977_v4 = vadd.f32 %v976_v3, %v975_v2 }
 0x132   : > { %v979_v5 = vmul.f32 0.0625, %v977_v4 }
 0x134   : > { %v980_v6 = vsub.f32 %v969_v59, %v979_v5  ;;  %v981_v7 = vsub.f32 %v970_v61, %v979_v5 }
 0x136   : > { %v982_v8 = vmul.f32 %v980_v6, %v980_v6  ;;  %v983_v9 = vmul.f32 %v981_v7, %v981_v7 }
 0x138   : > { %v984_v10 = vadd.f32 %v983_v9, %v982_v8 }
 0x13a   : > { %v985_v11 = vrot.slane %v984_v10, 4 }
 0x13c   : > { %v986_v12 = vadd.f32 %v985_v11, %v984_v10 }
 0x13e   : > { %v987_v13 = vrot.slane %v986_v12, 2 }
 0x140   : > { %v988_v14 = vadd.f32 %v987_v13, %v986_v12 }
 0x142   : > { %v989_v15 = vrot.slane %v988_v14, 1 }
 0x144   : > { %v990_v16 = vadd.f32 %v989_v15, %v988_v14 }
 0x146   : > { %v991_v17 = vmul.f32 0.0625, %v990_v16 }
 0x148   : > { %v992_v18 = vadd.f32 1e-05, %v991_v17 }
 0x14a   : > { %1441 = vrsqrt.f32 %v992_v18 }
 0x154   : > { %v1442_v19 = vpop.eup %1441 }
 0x155   : > { %v995_v20 = vmul.f32 %v1442_v19, %v981_v7  ;;  %v994_v21 = vmul.f32 %v1442_v19, %v980_v6 }
 0x157   : > { %vm996_vm1 = vcmp.ge.f32.partialorder %v994_v21, 0.0  ;;  %vm997_vm2 = vcmp.ge.f32.partialorder %v995_v20, 0.0  ;;  %v998_v24 = vmul.f32 0.2, %v994_v21  ;;  %v999_v25 = vmul.f32 0.2, %v995_v20 }
 0x159   : > { %v1000_v26 = vsel %vm996_vm1, %v994_v21, %v998_v24  ;;  %v1001_v27 = vsel %vm997_vm2, %v995_v20, %v999_v25 }
 0x15a   : > { %v1004_v28 = vmul.f32 %v1002_v22, %v1000_v26  ;;  %v1005_v29 = vmul.f32 %v1003_v23, %v1001_v27 }
 0x15c   : > { %v1006_v30 = vadd.f32 %v1005_v29, %v1004_v28 }
 0x15e   : > { %1007 = vadd.xlane.f32.xlu0 %v1006_v30 }
 0x1eb   : > { %v1008_v31 = vpop.xlane.xlu0 %1007 }
 0x1ec   : > { %v1009_v32 = vrot.slane %v1008_v31, 4 }
 0x1ee   : > { %v1010_v33 = vadd.f32 %v1009_v32, %v1008_v31 }
 0x1f0   : > { %v1011_v34 = vrot.slane %v1010_v33, 2 }
 0x1f2   : > { %v1012_v35 = vadd.f32 %v1011_v34, %v1010_v33 }
 0x1f4   : > { %v1013_v36 = vrot.slane %v1012_v35, 1 }
 0x1f6   : > { %v1014_v37 = vadd.f32 %v1013_v36, %v1012_v35 }
 0x1f8   : > { %1355 = vpush %v1014_v37 }
 0x229   : > { %s1356_s14 = spop %1355 }
 0x22a   : > { %v1016_v38 = vstv %s1356_s14 }
 0x22b   : > { %v1263_v39 = vmul.f32 -1.442695, %v1016_v38 }
 0x22d   : > { %1443 = vpow2.f32 %v1263_v39 }
 0x237   : > { %v1444_v40 = vpop.eup %1443 }
 0x238   : > { %v1020_v41 = vadd.f32 1.0, %v1444_v40 }
 0x23a   : > { %1445 = vrcp.f32 %v1020_v41 }
 0x244   : > { %v1446_v42 = vpop.eup %1445 }
 0x245   : > { %1024 = vst.msk [vmem:[%s213_s19] sm:$0x1] %vm1023_vm3, %v1446_v42 }
 0x246 PF: > { %s14_s15 = sadd.s32 1, %s1453_s15  }
 0x247   : > { %p11_p4 = scmp.ge.s32.totalorder %s14_s15, 4  }
 0x249   :  { %13 = sbr.rel (!%p11_p4) target bundleno = 1 (0x1), region = 72 }

</bundles_post_ra>
